<compile_context>
chip_gen: v6e
topology: v6e:2x2x1
jax: 0.10.0
libtpu: 0.0.40
codegen_flags: <defaults>
</compile_context>

<pallas_src>
import math

import jax
import jax.numpy as jnp
from jax import lax
from jax.experimental import pallas as pl
from jax.experimental.pallas import tpu as pltpu

# ---- model dimensions (from TrajectoryGAT) ----
D_IN = 9      # input node-feature dim
H = 128       # hidden dim
C = 2         # output classes
N = 16        # nodes per batch element (example graphs)
G = 2         # graphs per batch element (example)

# ---- kernel tiling ----
TB = 16               # batch elements folded into one grid step (super-graph TB*N nodes)
AUG = H + 128         # augmented weight width: [W | W@a_dst^T | W@a_src^T | zero pad]
MXU_DTYPE = jnp.bfloat16   # bf16 is MXU-native on v5e, v6e and v7x


def _gat_layer(h_in, w_aug, b, adj):
    """Dense single-head GATConv over one block-diagonal super-graph.

    h_in : (TBN, Fin) f32 node features
    w_aug: (Fin, AUG) bf16 -- cols [:H] = W, col H = W@a_dst^T, col H+1 = W@a_src^T
    b    : (1, H) f32 bias
    adj  : (TBN, TBN) f32 with adj[i, j] = 1 iff edge j -> i (self-loops included)
    """
    # One fused MXU pass: transformed features AND both attention scores.
    out = jnp.dot(h_in.astype(MXU_DTYPE), w_aug, preferred_element_type=jnp.float32)
    h = out[:, :H]                                   # (TBN, H)
    s = out[:, H:H + 2]                              # (TBN, 2): [dst, src] scores

    # e[i, j] = s_dst[i] + s_src[j] via a single rank-2 MXU matmul:
    #   [s_dst, 1] @ [1, s_src]^T  (avoids a (TBN,1)->(1,TBN) transpose).
    col = lax.broadcasted_iota(jnp.int32, s.shape, 1)
    u = jnp.where(col == 0, s, 1.0)                  # columns [s_dst, 1]
    v = jnp.where(col == 1, s, 1.0)                  # columns [1, s_src]
    e = lax.dot_general(u, v, (((1,), (1,)), ((), ())),
                        preferred_element_type=jnp.float32)       # (TBN, TBN)

    e = jnp.where(e >= 0, e, 0.2 * e)                # LeakyReLU(0.2)
    e = jnp.where(adj > 0, e, -1e30)                 # mask non-edges (keep f32!)
    m = jnp.max(e, axis=1, keepdims=True)            # XLU row-max
    p = jnp.exp(e - m)                               # masked entries underflow to 0
    denom = jnp.sum(p, axis=1, keepdims=True)        # XLU row-sum (not MXU p@ones)
    # Unnormalized aggregation on the bf16-native MXU; one EUP reciprocal to normalize.
    aggr = jnp.dot(p.astype(MXU_DTYPE), h.astype(MXU_DTYPE),
                   preferred_element_type=jnp.float32)            # (TBN, H)
    return aggr * pl.reciprocal(denom, approx=True) + b


def trajectory_gat_kernel(x_ref, adj_ref, pool_ref, w1_ref, w2_ref, wc_ref, pv_ref,
                          out_ref):
    tbn = adj_ref.shape[0]
    pv = pv_ref[...]                      # packed biases: one DMA instead of three
    b1 = pv[0:1, :]
    b2 = pv[1:2, :]
    bc = pv[2:3, 0:C]

    adj = adj_ref[...]                    # (TBN, 2*TBN) = [adj_spatial | adj_temporal]
    adj_s = adj[:, :tbn]
    adj_t = adj[:, tbn:]

    # spatial GAT + ReLU
    h1 = jnp.maximum(_gat_layer(x_ref[...], w1_ref[...], b1, adj_s), 0.0)
    # temporal GAT
    h2 = _gat_layer(h1, w2_ref[...], b2, adj_t)
    # global mean pool via block-diagonal row-normalized pooling matrix
    pooled = jnp.dot(pool_ref[...].astype(MXU_DTYPE), h2.astype(MXU_DTYPE),
                     preferred_element_type=jnp.float32)          # (TB*G, H)
    # classifier + log_softmax
    logits = jnp.dot(pooled.astype(MXU_DTYPE), wc_ref[...],
                     preferred_element_type=jnp.float32) + bc     # (TB*G, C)
    z = logits - jnp.max(logits, axis=-1, keepdims=True)
    out_ref[...] = z - jnp.log(jnp.sum(jnp.exp(z), axis=-1, keepdims=True))


# ------------------------------ host-side packing ------------------------------
def _block_diag(a, tb):
    """(B, R, Cc) -> (B//tb, tb*R, tb*Cc) block-diagonal batches."""
    b, r, c = a.shape
    nb = b // tb
    a4 = a.reshape(nb, tb, r, c)
    eye = jnp.eye(tb, dtype=a.dtype)
    out = a4[:, :, None, :, :] * eye[None, :, :, None, None]      # (nb, tb, tb, r, c)
    return out.transpose(0, 1, 3, 2, 4).reshape(nb, tb * r, tb * c)


def _augment_weight(w, a_dst, a_src):
    """bf16 [W | W@a_dst^T | W@a_src^T | 0-pad] of width AUG (lane-tile aligned)."""
    c_dst = w @ a_dst.T                                # (Fin, 1)
    c_src = w @ a_src.T
    pad = jnp.zeros((w.shape[0], AUG - H - 2), w.dtype)
    return jnp.concatenate([w, c_dst, c_src, pad], axis=1).astype(MXU_DTYPE)


def _pack_small_params(params):
    """Pack b1, b2, bc into one (8, H) f32 slab (single sub-vreg DMA)."""
    pv = jnp.zeros((8, H), jnp.float32)
    pv = pv.at[0, :].set(params["b1"].reshape(-1))
    pv = pv.at[1, :].set(params["b2"].reshape(-1))
    pv = pv.at[2, :C].set(params["bc"].reshape(-1))
    return pv


def trajectory_gat(x, adj_s, adj_t, pool, params, tb=TB):
    """x: (B, N, D_IN) f32, adj_*: (B, N, N) {0,1} (adj[i,j]=1 iff edge j->i, self-loops
    included), pool: (B, G, N) row-normalized mean-pool matrix. Returns (B, G, C)."""
    b_sz, n, d_in = x.shape
    g = pool.shape[1]

    # Keep >= 2 grid steps when possible so both v7x TensorCores get work.
    tb = int(max(1, min(tb, -(-b_sz // 2))))
    nb = -(-b_sz // tb)
    b_pad = nb * tb
    if b_pad != b_sz:                      # pad batch to a multiple of tb (discarded later)
        pad = b_pad - b_sz
        zf = lambda a: jnp.concatenate(
            [a, jnp.zeros((pad,) + a.shape[1:], a.dtype)], axis=0)
        x, adj_s, adj_t, pool = zf(x), zf(adj_s), zf(adj_t), zf(pool)

    tbn, tbg = tb * n, tb * g
    # TB elements per grid step as one block-diagonal "super-graph"; both adjacencies
    # fused into a single lane-concatenated slab (one DMA instead of two).
    adj_pack = jnp.concatenate(
        [_block_diag(adj_s, tb), _block_diag(adj_t, tb)], axis=2
    ).reshape(nb * tbn, 2 * tbn)
    pool_bd = _block_diag(pool, tb).reshape(nb * tbg, tbn)
    x2 = x.reshape(b_pad * n, d_in)

    w1_aug = _augment_weight(params["w1"], params["a1_dst"], params["a1_src"])
    w2_aug = _augment_weight(params["w2"], params["a2_dst"], params["a2_src"])
    wc = params["wc"].astype(MXU_DTYPE)
    pv = _pack_small_params(params)

    grid_spec = pltpu.PrefetchScalarGridSpec(
        num_scalar_prefetch=0,
        grid=(nb,),
        in_specs=[
            pl.BlockSpec((tbn, d_in), lambda b: (b, 0)),        # node features
            pl.BlockSpec((tbn, 2 * tbn), lambda b: (b, 0)),     # [adj_s | adj_t]
            pl.BlockSpec((tbg, tbn), lambda b: (b, 0)),         # pooling matrix
            pl.BlockSpec(w1_aug.shape, lambda b: (0, 0)),       # shared weights:
            pl.BlockSpec(w2_aug.shape, lambda b: (0, 0)),       #   constant index_map
            pl.BlockSpec(wc.shape, lambda b: (0, 0)),           #   -> fetched once
            pl.BlockSpec((8, H), lambda b: (0, 0)),             # packed biases
        ],
        out_specs=pl.BlockSpec((tbg, C), lambda b: (b, 0)),
    )
    out2 = pl.pallas_call(
        trajectory_gat_kernel,
        out_shape=jax.ShapeDtypeStruct((nb * tbg, C), jnp.float32),
        grid_spec=grid_spec,
        compiler_params=pltpu.CompilerParams(
            dimension_semantics=("parallel",)),
    )(x2, adj_pack, pool_bd, w1_aug, w2_aug, wc, pv)
    return out2.reshape(b_pad, g, C)[:b_sz]


# -------- pure-JAX reference (model math; bf16 weights for the linear maps) --------
def _ref_gat(h_in, w, a_src, a_dst, b, adj):
    h = jnp.dot(h_in.astype(MXU_DTYPE), w.astype(MXU_DTYPE),
                preferred_element_type=jnp.float32)
    e = (h @ a_dst.T) + (h @ a_src.T).T
    e = jnp.where(e >= 0, e, 0.2 * e)
    e = jnp.where(adj > 0, e, -jnp.inf)
    alpha = jax.nn.softmax(e, axis=1)
    return alpha @ h + b


def _ref_single(x, adj_s, adj_t, pool, p):
    h1 = jnp.maximum(
        _ref_gat(x, p["w1"], p["a1_src"], p["a1_dst"], p["b1"], adj_s), 0.0)
    h2 = _ref_gat(h1, p["w2"], p["a2_src"], p["a2_dst"], p["b2"], adj_t)
    pooled = pool @ h2
    logits = jnp.dot(pooled.astype(MXU_DTYPE), p["wc"].astype(MXU_DTYPE),
                     preferred_element_type=jnp.float32) + p["bc"]
    return jax.nn.log_softmax(logits, axis=-1)


def trajectory_gat_ref(x, adj_s, adj_t, pool, params):
    return jax.vmap(_ref_single, in_axes=(0, 0, 0, 0, None))(x, adj_s, adj_t, pool, params)


def _xavier(key, shape):
    fan_in, fan_out = shape[-2], shape[-1]
    bound = math.sqrt(6.0 / (fan_in + fan_out))
    return jax.random.uniform(key, shape, jnp.float32, -bound, bound)


if __name__ == "__main__":
    key = jax.random.PRNGKey(0)
    ks = jax.random.split(key, 8)

    # parameters: GATConv(9,128), GATConv(128,128), Linear(128,2); biases init to 0
    params = dict(
        w1=_xavier(ks[0], (D_IN, H)),
        a1_src=_xavier(ks[1], (1, H)),
        a1_dst=_xavier(ks[2], (1, H)),
        b1=jnp.zeros((1, H), jnp.float32),
        w2=_xavier(ks[3], (H, H)),
        a2_src=_xavier(ks[4], (1, H)),
        a2_dst=_xavier(ks[5], (1, H)),
        b2=jnp.zeros((1, H), jnp.float32),
        wc=_xavier(ks[6], (H, C)),
        bc=jnp.zeros((1, C), jnp.float32),
    )

    B = 32    # batch elements -> grid of 2 steps of TB=16 super-graphs (256 nodes each)
    x = jax.random.normal(ks[7], (B, N, D_IN), jnp.float32)

    # per-element graph structure: first 8 nodes -> graph 0, last 8 -> graph 1
    nodes_per_graph = N // G
    batch = [i // nodes_per_graph for i in range(N)]
    adj_s1 = [[0.0] * N for _ in range(N)]
    adj_t1 = [[0.0] * N for _ in range(N)]
    for i in range(N):
        adj_s1[i][i] = 1.0
        adj_t1[i][i] = 1.0
        for j in range(N):
            if batch[i] != batch[j] or i == j:
                continue
            if abs(i - j) == 1:      # spatial: chain neighbors
                adj_s1[i][j] = 1.0
            if abs(i - j) == 2:      # temporal: skip-1 neighbors
                adj_t1[i][j] = 1.0
    adj_s1 = jnp.array(adj_s1, jnp.float32)
    adj_t1 = jnp.array(adj_t1, jnp.float32)
    pool1 = jnp.array([[1.0 / nodes_per_graph if batch[nn] == gg else 0.0
                        for nn in range(N)] for gg in range(G)], jnp.float32)

    adj_s = jnp.tile(adj_s1[None], (B, 1, 1))
    adj_t = jnp.tile(adj_t1[None], (B, 1, 1))
    pool = jnp.tile(pool1[None], (B, 1, 1))

    out = jax.block_until_ready(trajectory_gat(x, adj_s, adj_t, pool, params))
    ref = jax.block_until_ready(trajectory_gat_ref(x, adj_s, adj_t, pool, params))

    # bf16-fed MXU matmuls + fused bf16 score columns (kernel) vs the f32-score /
    # f32-aggregation reference -> allow ~1e-2 drift on the 2-class log-probs.
    if not jnp.allclose(out, ref, atol=1e-2, rtol=1e-2):
        err = float(jnp.max(jnp.abs(out - ref)))
        raise AssertionError(f"kernel/reference mismatch (max abs err = {err})")
    print("KERNEL_OK")
</pallas_src>

<mosaic_0001>
module attributes {stable_mosaic.version = 11 : i64} {
  func.func @trajectory_gat_kernel(%arg0: i32, %arg1: memref<256x9xf32, #tpu.memory_space<vmem>>, %arg2: memref<256x512xf32, #tpu.memory_space<vmem>>, %arg3: memref<32x256xf32, #tpu.memory_space<vmem>>, %arg4: memref<9x256xbf16, #tpu.memory_space<vmem>>, %arg5: memref<128x256xbf16, #tpu.memory_space<vmem>>, %arg6: memref<128x2xbf16, #tpu.memory_space<vmem>>, %arg7: memref<8x128xf32, #tpu.memory_space<vmem>>, %arg8: memref<32x2xf32, #tpu.memory_space<vmem>>) attributes {dimension_semantics = [#tpu.dimension_semantics<parallel>], iteration_bounds = array<i64: 2>, scalar_prefetch = 0 : i64, scratch_operands = 0 : i64, tpu.core_type = #tpu.core_type<tc>, window_params = [{transform_indices = @transform_0, window_bounds = array<i64: 256, 9>}, {transform_indices = @transform_1, window_bounds = array<i64: 256, 512>}, {transform_indices = @transform_2, window_bounds = array<i64: 32, 256>}, {pipeline_mode = #tpu.pipeline_mode<synchronous>, transform_indices = @transform_3, window_bounds = array<i64: 9, 256>}, {pipeline_mode = #tpu.pipeline_mode<synchronous>, transform_indices = @transform_4, window_bounds = array<i64: 128, 256>}, {pipeline_mode = #tpu.pipeline_mode<synchronous>, transform_indices = @transform_5, window_bounds = array<i64: 128, 2>}, {pipeline_mode = #tpu.pipeline_mode<synchronous>, transform_indices = @transform_6, window_bounds = array<i64: 8, 128>}, {transform_indices = @transform_7, window_bounds = array<i64: 32, 2>}]} {
    %c0 = arith.constant 0 : index
    %c0_0 = arith.constant 0 : index
    %0 = vector.load %arg7[%c0, %c0_0] : memref<8x128xf32, #tpu.memory_space<vmem>>, vector<8x128xf32>
    %1 = vector.extract_strided_slice %0 {offsets = [0, 0], sizes = [1, 128], strides = [1, 1]} : vector<8x128xf32> to vector<1x128xf32>
    %2 = vector.extract_strided_slice %0 {offsets = [1, 0], sizes = [1, 128], strides = [1, 1]} : vector<8x128xf32> to vector<1x128xf32>
    %3 = vector.extract_strided_slice %0 {offsets = [2, 0], sizes = [1, 2], strides = [1, 1]} : vector<8x128xf32> to vector<1x2xf32>
    %c0_1 = arith.constant 0 : index
    %c0_2 = arith.constant 0 : index
    %4 = vector.load %arg2[%c0_1, %c0_2] : memref<256x512xf32, #tpu.memory_space<vmem>>, vector<256x512xf32>
    %5 = vector.extract_strided_slice %4 {offsets = [0, 0], sizes = [256, 256], strides = [1, 1]} : vector<256x512xf32> to vector<256x256xf32>
    %6 = vector.extract_strided_slice %4 {offsets = [0, 256], sizes = [256, 256], strides = [1, 1]} : vector<256x512xf32> to vector<256x256xf32>
    %c0_3 = arith.constant 0 : index
    %c0_4 = arith.constant 0 : index
    %7 = vector.load %arg1[%c0_3, %c0_4] : memref<256x9xf32, #tpu.memory_space<vmem>>, vector<256x9xf32>
    %c0_5 = arith.constant 0 : index
    %c0_6 = arith.constant 0 : index
    %8 = vector.load %arg4[%c0_5, %c0_6] : memref<9x256xbf16, #tpu.memory_space<vmem>>, vector<9x256xbf16>
    %9 = arith.truncf %7 : vector<256x9xf32> to vector<256x9xbf16>
    %cst = arith.constant dense<0.000000e+00> : vector<256x256xf32>
    %10 = tpu.matmul %9, %8, %cst {dimension_numbers = #tpu.dot_dimension_numbers<[1], [0], [0], [1], [0, 0, 1, 1], [], []>} : vector<256x9xbf16>, vector<9x256xbf16>, vector<256x256xf32> -> vector<256x256xf32>
    %11 = vector.extract_strided_slice %10 {offsets = [0, 0], sizes = [256, 128], strides = [1, 1]} : vector<256x256xf32> to vector<256x128xf32>
    %12 = vector.extract_strided_slice %10 {offsets = [0, 128], sizes = [256, 2], strides = [1, 1]} : vector<256x256xf32> to vector<256x2xf32>
    %13 = tpu.iota {dimensions = array<i32: 1>} : vector<256x2xi32>
    %c0_i32 = arith.constant 0 : i32
    %14 = vector.broadcast %c0_i32 : i32 to vector<256x2xi32>
    %15 = arith.cmpi eq, %13, %14 : vector<256x2xi32>
    %cst_7 = arith.constant 1.000000e+00 : f32
    %16 = vector.broadcast %cst_7 : f32 to vector<256x2xf32>
    %17 = arith.select %15, %12, %16 : vector<256x2xi1>, vector<256x2xf32>
    %c1_i32 = arith.constant 1 : i32
    %18 = vector.broadcast %c1_i32 : i32 to vector<256x2xi32>
    %19 = arith.cmpi eq, %13, %18 : vector<256x2xi32>
    %cst_8 = arith.constant 1.000000e+00 : f32
    %20 = vector.broadcast %cst_8 : f32 to vector<256x2xf32>
    %21 = arith.select %19, %12, %20 : vector<256x2xi1>, vector<256x2xf32>
    %cst_9 = arith.constant dense<0.000000e+00> : vector<256x256xf32>
    %22 = tpu.matmul %17, %21, %cst_9 {dimension_numbers = #tpu.dot_dimension_numbers<[1], [1], [0], [0], [0, 0, 1, 0], [], []>} : vector<256x2xf32>, vector<256x2xf32>, vector<256x256xf32> -> vector<256x256xf32>
    %cst_10 = arith.constant 0.000000e+00 : f32
    %23 = vector.broadcast %cst_10 : f32 to vector<256x256xf32>
    %24 = arith.cmpf oge, %22, %23 : vector<256x256xf32>
    %cst_11 = arith.constant 2.000000e-01 : f32
    %25 = vector.broadcast %cst_11 : f32 to vector<256x256xf32>
    %26 = arith.mulf %25, %22 : vector<256x256xf32>
    %27 = arith.select %24, %22, %26 : vector<256x256xi1>, vector<256x256xf32>
    %cst_12 = arith.constant 0.000000e+00 : f32
    %28 = vector.broadcast %cst_12 : f32 to vector<256x256xf32>
    %29 = arith.cmpf ogt, %5, %28 : vector<256x256xf32>
    %cst_13 = arith.constant -1.000000e+30 : f32
    %30 = vector.broadcast %cst_13 : f32 to vector<256x256xf32>
    %31 = arith.select %29, %27, %30 : vector<256x256xi1>, vector<256x256xf32>
    %cst_14 = arith.constant dense<0xFF800000> : vector<256xf32>
    %32 = vector.multi_reduction <maximumf>, %31, %cst_14 [1] : vector<256x256xf32> to vector<256xf32>
    %33 = vector.shape_cast %32 : vector<256xf32> to vector<256x1xf32>
    %34 = vector.broadcast %33 : vector<256x1xf32> to vector<256x256xf32>
    %35 = arith.subf %31, %34 : vector<256x256xf32>
    %36 = math.exp %35 : vector<256x256xf32>
    %cst_15 = arith.constant dense<0.000000e+00> : vector<256xf32>
    %37 = vector.multi_reduction <add>, %36, %cst_15 [1] : vector<256x256xf32> to vector<256xf32>
    %38 = vector.shape_cast %37 : vector<256xf32> to vector<256x1xf32>
    %39 = arith.truncf %36 : vector<256x256xf32> to vector<256x256xbf16>
    %40 = arith.truncf %11 : vector<256x128xf32> to vector<256x128xbf16>
    %cst_16 = arith.constant dense<0.000000e+00> : vector<256x128xf32>
    %41 = tpu.matmul %39, %40, %cst_16 {dimension_numbers = #tpu.dot_dimension_numbers<[1], [0], [0], [1], [0, 0, 1, 1], [], []>} : vector<256x256xbf16>, vector<256x128xbf16>, vector<256x128xf32> -> vector<256x128xf32>
    %42 = tpu.reciprocal %38 {approx = true} : vector<256x1xf32> -> vector<256x1xf32>
    %43 = vector.broadcast %42 : vector<256x1xf32> to vector<256x128xf32>
    %44 = arith.mulf %41, %43 : vector<256x128xf32>
    %45 = vector.broadcast %1 : vector<1x128xf32> to vector<256x128xf32>
    %46 = arith.addf %44, %45 : vector<256x128xf32>
    %cst_17 = arith.constant 0.000000e+00 : f32
    %47 = vector.broadcast %cst_17 : f32 to vector<256x128xf32>
    %48 = arith.maximumf %46, %47 : vector<256x128xf32>
    %c0_18 = arith.constant 0 : index
    %c0_19 = arith.constant 0 : index
    %49 = vector.load %arg5[%c0_18, %c0_19] : memref<128x256xbf16, #tpu.memory_space<vmem>>, vector<128x256xbf16>
    %50 = arith.truncf %48 : vector<256x128xf32> to vector<256x128xbf16>
    %cst_20 = arith.constant dense<0.000000e+00> : vector<256x256xf32>
    %51 = tpu.matmul %50, %49, %cst_20 {dimension_numbers = #tpu.dot_dimension_numbers<[1], [0], [0], [1], [0, 0, 1, 1], [], []>} : vector<256x128xbf16>, vector<128x256xbf16>, vector<256x256xf32> -> vector<256x256xf32>
    %52 = vector.extract_strided_slice %51 {offsets = [0, 0], sizes = [256, 128], strides = [1, 1]} : vector<256x256xf32> to vector<256x128xf32>
    %53 = vector.extract_strided_slice %51 {offsets = [0, 128], sizes = [256, 2], strides = [1, 1]} : vector<256x256xf32> to vector<256x2xf32>
    %54 = tpu.iota {dimensions = array<i32: 1>} : vector<256x2xi32>
    %c0_i32_21 = arith.constant 0 : i32
    %55 = vector.broadcast %c0_i32_21 : i32 to vector<256x2xi32>
    %56 = arith.cmpi eq, %54, %55 : vector<256x2xi32>
    %cst_22 = arith.constant 1.000000e+00 : f32
    %57 = vector.broadcast %cst_22 : f32 to vector<256x2xf32>
    %58 = arith.select %56, %53, %57 : vector<256x2xi1>, vector<256x2xf32>
    %c1_i32_23 = arith.constant 1 : i32
    %59 = vector.broadcast %c1_i32_23 : i32 to vector<256x2xi32>
    %60 = arith.cmpi eq, %54, %59 : vector<256x2xi32>
    %cst_24 = arith.constant 1.000000e+00 : f32
    %61 = vector.broadcast %cst_24 : f32 to vector<256x2xf32>
    %62 = arith.select %60, %53, %61 : vector<256x2xi1>, vector<256x2xf32>
    %cst_25 = arith.constant dense<0.000000e+00> : vector<256x256xf32>
    %63 = tpu.matmul %58, %62, %cst_25 {dimension_numbers = #tpu.dot_dimension_numbers<[1], [1], [0], [0], [0, 0, 1, 0], [], []>} : vector<256x2xf32>, vector<256x2xf32>, vector<256x256xf32> -> vector<256x256xf32>
    %cst_26 = arith.constant 0.000000e+00 : f32
    %64 = vector.broadcast %cst_26 : f32 to vector<256x256xf32>
    %65 = arith.cmpf oge, %63, %64 : vector<256x256xf32>
    %cst_27 = arith.constant 2.000000e-01 : f32
    %66 = vector.broadcast %cst_27 : f32 to vector<256x256xf32>
    %67 = arith.mulf %66, %63 : vector<256x256xf32>
    %68 = arith.select %65, %63, %67 : vector<256x256xi1>, vector<256x256xf32>
    %cst_28 = arith.constant 0.000000e+00 : f32
    %69 = vector.broadcast %cst_28 : f32 to vector<256x256xf32>
    %70 = arith.cmpf ogt, %6, %69 : vector<256x256xf32>
    %cst_29 = arith.constant -1.000000e+30 : f32
    %71 = vector.broadcast %cst_29 : f32 to vector<256x256xf32>
    %72 = arith.select %70, %68, %71 : vector<256x256xi1>, vector<256x256xf32>
    %cst_30 = arith.constant dense<0xFF800000> : vector<256xf32>
    %73 = vector.multi_reduction <maximumf>, %72, %cst_30 [1] : vector<256x256xf32> to vector<256xf32>
    %74 = vector.shape_cast %73 : vector<256xf32> to vector<256x1xf32>
    %75 = vector.broadcast %74 : vector<256x1xf32> to vector<256x256xf32>
    %76 = arith.subf %72, %75 : vector<256x256xf32>
    %77 = math.exp %76 : vector<256x256xf32>
    %cst_31 = arith.constant dense<0.000000e+00> : vector<256xf32>
    %78 = vector.multi_reduction <add>, %77, %cst_31 [1] : vector<256x256xf32> to vector<256xf32>
    %79 = vector.shape_cast %78 : vector<256xf32> to vector<256x1xf32>
    %80 = arith.truncf %77 : vector<256x256xf32> to vector<256x256xbf16>
    %81 = arith.truncf %52 : vector<256x128xf32> to vector<256x128xbf16>
    %cst_32 = arith.constant dense<0.000000e+00> : vector<256x128xf32>
    %82 = tpu.matmul %80, %81, %cst_32 {dimension_numbers = #tpu.dot_dimension_numbers<[1], [0], [0], [1], [0, 0, 1, 1], [], []>} : vector<256x256xbf16>, vector<256x128xbf16>, vector<256x128xf32> -> vector<256x128xf32>
    %83 = tpu.reciprocal %79 {approx = true} : vector<256x1xf32> -> vector<256x1xf32>
    %84 = vector.broadcast %83 : vector<256x1xf32> to vector<256x128xf32>
    %85 = arith.mulf %82, %84 : vector<256x128xf32>
    %86 = vector.broadcast %2 : vector<1x128xf32> to vector<256x128xf32>
    %87 = arith.addf %85, %86 : vector<256x128xf32>
    %c0_33 = arith.constant 0 : index
    %c0_34 = arith.constant 0 : index
    %88 = vector.load %arg3[%c0_33, %c0_34] : memref<32x256xf32, #tpu.memory_space<vmem>>, vector<32x256xf32>
    %89 = arith.truncf %88 : vector<32x256xf32> to vector<32x256xbf16>
    %90 = arith.truncf %87 : vector<256x128xf32> to vector<256x128xbf16>
    %cst_35 = arith.constant dense<0.000000e+00> : vector<32x128xf32>
    %91 = tpu.matmul %89, %90, %cst_35 {dimension_numbers = #tpu.dot_dimension_numbers<[1], [0], [0], [1], [0, 0, 1, 1], [], []>} : vector<32x256xbf16>, vector<256x128xbf16>, vector<32x128xf32> -> vector<32x128xf32>
    %92 = arith.truncf %91 : vector<32x128xf32> to vector<32x128xbf16>
    %c0_36 = arith.constant 0 : index
    %c0_37 = arith.constant 0 : index
    %93 = vector.load %arg6[%c0_36, %c0_37] : memref<128x2xbf16, #tpu.memory_space<vmem>>, vector<128x2xbf16>
    %cst_38 = arith.constant dense<0.000000e+00> : vector<32x2xf32>
    %94 = tpu.matmul %92, %93, %cst_38 {dimension_numbers = #tpu.dot_dimension_numbers<[1], [0], [0], [1], [0, 0, 1, 1], [], []>} : vector<32x128xbf16>, vector<128x2xbf16>, vector<32x2xf32> -> vector<32x2xf32>
    %95 = vector.broadcast %3 : vector<1x2xf32> to vector<32x2xf32>
    %96 = arith.addf %94, %95 : vector<32x2xf32>
    %cst_39 = arith.constant dense<0xFF800000> : vector<32xf32>
    %97 = vector.multi_reduction <maximumf>, %96, %cst_39 [1] : vector<32x2xf32> to vector<32xf32>
    %98 = vector.shape_cast %97 : vector<32xf32> to vector<32x1xf32>
    %99 = vector.broadcast %98 : vector<32x1xf32> to vector<32x2xf32>
    %100 = arith.subf %96, %99 : vector<32x2xf32>
    %101 = math.exp %100 : vector<32x2xf32>
    %cst_40 = arith.constant dense<0.000000e+00> : vector<32xf32>
    %102 = vector.multi_reduction <add>, %101, %cst_40 [1] : vector<32x2xf32> to vector<32xf32>
    %103 = vector.shape_cast %102 : vector<32xf32> to vector<32x1xf32>
    %104 = math.log %103 : vector<32x1xf32>
    %105 = vector.broadcast %104 : vector<32x1xf32> to vector<32x2xf32>
    %106 = arith.subf %100, %105 : vector<32x2xf32>
    %c0_41 = arith.constant 0 : index
    %c0_42 = arith.constant 0 : index
    %107 = vector.load %arg8[%c0_41, %c0_42] : memref<32x2xf32, #tpu.memory_space<vmem>>, vector<32x2xf32>
    tpu.vector_store %arg8[%c0_41, %c0_42], %106 {strides = array<i32>} : memref<32x2xf32, #tpu.memory_space<vmem>>, vector<32x2xf32>,
    return
  }
  func.func @transform_0(%arg0: i32) -> (i32, i32) {
    %c0_i32 = arith.constant 0 : i32
    %c0_i32_0 = arith.constant 0 : i32
    return %arg0, %c0_i32 : i32, i32
  }
  func.func @transform_1(%arg0: i32) -> (i32, i32) {
    %c0_i32 = arith.constant 0 : i32
    %c0_i32_0 = arith.constant 0 : i32
    return %arg0, %c0_i32 : i32, i32
  }
  func.func @transform_2(%arg0: i32) -> (i32, i32) {
    %c0_i32 = arith.constant 0 : i32
    %c0_i32_0 = arith.constant 0 : i32
    return %arg0, %c0_i32 : i32, i32
  }
  func.func @transform_3(%arg0: i32) -> (i32, i32) {
    %c0_i32 = arith.constant 0 : i32
    %c0_i32_0 = arith.constant 0 : i32
    %c0_i32_1 = arith.constant 0 : i32
    return %c0_i32, %c0_i32_0 : i32, i32
  }
  func.func @transform_4(%arg0: i32) -> (i32, i32) {
    %c0_i32 = arith.constant 0 : i32
    %c0_i32_0 = arith.constant 0 : i32
    %c0_i32_1 = arith.constant 0 : i32
    return %c0_i32, %c0_i32_0 : i32, i32
  }
  func.func @transform_5(%arg0: i32) -> (i32, i32) {
    %c0_i32 = arith.constant 0 : i32
    %c0_i32_0 = arith.constant 0 : i32
    %c0_i32_1 = arith.constant 0 : i32
    return %c0_i32, %c0_i32_0 : i32, i32
  }
  func.func @transform_6(%arg0: i32) -> (i32, i32) {
    %c0_i32 = arith.constant 0 : i32
    %c0_i32_0 = arith.constant 0 : i32
    %c0_i32_1 = arith.constant 0 : i32
    return %c0_i32, %c0_i32_0 : i32, i32
  }
  func.func @transform_7(%arg0: i32) -> (i32, i32) {
    %c0_i32 = arith.constant 0 : i32
    %c0_i32_0 = arith.constant 0 : i32
    return %arg0, %c0_i32 : i32, i32
  }
}

</mosaic_0001>

<bundles_post_ra>
// kernel: tpu_custom_call.1
= control target key start
LH: loop header
LB: loop body
LE: loop exit
PB: predicated region body
PF: predicated region fallthrough
CT: control target
= control target key end

     0   :  { %12 = vsyncpa [#allocation3], 0  ;;  %s7908_s0 = inlined_call_operand.vmem [shape: f32[512,9], index: 0, kind: input, shape index: {}]   ;;  %s7909_s1 = inlined_call_operand.hbm [shape: f32[512,512], index: 1, kind: input, shape index: {}]   ;;  %s7910_s2 = inlined_call_operand.vmem [shape: f32[64,256], index: 2, kind: input, shape index: {}]   ;;  %s7911_s3 = inlined_call_operand.vmem [shape: bf16[9,256], index: 3, kind: input, shape index: {}]   ;;  %s7912_s4 = inlined_call_operand.vmem [shape: bf16[128,256], index: 4, kind: input, shape index: {}]   ;;  %s7913_s5 = inlined_call_operand.vmem [shape: bf16[128,2], index: 5, kind: input, shape index: {}]   ;;  %s7914_s6 = inlined_call_operand.vmem [shape: f32[8,128], index: 6, kind: input, shape index: {}]   ;;  %s7915_s7 = inlined_call_operand.vmem [shape: f32[64,2], index: 7, kind: output, shape index: {}]  }
   0x1   :  { %14 = vsyncpa [#allocation3 + $0x1], 0  ;;  %s5776_s24 = smov 0   ;;  %s5778_s25 = smov 0  }
   0x2   :  { %s5780_s26 = smov 0   ;;  %s5782_s27 = smov 0  }
   0x3 LB: > { %s5795_s28 = sadd.s32 4294967295, %s5729_s27   ;;  %s5798_s29 = sadd.s32 1, %s5729_s27   ;;  %s5729_s27 = sphi %s5782_s27, %s8074_s27   ;;  %s5725_s26 = sphi %s5780_s26, %s8073_s26   ;;  %s5721_s25 = sphi %s5778_s25, %s8072_s25   ;;  %s5717_s24 = sphi %s5776_s24, %s8071_s24  }
   0x4   : > { %s50_s30 = ssub.s32 %s5729_s27, %s5798_s29  ;;  %s53_s8 = sadd.s32 1, %s5725_s26 }
   0x5   : > { %p51_p0 = scmp.eq.s32.totalorder %s50_s30, 0  ;;  %p60_p1 = scmp.ne.s32.totalorder %s5725_s26, %s5721_s25 }
   0x6   : > { %p61_p2 = scmp.eq.s32.totalorder %s5729_s27, 0  ;;  %p66_p3 = scmp.ne.s32.totalorder %s5721_s25, %s5717_s24 }
   0x7   : > { %s5808_s9 = scalar_select %p51_p0, %s5725_s26, %s53_s8  }
   0x8   : > { %p62_p4 = por %p61_p2, %p60_p1  ;;  %p67_p5 = scmp.eq.s32.totalorder %s5795_s28, 0 }
   0x9   : > { %p5194_p6 = scmp.lt.s32.totalorder %s5729_s27, 2  ;;  %s247_s11 = sand.u32 1, %s5725_s26  }
   0xa   : > { %p5812_p7 = por %p67_p5, %p66_p3  ;;  %s4526_s12 = sshll.u32 %s247_s11, 10 }
   0xb   : > { %s4712_s13 = sshll.u32 %s5729_s27, 14  ;;  %s251_s17 = scalar_lea.vmem [#allocation2], %s4526_s12 }
   0xc   : > { %s7961_s10 = scalar_select %p5812_p7, 1, 0 }
   0xd   : > { %s5821_s16 = scalar_lea.hbm %s7909_s1, %s4712_s13  ;;  %s259_s18 = sshll.u32 %s251_s17, 4  ;;  %s5823_s18 = int_to_ptr.vmem [resolvable:$true] %s259_s18 }
   0xe   : > { %p5825_p8 = pnand %p5194_p6, %p62_p4  ;;  %s5830_s20 = scalar_lea.sflag [#allocation3], %s247_s11 }
   0xf   : > { %s5667_s21 = scalar_lea.hbm %s5821_s16, 16384  ;;  %s5672_s24 = scalar_lea.hbm %s7909_s1, 32768 }
  0x10   : > { %p5668_p10 = scmp.ne.s32.totalorder %s5821_s16, %s5667_s21  ;;  %p5669_p11 = pneg %p5825_p8 }
  0x11   : > { %p5673_p0 = scmp.lt.s32.totalorder %s5821_s16, %s7909_s1  ;;  %p5674_p1 = scmp.lt.s32.totalorder %s5672_s24, %s5667_s21 }
  0x12   : > { %p5670_p12 = pnand %p5669_p11, %p5668_p10 }
  0x13   : > { %p5675_p2 = por %p5674_p1, %p5673_p0 }
  0x14   : > { %p5671_p13 = pneg %p5670_p12 }
  0x16   : > { %p5676_p3 = pnand %p5675_p2, %p5671_p13 }
  0x18   : > { %5679 = shalt.err (!%p5676_p3)
}
  0x19   : > { %s5680_s11 = scalar_lea.vmem %s5823_s18, 16384  ;;  %s5731_s12 = smov [#allocation2]  }
  0x1a   : > { %p5681_p4 = scmp.ne.s32.totalorder %s5823_s18, %s5680_s11  ;;  %s5685_s13 = sshll.u32 %s5731_s12, 4  ;;  %s5686_s13 = int_to_ptr.vmem [resolvable:$false] %s5685_s13 }
  0x1b   : > { %s5687_s14 = scalar_lea.vmem %s5686_s13, 32768  ;;  %p5688_p10 = scmp.lt.s32.totalorder %s5823_s18, %s5686_s13 }
  0x1c   : > { %p5683_p5 = pnand %p5681_p4, %p5669_p11  ;;  %p5689_p12 = scmp.lt.s32.totalorder %s5687_s14, %s5680_s11 }
  0x1e   : > { %p5684_p6 = pneg %p5683_p5  ;;  %p5690_p9 = por %p5689_p12, %p5688_p10 }
  0x20   : > { %p5691_p7 = pnand %p5690_p9, %p5684_p6 }
  0x22   : > { %5694 = shalt.err (!%p5691_p7)
}
  0x23   : > { %s5732_s15 = smov 512   ;;  %s5733_s17 = smov 32  }
  0x24   : > { %5193 = dma.hbm_to_vmem [thread:$0]  (!%p5825_p8), %s5821_s16, 16384, %s5823_s18, %s5830_s20, %s5732_s15, %s5732_s15, %s5733_s17  }
  0x25   : > { %p277_p11 = scmp.lt.s32.totalorder %s5729_s27, 3  ;;  %p7963_p13 = scmp.ge.s32.totalorder %s5729_s27, 1 }
  0x27   : > { %p278_p0 = pnand %p7963_p13, %p277_p11 }
  0x29   : > { %281 = sbr.rel (%p278_p0) target bundleno = 2856 (0xb28), region = 48 }
  0x2e   : > { %s283_s21 = sand.u32 1, %s5721_s25   ;;  %p7964_p7 = scmp.ne.s32.totalorder %s7961_s10, 0 }
  0x2f   : > { %s4531_s22 = sshll.u32 %s283_s21, 10  ;;  %s284_s23 = scalar_lea.sflag [#allocation3], %s283_s21 }
  0x30   : > { %s5855_s24 = scalar_lea.vmem [#allocation2], %s4531_s22 }
  0x31   : > { %5712 = dma.done.wait (%p7964_p7), %s284_s23, 16384  }
  0x32   : > { %5714 = vsyncadd (%p7964_p7), %s284_s23, 4294950912  ;;  %vm586_vm0 = vcmask 1043456   ;;  %s4532_s19 = sshll.u32 %s5795_s28, 5  ;;  %v7918_v0 = vmov 0   ;;  %vm587_vm1 = vcmask 1044480   ;;  %v5735_v1 = vmov 65535  }
  0x33   : > { %628 = vmatprep.mubr.bf16.mxu0 %v7918_v0  ;;  %p330_p8 = scmp.lt.s32.totalorder %s4532_s19, 63  ;;  %v588_v2 = vsel %vm586_vm0, 4294967295, %v5735_v1  ;;  %v5231_v4 = vld [vmem:[%s7911_s3 + $0x4] ss:$8 sps:$4 sm:$0x1f]   ;;  %vm537_vm2 = vcmask 72704   ;;  %v7917_v56 = vlaneseq }
  0x34   : > { %v589_v3 = vsel %vm587_vm1, %v588_v2, 0  ;;  %v5233_v5 = vld [vmem:[%s7911_s3] ss:$8 sps:$4 sm:$0x1f]   ;;  %vm857_vm4 = vcmask 15360  }
  0x35   : > { %s8076_s19 = smov (!%p330_p8, %s4532_s19), 63  ;;  %v594_v8 = vand.u32 %v5231_v4, %v589_v3  ;;  %v591_v9 = vand.u32 %v5233_v5, %v589_v3  ;;  %v5938_v57 = vand.u32 127, %v7917_v56 }
  0x36   : > { %s4533_s27 = sshll.u32 %s8076_s19, 3 }
  0x37   : > { %s5866_s20 = scalar_lea.vmem %s7908_s0, %s4533_s27  ;;  %610 = vmatprep.subr.bf16.mxu0 %v594_v8  ;;  %7965 = vst [vmem:[#allocation5_spill] sm:$0xff] %v5938_v57  ;;  %vm791_vm3 = vcmp.eq.s32.totalorder %v5938_v57, 0  ;;  %vm824_vm5 = vcmp.eq.s32.totalorder %v5938_v57, 1  ;;  %v452_v57 = vld [vmem:[%s5855_s24 + $0x328] sm:$0xff] }
  0x38   : > { %v479_v6 = vld [vmem:[%s5866_s20] sm:$0xff]  ;;  %v480_v7 = vld [vmem:[%s5866_s20 + $0x8] sm:$0xff]  ;;  %611 = vmatpush1.bf16.msra.mxu0 %v591_v9  ;;  %v481_v11 = vld [vmem:[%s5866_s20 + $0x10] sm:$0xff] }
  0x39   : > { %v513_v10 = vpack.c.bf16 %v480_v7, %v479_v6  ;;  %v482_v12 = vld [vmem:[%s5866_s20 + $0x18] sm:$0xff]  ;;  %v483_v14 = vld [vmem:[%s5866_s20 + $0x20] sm:$0xff]  ;;  %v484_v15 = vld [vmem:[%s5866_s20 + $0x28] sm:$0xff] }
  0x3a   : > { %v514_v13 = vpack.c.bf16 %v482_v12, %v481_v11  ;;  %v515_v16 = vpack.c.bf16 %v484_v15, %v483_v14  ;;  %v485_v17 = vld [vmem:[%s5866_s20 + $0x30] sm:$0xff]  ;;  %v486_v18 = vld [vmem:[%s5866_s20 + $0x38] sm:$0xff]  ;;  %v487_v20 = vld [vmem:[%s5866_s20 + $0x40] sm:$0xff] }
  0x3b   : > { %4541 = vmatmul.mubr.msk.bf16.vlgmr.msra.gmra.mxu0 %vm537_vm2, %v513_v10  ;;  %v516_v19 = vpack.c.bf16 %v486_v18, %v485_v17  ;;  %v488_v21 = vld [vmem:[%s5866_s20 + $0x48] sm:$0xff]  ;;  %v489_v23 = vld [vmem:[%s5866_s20 + $0x50] sm:$0xff]  ;;  %v490_v24 = vld [vmem:[%s5866_s20 + $0x58] sm:$0xff] }
  0x3c   : > { %638 = vmatprep.mubr.bf16.mxu0 %v7918_v0  ;;  %v517_v22 = vpack.c.bf16 %v488_v21, %v487_v20  ;;  %v518_v25 = vpack.c.bf16 %v490_v24, %v489_v23  ;;  %v491_v26 = vld [vmem:[%s5866_s20 + $0x60] sm:$0xff]  ;;  %v492_v27 = vld [vmem:[%s5866_s20 + $0x68] sm:$0xff]  ;;  %v493_v29 = vld [vmem:[%s5866_s20 + $0x70] sm:$0xff] }
  0x3d   : > { %v519_v28 = vpack.c.bf16 %v492_v27, %v491_v26  ;;  %v494_v30 = vld [vmem:[%s5866_s20 + $0x78] sm:$0xff]  ;;  %v495_v32 = vld [vmem:[%s5866_s20 + $0x80] sm:$0xff]  ;;  %v496_v33 = vld [vmem:[%s5866_s20 + $0x88] sm:$0xff] }
  0x3e   : > { %v520_v31 = vpack.c.bf16 %v494_v30, %v493_v29  ;;  %v521_v34 = vpack.c.bf16 %v496_v33, %v495_v32  ;;  %v497_v35 = vld [vmem:[%s5866_s20 + $0x90] sm:$0xff]  ;;  %v498_v36 = vld [vmem:[%s5866_s20 + $0x98] sm:$0xff]  ;;  %v499_v38 = vld [vmem:[%s5866_s20 + $0xa0] sm:$0xff] }
  0x3f   : > { %v522_v37 = vpack.c.bf16 %v498_v36, %v497_v35  ;;  %v500_v39 = vld [vmem:[%s5866_s20 + $0xa8] sm:$0xff]  ;;  %v501_v41 = vld [vmem:[%s5866_s20 + $0xb0] sm:$0xff]  ;;  %v502_v42 = vld [vmem:[%s5866_s20 + $0xb8] sm:$0xff] }
  0x40   : > { %v523_v40 = vpack.c.bf16 %v500_v39, %v499_v38  ;;  %v524_v43 = vpack.c.bf16 %v502_v42, %v501_v41  ;;  %v503_v44 = vld [vmem:[%s5866_s20 + $0xc0] sm:$0xff]  ;;  %v504_v45 = vld [vmem:[%s5866_s20 + $0xc8] sm:$0xff]  ;;  %v505_v47 = vld [vmem:[%s5866_s20 + $0xd0] sm:$0xff] }
  0x41   : > { %v525_v46 = vpack.c.bf16 %v504_v45, %v503_v44  ;;  %v506_v48 = vld [vmem:[%s5866_s20 + $0xd8] sm:$0xff]  ;;  %v507_v50 = vld [vmem:[%s5866_s20 + $0xe0] sm:$0xff]  ;;  %v508_v51 = vld [vmem:[%s5866_s20 + $0xe8] sm:$0xff] }
  0x42   : > { %v526_v49 = vpack.c.bf16 %v506_v48, %v505_v47  ;;  %v527_v52 = vpack.c.bf16 %v508_v51, %v507_v50  ;;  %v509_v53 = vld [vmem:[%s5866_s20 + $0xf0] sm:$0xff]  ;;  %v510_v54 = vld [vmem:[%s5866_s20 + $0xf8] sm:$0xff] }
  0x43   : > { %4542 = vmatmul.mubr.msk.bf16.gmra.mxu0 %vm537_vm2, %v514_v13  ;;  %v528_v55 = vpack.c.bf16 %v510_v54, %v509_v53 }
  0x44   : > { %648 = vmatprep.mubr.bf16.mxu0 %v7918_v0 }
  0x4b   : > { %4543 = vmatmul.mubr.msk.bf16.gmra.mxu0 %vm537_vm2, %v515_v16 }
  0x4c   : > { %658 = vmatprep.mubr.bf16.mxu0 %v7918_v0 }
  0x53   : > { %4544 = vmatmul.mubr.msk.bf16.gmra.mxu0 %vm537_vm2, %v516_v19 }
  0x54   : > { %668 = vmatprep.mubr.bf16.mxu0 %v7918_v0 }
  0x5b   : > { %4545 = vmatmul.mubr.msk.bf16.gmra.mxu0 %vm537_vm2, %v517_v22 }
  0x5c   : > { %678 = vmatprep.mubr.bf16.mxu0 %v7918_v0 }
  0x63   : > { %4546 = vmatmul.mubr.msk.bf16.gmra.mxu0 %vm537_vm2, %v518_v25 }
  0x64   : > { %688 = vmatprep.mubr.bf16.mxu0 %v7918_v0 }
  0x6b   : > { %4547 = vmatmul.mubr.msk.bf16.gmra.mxu0 %vm537_vm2, %v519_v28 }
  0x6c   : > { %698 = vmatprep.mubr.bf16.mxu0 %v7918_v0 }
  0x73   : > { %4548 = vmatmul.mubr.msk.bf16.gmra.mxu0 %vm537_vm2, %v520_v31 }
  0x74   : > { %708 = vmatprep.mubr.bf16.mxu0 %v7918_v0 }
  0x7b   : > { %4549 = vmatmul.mubr.msk.bf16.gmra.mxu0 %vm537_vm2, %v521_v34 }
  0x7c   : > { %718 = vmatprep.mubr.bf16.mxu0 %v7918_v0 }
  0x83   : > { %4550 = vmatmul.mubr.msk.bf16.gmra.mxu0 %vm537_vm2, %v522_v37 }
  0x84   : > { %728 = vmatprep.mubr.bf16.mxu0 %v7918_v0 }
  0x8b   : > { %4551 = vmatmul.mubr.msk.bf16.gmra.mxu0 %vm537_vm2, %v523_v40 }
  0x8c   : > { %738 = vmatprep.mubr.bf16.mxu0 %v7918_v0 }
  0x93   : > { %4552 = vmatmul.mubr.msk.bf16.gmra.mxu0 %vm537_vm2, %v524_v43 }
  0x94   : > { %748 = vmatprep.mubr.bf16.mxu0 %v7918_v0 }
  0x9b   : > { %4553 = vmatmul.mubr.msk.bf16.gmra.mxu0 %vm537_vm2, %v525_v46 }
  0x9c   : > { %758 = vmatprep.mubr.bf16.mxu0 %v7918_v0 }
  0xa3   : > { %4554 = vmatmul.mubr.msk.bf16.gmra.mxu0 %vm537_vm2, %v526_v49 }
  0xa4   : > { %768 = vmatprep.mubr.bf16.mxu0 %v7918_v0 }
  0xab   : > { %4555 = vmatmul.mubr.msk.bf16.gmra.mxu0 %vm537_vm2, %v527_v52 }
  0xac   : > { %778 = vmatprep.mubr.bf16.mxu0 %v7918_v0 }
  0xb3   : > { %4556 = vmatmul.mubr.msk.bf16.gmra.mxu0 %vm537_vm2, %v528_v55 }
  0xfb   : > { %v5940_v58 = vpop.f32.mrf.mxu0 }
  0xfd   : > { %v5943_v59 = vpop.f32.mrf.mxu0 }
  0xfe   : > { %7966 = vst [vmem:[#allocation6_spill] sm:$0xff] %v5943_v59  ;;  %v5948_v60 = vsel %vm791_vm3, %v5943_v59, 1.0 }
  0xff   : > { %7967 = vst [vmem:[#allocation7_spill] sm:$0xff] %v5948_v60  ;;  %v5950_v61 = vpop.f32.mrf.mxu0  ;;  %4746 = vmatprep.mubr.msk.f32.mxu1 %vm857_vm4, %v5948_v60 }
 0x101   : > { %v5956_v63 = vpop.f32.mrf.mxu0 }
 0x102   : > { %7968 = vst [vmem:[#allocation8_spill] sm:$0xff] %v5956_v63 }
 0x103   : > { %v5958_v1 = vpop.f32.mrf.mxu0 }
 0x105   : > { %v5960_v2 = vpop.f32.mrf.mxu0 }
 0x107   : > { %v5962_v3 = vpop.f32.mrf.mxu0 }
 0x109   : > { %v5966_v5 = vpop.f32.mrf.mxu0 }
 0x10b   : > { %v5968_v6 = vpop.f32.mrf.mxu0 }
 0x10d   : > { %v5970_v7 = vpop.f32.mrf.mxu0 }
 0x10f   : > { %v5972_v8 = vpop.f32.mrf.mxu0 }
 0x111   : > { %v5976_v10 = vpop.f32.mrf.mxu0 }
 0x113   : > { %v5978_v11 = vpop.f32.mrf.mxu0 }
 0x115   : > { %v5980_v12 = vpop.f32.mrf.mxu0 }
 0x117   : > { %v5982_v13 = vpop.f32.mrf.mxu0 }
 0x119   : > { %v5986_v15 = vpop.f32.mrf.mxu0 }
 0x11b   : > { %v5988_v16 = vpop.f32.mrf.mxu0 }
 0x11d   : > { %v5990_v17 = vpop.f32.mrf.mxu0 }
 0x11f   : > { %v5992_v18 = vpop.f32.mrf.mxu0 }
 0x121   : > { %v5996_v20 = vpop.f32.mrf.mxu0 }
 0x123   : > { %v5998_v21 = vpop.f32.mrf.mxu0 }
 0x125   : > { %v6000_v22 = vpop.f32.mrf.mxu0 }
 0x127   : > { %v6002_v23 = vpop.f32.mrf.mxu0 }
 0x129   : > { %v6006_v25 = vpop.f32.mrf.mxu0 }
 0x12b   : > { %v690_v26 = vpop.f32.mrf.mxu0 }
 0x12d   : > { %v6008_v27 = vpop.f32.mrf.mxu0 }
 0x12f   : > { %v694_v28 = vpop.f32.mrf.mxu0 }
 0x130   : > { %v2049_v29 = vpack.c.bf16 %v694_v28, %v690_v26 }
 0x131   : > { %v6010_v30 = vpop.f32.mrf.mxu0 }
 0x133   : > { %v700_v31 = vpop.f32.mrf.mxu0 }
 0x135   : > { %v6012_v32 = vpop.f32.mrf.mxu0 }
 0x137   : > { %v704_v33 = vpop.f32.mrf.mxu0 }
 0x138   : > { %v2050_v34 = vpack.c.bf16 %v704_v33, %v700_v31 }
 0x139   : > { %v6014_v35 = vpop.f32.mrf.mxu0 }
 0x13a   : > { %v840_v63 = vsel %vm824_vm5, %v6014_v35, 1.0 }
 0x13b   : > { %v6016_v36 = vpop.f32.mrf.mxu0 }
 0x13d   : > { %v6018_v37 = vpop.f32.mrf.mxu0 }
 0x13e   : > { %7969 = vst [vmem:[#allocation9_spill] sm:$0xff] %v6018_v37 }
 0x13f   : > { %v6020_v38 = vpop.f32.mrf.mxu0 }
 0x141   : > { %v6024_v40 = vpop.f32.mrf.mxu0 }
 0x143   : > { %v6026_v41 = vpop.f32.mrf.mxu0 }
 0x145   : > { %v6028_v42 = vpop.f32.mrf.mxu0 }
 0x147   : > { %v6030_v43 = vpop.f32.mrf.mxu0 }
 0x149   : > { %v6034_v45 = vpop.f32.mrf.mxu0 }
 0x14b   : > { %v730_v46 = vpop.f32.mrf.mxu0 }
 0x14d   : > { %v6036_v47 = vpop.f32.mrf.mxu0 }
 0x14f   : > { %v734_v48 = vpop.f32.mrf.mxu0 }
 0x151   : > { %v6038_v49 = vpop.f32.mrf.mxu0 }
 0x153   : > { %v740_v50 = vpop.f32.mrf.mxu0 }
 0x155   : > { %v6040_v51 = vpop.f32.mrf.mxu0 }
 0x157   : > { %v744_v52 = vpop.f32.mrf.mxu0 }
 0x159   : > { %v6042_v53 = vpop.f32.mrf.mxu0 }
 0x15b   : > { %v750_v54 = vpop.f32.mrf.mxu0 }
 0x15d   : > { %v6044_v55 = vpop.f32.mrf.mxu0 }
 0x15f   : > { %v754_v26 = vpop.f32.mrf.mxu0 }
 0x161   : > { %v6046_v28 = vpop.f32.mrf.mxu0 }
 0x163   : > { %v760_v31 = vpop.f32.mrf.mxu0 }
 0x165   : > { %v6048_v33 = vpop.f32.mrf.mxu0 }
 0x167   : > { %v764_v56 = vpop.f32.mrf.mxu0 }
 0x169   : > { %v6050_v0 = vpop.f32.mrf.mxu0 }
 0x16b   : > { %v770_v62 = vpop.f32.mrf.mxu0 }
 0x16d   : > { %v6052_v39 = vpop.f32.mrf.mxu0 }
 0x16f   : > { %v774_v4 = vpop.f32.mrf.mxu0 }
 0x170   : > { %v2057_v59 = vpack.c.bf16 %v774_v4, %v770_v62  ;;  %v2056_v62 = vpack.c.bf16 %v764_v56, %v760_v31  ;;  %v839_v4 = vsel %vm824_vm5, %v6012_v32, 1.0  ;;  %v838_v56 = vsel %vm824_vm5, %v6010_v30, 1.0 }
 0x171   : > { %v6054_v44 = vpop.f32.mrf.mxu0  ;;  %v829_v31 = vsel %vm824_vm5, %v5970_v7, 1.0 }
 0x173   : > { %v780_v9 = vpop.f32.mrf.mxu0 }
 0x175   : > { %v6056_v14 = vpop.f32.mrf.mxu0 }
 0x177   : > { %v784_v19 = vpop.f32.mrf.mxu0 }
 0x178   : > { %v2058_v24 = vpack.c.bf16 %v784_v19, %v780_v9  ;;  %v855_v9 = vsel %vm824_vm5, %v6056_v14, 1.0  ;;  %v7970_v19 = vpack.c.bf16 %v6002_v23, %v5998_v21  ;;  %v837_v21 = vsel %vm824_vm5, %v6008_v27, 1.0 }
 0x179   : > { %v6059_v60 = vpop.f32.mrf.mxu0  ;;  %v852_v23 = vsel %vm824_vm5, %v6050_v0, 1.0 }
 0x17a   : > { %4810 = vmatprep.subr.bf16.mxu0 %v2058_v24  ;;  %v856_v37 = vsel %vm824_vm5, %v6059_v60, 1.0  ;;  %v853_v24 = vsel %vm824_vm5, %v6052_v39, 1.0 }
 0x17b   : > { %4714 = vmatprep.subr.msk.mxu1 %vm857_vm4, %v856_v37  ;;  %4811 = vmatpush3.bf16.msra.mxu0 %v2050_v34  ;;  %v7971_v34 = vpack.c.bf16 %v5992_v18, %v5988_v16  ;;  %v2053_v37 = vpack.c.bf16 %v734_v48, %v730_v46  ;;  %v836_v16 = vsel %vm824_vm5, %v6006_v25, 1.0  ;;  %v851_v18 = vsel %vm824_vm5, %v6048_v33, 1.0 }
 0x17c   : > { %4715 = vmatpush3.xpose.msk.msra.mxu1 %vm857_vm4, %v840_v63  ;;  %4812 = vmatprep.subr.bf16.mxu0 %v2057_v59  ;;  %v854_v63 = vsel %vm824_vm5, %v6054_v44, 1.0  ;;  %v2055_v59 = vpack.c.bf16 %v754_v26, %v750_v54  ;;  %v7973_v46 = vpack.c.bf16 %v5972_v8, %v5968_v6  ;;  %v850_v48 = vsel %vm824_vm5, %v6046_v28, 1.0 }
 0x17d   : > { %4716 = vmatprep.subr.msk.mxu1 %vm857_vm4, %v855_v9  ;;  %v7975_v6 = vpack.c.bf16 %v5962_v3, %v5958_v1  ;;  %v834_v8 = vsel %vm824_vm5, %v5996_v20, 1.0  ;;  %v7977_v1 = vpack.c.bf16 %v5950_v61, %v5940_v58  ;;  %v833_v3 = vsel %vm824_vm5, %v5990_v17, 1.0 }
 0x17e   : > { %v847_v58 = vsel %vm824_vm5, %v6040_v51, 1.0  ;;  %v831_v61 = vsel %vm824_vm5, %v5980_v12, 1.0  ;;  %v830_v54 = vsel %vm824_vm5, %v5976_v10, 1.0  ;;  %v845_v26 = vsel %vm824_vm5, %v6036_v47, 1.0 }
 0x17f   : > { %4813 = vmatpush3.bf16.msra.mxu0 %v2049_v29  ;;  %v2054_v29 = vpack.c.bf16 %v744_v52, %v740_v50  ;;  %v7972_v50 = vpack.c.bf16 %v5982_v13, %v5978_v11  ;;  %v835_v11 = vsel %vm824_vm5, %v6000_v22, 1.0  ;;  %v7974_v13 = vpack.c.bf16 %v6030_v43, %v6026_v41 }
 0x180   : > { %4717 = vmatpush3.xpose.msk.msra.mxu1 %vm857_vm4, %v839_v4  ;;  %4814 = vmatprep.subr.bf16.mxu0 %v2056_v62  ;;  %v7976_v41 = vpack.c.bf16 %v6020_v38, %v6016_v36  ;;  %v849_v43 = vsel %vm824_vm5, %v6044_v55, 1.0  ;;  %v848_v36 = vsel %vm824_vm5, %v6042_v53, 1.0  ;;  %v832_v38 = vsel %vm824_vm5, %v5986_v15, 1.0 }
 0x181   : > { %4718 = vmatprep.subr.msk.mxu1 %vm857_vm4, %v854_v63  ;;  %v846_v52 = vsel %vm824_vm5, %v6038_v49, 1.0  ;;  %v844_v9 = vsel %vm824_vm5, %v6034_v45, 1.0  ;;  %v828_v62 = vsel %vm824_vm5, %v5966_v5, 1.0  ;;  %v843_v4 = vsel %vm824_vm5, %v6028_v42, 1.0 }
 0x182   : > { %v827_v63 = vsel %vm824_vm5, %v5960_v2, 1.0 }
 0x183   : > { %4815 = vmatpush3.bf16.msra.mxu0 %v7970_v19  ;;  %v7978_v19 = vld [vmem:[#allocation8_spill] sm:$0xff] }
 0x184   : > { %4719 = vmatpush3.xpose.msk.msra.mxu1 %vm857_vm4, %v838_v56  ;;  %4816 = vmatprep.subr.bf16.mxu0 %v2055_v59  ;;  %v842_v59 = vsel %vm824_vm5, %v6024_v40, 1.0  ;;  %v826_v56 = vsel %vm824_vm5, %v7978_v19, 1.0 }
 0x185   : > { %4720 = vmatprep.subr.msk.mxu1 %vm857_vm4, %v853_v24  ;;  %v7979_v24 = vld [vmem:[#allocation9_spill] sm:$0xff] }
 0x187   : > { %4817 = vmatpush3.bf16.msra.mxu0 %v7971_v34  ;;  %v7980_v34 = vld [vmem:[#allocation6_spill] sm:$0xff] }
 0x188   : > { %4721 = vmatpush3.xpose.msk.msra.mxu1 %vm857_vm4, %v837_v21  ;;  %4818 = vmatprep.subr.bf16.mxu0 %v2054_v29  ;;  %v841_v29 = vsel %vm824_vm5, %v7979_v24, 1.0  ;;  %v825_v21 = vsel %vm824_vm5, %v7980_v34, 1.0 }
 0x189   : > { %4722 = vmatprep.subr.msk.mxu1 %vm857_vm4, %v852_v23  ;;  %v7981_v23 = vld [vmem:[#allocation7_spill] sm:$0xff] }
 0x18b   : > { %4819 = vmatpush3.bf16.msra.mxu0 %v7972_v50  ;;  %v794_v50 = vsel %vm791_vm3, %v5960_v2, 1.0  ;;  %v797_v2 = vsel %vm791_vm3, %v5976_v10, 1.0  ;;  %v800_v10 = vsel %vm791_vm3, %v5990_v17, 1.0  ;;  %v803_v17 = vsel %vm791_vm3, %v6006_v25, 1.0 }
 0x18c   : > { %4723 = vmatpush3.xpose.msk.msra.mxu1 %vm857_vm4, %v836_v16  ;;  %4820 = vmatprep.subr.bf16.mxu0 %v2053_v37  ;;  %v793_v37 = vsel %vm791_vm3, %v7978_v19, 1.0  ;;  %v795_v16 = vsel %vm791_vm3, %v5966_v5, 1.0  ;;  %v798_v5 = vsel %vm791_vm3, %v5980_v12, 1.0  ;;  %v801_v12 = vsel %vm791_vm3, %v5996_v20, 1.0 }
 0x18d   : > { %4724 = vmatprep.subr.msk.mxu1 %vm857_vm4, %v851_v18  ;;  %v796_v18 = vsel %vm791_vm3, %v5970_v7, 1.0  ;;  %v799_v7 = vsel %vm791_vm3, %v5986_v15, 1.0  ;;  %v802_v15 = vsel %vm791_vm3, %v6000_v22, 1.0  ;;  %v804_v20 = vsel %vm791_vm3, %v6008_v27, 1.0 }
 0x18e   : > { %v805_v22 = vsel %vm791_vm3, %v6010_v30, 1.0  ;;  %v806_v25 = vsel %vm791_vm3, %v6012_v32, 1.0  ;;  %v807_v27 = vsel %vm791_vm3, %v6014_v35, 1.0  ;;  %v808_v30 = vsel %vm791_vm3, %v7979_v24, 1.0 }
 0x18f   : > { %4821 = vmatpush3.bf16.msra.mxu0 %v7973_v46  ;;  %v809_v32 = vsel %vm791_vm3, %v6024_v40, 1.0  ;;  %v810_v35 = vsel %vm791_vm3, %v6028_v42, 1.0  ;;  %v811_v46 = vsel %vm791_vm3, %v6034_v45, 1.0  ;;  %v812_v40 = vsel %vm791_vm3, %v6036_v47, 1.0 }
 0x190   : > { %4725 = vmatpush3.xpose.msk.msra.mxu1 %vm857_vm4, %v835_v11  ;;  %4822 = vmatprep.subr.bf16.mxu0 %v7974_v13  ;;  %v813_v42 = vsel %vm791_vm3, %v6038_v49, 1.0  ;;  %v814_v45 = vsel %vm791_vm3, %v6040_v51, 1.0  ;;  %v815_v47 = vsel %vm791_vm3, %v6042_v53, 1.0  ;;  %v816_v49 = vsel %vm791_vm3, %v6044_v55, 1.0  ;;  %v351_v11 = vld [vmem:[%s5855_s24] sm:$0xff] }
 0x191   : > { %4726 = vmatprep.subr.msk.mxu1 %vm857_vm4, %v850_v48  ;;  %v817_v51 = vsel %vm791_vm3, %v6046_v28, 1.0  ;;  %v818_v53 = vsel %vm791_vm3, %v6048_v33, 1.0  ;;  %v819_v55 = vsel %vm791_vm3, %v6050_v0, 1.0  ;;  %v820_v28 = vsel %vm791_vm3, %v6052_v39, 1.0  ;;  %v352_v48 = vld [vmem:[%s5855_s24 + $0x8] sm:$0xff] }
 0x192   : > { %v821_v33 = vsel %vm791_vm3, %v6054_v44, 1.0  ;;  %v822_v0 = vsel %vm791_vm3, %v6056_v14, 1.0  ;;  %v823_v39 = vsel %vm791_vm3, %v6059_v60, 1.0  ;;  %v7982_v44 = vmov 0   ;;  %v355_v60 = vld [vmem:[%s5855_s24 + $0x20] sm:$0xff] }
 0x193   : > { %4823 = vmatpush3.bf16.msra.mxu0 %v7975_v6  ;;  %vm1499_vm7 = vcmp.gt.f32.partialorder %v351_v11, 0.0  ;;  %vm1500_vm9 = vcmp.gt.f32.partialorder %v352_v48, 0.0  ;;  %vm1501_vm11 = vcmp.gt.f32.partialorder %v355_v60, 0.0  ;;  %v375_v11 = vld [vmem:[%s5855_s24 + $0xc0] sm:$0xff] }
 0x194   : > { %4727 = vmatpush3.xpose.msk.msra.mxu1 %vm857_vm4, %v834_v8  ;;  %4824 = vmatprep.subr.bf16.mxu0 %v7976_v41 }
 0x195   : > { %4728 = vmatprep.subr.msk.mxu1 %vm857_vm4, %v849_v43  ;;  %v356_v43 = vld [vmem:[%s5855_s24 + $0x28] sm:$0xff] }
 0x196   : > { %vm1502_vm12 = vcmp.gt.f32.partialorder %v356_v43, 0.0 }
 0x197   : > { %4825 = vmatpush3.bf16.msra.mxu0 %v7977_v1 }
 0x198   : > { %4729 = vmatpush3.xpose.msk.msra.mxu1 %vm857_vm4, %v833_v3 }
 0x199   : > { %4730 = vmatprep.subr.msk.mxu1 %vm857_vm4, %v848_v36 }
 0x19c   : > { %4731 = vmatpush3.xpose.msk.msra.mxu1 %vm857_vm4, %v832_v38 }
 0x19d   : > { %4732 = vmatprep.subr.msk.mxu1 %vm857_vm4, %v847_v58 }
 0x1a0   : > { %4733 = vmatpush3.xpose.msk.msra.mxu1 %vm857_vm4, %v831_v61 }
 0x1a1   : > { %4734 = vmatprep.subr.msk.mxu1 %vm857_vm4, %v846_v52 }
 0x1a4   : > { %4735 = vmatpush3.xpose.msk.msra.mxu1 %vm857_vm4, %v830_v54 }
 0x1a5   : > { %4736 = vmatprep.subr.msk.mxu1 %vm857_vm4, %v845_v26 }
 0x1a8   : > { %4737 = vmatpush3.xpose.msk.msra.mxu1 %vm857_vm4, %v829_v31  ;;  %v359_v31 = vld [vmem:[%s5855_s24 + $0x40] sm:$0xff] }
 0x1a9   : > { %4738 = vmatprep.subr.msk.mxu1 %vm857_vm4, %v844_v9  ;;  %v360_v9 = vld [vmem:[%s5855_s24 + $0x48] sm:$0xff]  ;;  %vm1503_vm15 = vcmp.gt.f32.partialorder %v359_v31, 0.0 }
 0x1aa   : > { %vm1504_vm0 = vcmp.gt.f32.partialorder %v360_v9, 0.0 }
 0x1ac   : > { %4739 = vmatpush3.xpose.msk.msra.mxu1 %vm857_vm4, %v828_v62 }
 0x1ad   : > { %4740 = vmatprep.subr.msk.mxu1 %vm857_vm4, %v843_v4 }
 0x1b0   : > { %4741 = vmatpush3.xpose.msk.msra.mxu1 %vm857_vm4, %v827_v63 }
 0x1b1   : > { %4742 = vmatprep.subr.msk.mxu1 %vm857_vm4, %v842_v59 }
 0x1b4   : > { %4743 = vmatpush3.xpose.msk.msra.mxu1 %vm857_vm4, %v826_v56 }
 0x1b5   : > { %4744 = vmatprep.subr.msk.mxu1 %vm857_vm4, %v841_v29 }
 0x1b8   : > { %4745 = vmatpush3.xpose.msk.msra.mxu1 %vm857_vm4, %v825_v21  ;;  %v363_v21 = vld [vmem:[%s5855_s24 + $0x60] sm:$0xff] }
 0x1bb   : > { %4747 = vmatmul.mubr.msk.f32.vlgmr.msra.gmra.mxu1 %vm857_vm4, %v7981_v23  ;;  %v364_v23 = vld [vmem:[%s5855_s24 + $0x68] sm:$0xff] }
 0x1bc   : > { %4748 = vmatprep.mubr.msk.f32.mxu1 %vm857_vm4, %v793_v37 }
 0x1bf   : > { %4749 = vmatmul.mubr.msk.f32.gmra.mxu1 %vm857_vm4, %v793_v37 }
 0x1c0   : > { %4750 = vmatprep.mubr.msk.f32.mxu1 %vm857_vm4, %v794_v50 }
 0x1c3   : > { %4751 = vmatmul.mubr.msk.f32.gmra.mxu1 %vm857_vm4, %v794_v50 }
 0x1c4   : > { %4752 = vmatprep.mubr.msk.f32.mxu1 %vm857_vm4, %v795_v16 }
 0x1c7   : > { %4753 = vmatmul.mubr.msk.f32.gmra.mxu1 %vm857_vm4, %v795_v16 }
 0x1c8   : > { %4754 = vmatprep.mubr.msk.f32.mxu1 %vm857_vm4, %v796_v18 }
 0x1cb   : > { %4755 = vmatmul.mubr.msk.f32.gmra.mxu1 %vm857_vm4, %v796_v18 }
 0x1cc   : > { %4756 = vmatprep.mubr.msk.f32.mxu1 %vm857_vm4, %v797_v2 }
 0x1cf   : > { %4757 = vmatmul.mubr.msk.f32.gmra.mxu1 %vm857_vm4, %v797_v2 }
 0x1d0   : > { %4758 = vmatprep.mubr.msk.f32.mxu1 %vm857_vm4, %v798_v5 }
 0x1d3   : > { %4759 = vmatmul.mubr.msk.f32.gmra.mxu1 %vm857_vm4, %v798_v5 }
 0x1d4   : > { %4760 = vmatprep.mubr.msk.f32.mxu1 %vm857_vm4, %v799_v7 }
 0x1d7   : > { %4761 = vmatmul.mubr.msk.f32.gmra.mxu1 %vm857_vm4, %v799_v7 }
 0x1d8   : > { %4762 = vmatprep.mubr.msk.f32.mxu1 %vm857_vm4, %v800_v10 }
 0x1db   : > { %4763 = vmatmul.mubr.msk.f32.gmra.mxu1 %vm857_vm4, %v800_v10 }
 0x1dc   : > { %4764 = vmatprep.mubr.msk.f32.mxu1 %vm857_vm4, %v801_v12 }
 0x1df   : > { %4765 = vmatmul.mubr.msk.f32.gmra.mxu1 %vm857_vm4, %v801_v12 }
 0x1e0   : > { %4766 = vmatprep.mubr.msk.f32.mxu1 %vm857_vm4, %v802_v15 }
 0x1e3   : > { %4767 = vmatmul.mubr.msk.f32.gmra.mxu1 %vm857_vm4, %v802_v15  ;;  %v367_v15 = vld [vmem:[%s5855_s24 + $0x80] sm:$0xff] }
 0x1e4   : > { %4768 = vmatprep.mubr.msk.f32.mxu1 %vm857_vm4, %v803_v17 }
 0x1e7   : > { %4769 = vmatmul.mubr.msk.f32.gmra.mxu1 %vm857_vm4, %v803_v17  ;;  %v368_v17 = vld [vmem:[%s5855_s24 + $0x88] sm:$0xff] }
 0x1e8   : > { %4770 = vmatprep.mubr.msk.f32.mxu1 %vm857_vm4, %v804_v20 }
 0x1eb   : > { %4771 = vmatmul.mubr.msk.f32.gmra.mxu1 %vm857_vm4, %v804_v20 }
 0x1ec   : > { %4772 = vmatprep.mubr.msk.f32.mxu1 %vm857_vm4, %v805_v22 }
 0x1ef   : > { %4773 = vmatmul.mubr.msk.f32.gmra.mxu1 %vm857_vm4, %v805_v22 }
 0x1f0   : > { %4774 = vmatprep.mubr.msk.f32.mxu1 %vm857_vm4, %v806_v25 }
 0x1f3   : > { %4775 = vmatmul.mubr.msk.f32.gmra.mxu1 %vm857_vm4, %v806_v25 }
 0x1f4   : > { %4776 = vmatprep.mubr.msk.f32.mxu1 %vm857_vm4, %v807_v27 }
 0x1f7   : > { %4777 = vmatmul.mubr.msk.f32.gmra.mxu1 %vm857_vm4, %v807_v27 }
 0x1f8   : > { %4778 = vmatprep.mubr.msk.f32.mxu1 %vm857_vm4, %v808_v30 }
 0x1fb   : > { %4779 = vmatmul.mubr.msk.f32.gmra.mxu1 %vm857_vm4, %v808_v30 }
 0x1fc   : > { %4780 = vmatprep.mubr.msk.f32.mxu1 %vm857_vm4, %v809_v32 }
 0x1ff   : > { %4781 = vmatmul.mubr.msk.f32.gmra.mxu1 %vm857_vm4, %v809_v32 }
 0x200   : > { %4782 = vmatprep.mubr.msk.f32.mxu1 %vm857_vm4, %v810_v35 }
 0x203   : > { %4783 = vmatmul.mubr.msk.f32.gmra.mxu1 %vm857_vm4, %v810_v35 }
 0x204   : > { %4784 = vmatprep.mubr.msk.f32.mxu1 %vm857_vm4, %v811_v46 }
 0x207   : > { %4785 = vmatmul.mubr.msk.f32.gmra.mxu1 %vm857_vm4, %v811_v46 }
 0x208   : > { %4786 = vmatprep.mubr.msk.f32.mxu1 %vm857_vm4, %v812_v40 }
 0x20b   : > { %4787 = vmatmul.mubr.msk.f32.gmra.mxu1 %vm857_vm4, %v812_v40 }
 0x20c   : > { %4788 = vmatprep.mubr.msk.f32.mxu1 %vm857_vm4, %v813_v42 }
 0x20f   : > { %4789 = vmatmul.mubr.msk.f32.gmra.mxu1 %vm857_vm4, %v813_v42  ;;  %v371_v42 = vld [vmem:[%s5855_s24 + $0xa0] sm:$0xff] }
 0x210   : > { %4790 = vmatprep.mubr.msk.f32.mxu1 %vm857_vm4, %v814_v45 }
 0x213   : > { %4791 = vmatmul.mubr.msk.f32.gmra.mxu1 %vm857_vm4, %v814_v45  ;;  %v372_v45 = vld [vmem:[%s5855_s24 + $0xa8] sm:$0xff] }
 0x214   : > { %4792 = vmatprep.mubr.msk.f32.mxu1 %vm857_vm4, %v815_v47 }
 0x217   : > { %4793 = vmatmul.mubr.msk.f32.gmra.mxu1 %vm857_vm4, %v815_v47 }
 0x218   : > { %4794 = vmatprep.mubr.msk.f32.mxu1 %vm857_vm4, %v816_v49 }
 0x21b   : > { %4795 = vmatmul.mubr.msk.f32.gmra.mxu1 %vm857_vm4, %v816_v49 }
 0x21c   : > { %4796 = vmatprep.mubr.msk.f32.mxu1 %vm857_vm4, %v817_v51 }
 0x21f   : > { %4797 = vmatmul.mubr.msk.f32.gmra.mxu1 %vm857_vm4, %v817_v51 }
 0x220   : > { %4798 = vmatprep.mubr.msk.f32.mxu1 %vm857_vm4, %v818_v53 }
 0x223   : > { %4799 = vmatmul.mubr.msk.f32.gmra.mxu1 %vm857_vm4, %v818_v53 }
 0x224   : > { %4800 = vmatprep.mubr.msk.f32.mxu1 %vm857_vm4, %v819_v55 }
 0x227   : > { %4801 = vmatmul.mubr.msk.f32.gmra.mxu1 %vm857_vm4, %v819_v55 }
 0x228   : > { %4802 = vmatprep.mubr.msk.f32.mxu1 %vm857_vm4, %v820_v28 }
 0x22b   : > { %4803 = vmatmul.mubr.msk.f32.gmra.mxu1 %vm857_vm4, %v820_v28 }
 0x22c   : > { %4804 = vmatprep.mubr.msk.f32.mxu1 %vm857_vm4, %v821_v33 }
 0x22f   : > { %4805 = vmatmul.mubr.msk.f32.gmra.mxu1 %vm857_vm4, %v821_v33 }
 0x230   : > { %4806 = vmatprep.mubr.msk.f32.mxu1 %vm857_vm4, %v822_v0 }
 0x233   : > { %4807 = vmatmul.mubr.msk.f32.gmra.mxu1 %vm857_vm4, %v822_v0 }
 0x234   : > { %4808 = vmatprep.mubr.msk.f32.mxu1 %vm857_vm4, %v823_v39 }
 0x237   : > { %4809 = vmatmul.mubr.msk.f32.gmra.mxu1 %vm857_vm4, %v823_v39 }
 0x238   : > { %2496 = vmatprep.mubr.bf16.mxu1 %v7982_v44 }
 0x27b   : > { %v1116_v13 = vpop.f32.mrf.mxu1 }
 0x27c   : > { %vm1307_vm6 = vcmp.ge.f32.partialorder %v1116_v13, 0.0  ;;  %v1371_v14 = vmul.f32 0.2, %v1116_v13 }
 0x27d   : > { %v1118_v6 = vpop.f32.mrf.mxu1 }
 0x27e   : > { %vm1308_vm8 = vcmp.ge.f32.partialorder %v1118_v6, 0.0  ;;  %v1372_v8 = vmul.f32 0.2, %v1118_v6  ;;  %v1435_v41 = vsel %vm1307_vm6, %v1116_v13, %v1371_v14  ;;  %vm1505_vm6 = vcmp.gt.f32.partialorder %v363_v21, 0.0  ;;  %v376_v13 = vld [vmem:[%s5855_s24 + $0xc8] sm:$0xff] }
 0x27f   : > { %v1122_v1 = vpop.f32.mrf.mxu1  ;;  %v6375_v58 = vsel %vm1499_vm7, %v1435_v41, -1e+30  ;;  %vm1506_vm7 = vcmp.gt.f32.partialorder %v364_v23, 0.0 }
 0x280   : > { %vm1309_vm10 = vcmp.ge.f32.partialorder %v1122_v1, 0.0  ;;  %v1373_v3 = vmul.f32 0.2, %v1122_v1  ;;  %v1436_v36 = vsel %vm1308_vm8, %v1118_v6, %v1372_v8 }
 0x281   : > { %v1124_v38 = vpop.f32.mrf.mxu1  ;;  %v6377_v61 = vsel %vm1500_vm9, %v1436_v36, -1e+30  ;;  %v379_v36 = vld [vmem:[%s5855_s24 + $0xe0] sm:$0xff] }
 0x282   : > { %v1374_v52 = vmul.f32 0.2, %v1124_v38  ;;  %v1627_v54 = vmax.f32 %v6375_v58, %v6377_v61  ;;  %vm1310_vm13 = vcmp.ge.f32.partialorder %v1124_v38, 0.0  ;;  %v1437_v26 = vsel %vm1309_vm10, %v1122_v1, %v1373_v3 }
 0x283   : > { %v1128_v62 = vpop.f32.mrf.mxu1  ;;  %v6383_v19 = vsel %vm1501_vm11, %v1437_v26, -1e+30  ;;  %vm1507_vm10 = vcmp.gt.f32.partialorder %v367_v15, 0.0  ;;  %vm1508_vm11 = vcmp.gt.f32.partialorder %v368_v17, 0.0  ;;  %v388_v15 = vld [vmem:[%s5855_s24 + $0x128] sm:$0xff] }
 0x284   : > { %vm1311_vm14 = vcmp.ge.f32.partialorder %v1128_v62, 0.0  ;;  %v1375_v4 = vmul.f32 0.2, %v1128_v62  ;;  %1628 = vmax.xlane.f32.xlu0 %v1627_v54  ;;  %v1438_v63 = vsel %vm1310_vm13, %v1124_v38, %v1374_v52  ;;  %v380_v38 = vld [vmem:[%s5855_s24 + $0xe8] sm:$0xff] }
 0x285   : > { %v1130_v59 = vpop.f32.mrf.mxu1  ;;  %v6385_v56 = vsel %vm1502_vm12, %v1438_v63, -1e+30 }
 0x286   : > { %vm1312_vm1 = vcmp.ge.f32.partialorder %v1130_v59, 0.0  ;;  %v1376_v24 = vmul.f32 0.2, %v1130_v59  ;;  %v1630_v29 = vmax.f32 %v6383_v19, %v6385_v56  ;;  %v1439_v34 = vsel %vm1311_vm14, %v1128_v62, %v1375_v4 }
 0x287   : > { %v1134_v37 = vpop.f32.mrf.mxu1  ;;  %v6391_v2 = vsel %vm1503_vm15, %v1439_v34, -1e+30  ;;  %vm1509_vm14 = vcmp.gt.f32.partialorder %v371_v42, 0.0  ;;  %vm1510_vm15 = vcmp.gt.f32.partialorder %v372_v45, 0.0  ;;  %v391_v45 = vld [vmem:[%s5855_s24 + $0x140] sm:$0xff] }
 0x288   : > { %vm1313_vm2 = vcmp.ge.f32.partialorder %v1134_v37, 0.0  ;;  %v1377_v50 = vmul.f32 0.2, %v1134_v37  ;;  %1631 = vmax.xlane.f32.xlu0 %v1630_v29  ;;  %v1440_v16 = vsel %vm1312_vm1, %v1130_v59, %v1376_v24  ;;  %v383_v24 = vld [vmem:[%s5855_s24 + $0x100] sm:$0xff]  ;;  %v384_v29 = vld [vmem:[%s5855_s24 + $0x108] sm:$0xff] }
 0x289   : > { %v1136_v18 = vpop.f32.mrf.mxu1  ;;  %v6393_v5 = vsel %vm1504_vm0, %v1440_v16, -1e+30 }
 0x28a   : > { %v1378_v7 = vmul.f32 0.2, %v1136_v18  ;;  %v1633_v10 = vmax.f32 %v6391_v2, %v6393_v5  ;;  %vm1314_vm8 = vcmp.ge.f32.partialorder %v1136_v18, 0.0  ;;  %v1441_v12 = vsel %vm1313_vm2, %v1134_v37, %v1377_v50 }
 0x28b   : > { %v1140_v20 = vpop.f32.mrf.mxu1  ;;  %v6399_v30 = vsel %vm1505_vm6, %v1441_v12, -1e+30  ;;  %vm1511_vm2 = vcmp.gt.f32.partialorder %v375_v11, 0.0  ;;  %vm1512_vm6 = vcmp.gt.f32.partialorder %v376_v13, 0.0  ;;  %v387_v12 = vld [vmem:[%s5855_s24 + $0x120] sm:$0xff] }
 0x28c   : > { %vm1315_vm9 = vcmp.ge.f32.partialorder %v1140_v20, 0.0  ;;  %v1379_v22 = vmul.f32 0.2, %v1140_v20  ;;  %1634 = vmax.xlane.f32.xlu1 %v1633_v10  ;;  %v1442_v25 = vsel %vm1314_vm8, %v1136_v18, %v1378_v7 }
 0x28d   : > { %v1142_v27 = vpop.f32.mrf.mxu1  ;;  %v6401_v32 = vsel %vm1506_vm7, %v1442_v25, -1e+30 }
 0x28e   : > { %vm1316_vm12 = vcmp.ge.f32.partialorder %v1142_v27, 0.0  ;;  %v1380_v35 = vmul.f32 0.2, %v1142_v27  ;;  %v1636_v46 = vmax.f32 %v6399_v30, %v6401_v32  ;;  %v1443_v40 = vsel %vm1315_vm9, %v1140_v20, %v1379_v22 }
 0x28f   : > { %v1146_v47 = vpop.f32.mrf.mxu1  ;;  %v6407_v55 = vsel %vm1507_vm10, %v1443_v40, -1e+30  ;;  %vm1513_vm9 = vcmp.gt.f32.partialorder %v379_v36, 0.0  ;;  %vm1514_vm10 = vcmp.gt.f32.partialorder %v380_v38, 0.0 }
 0x290   : > { %vm1317_vm13 = vcmp.ge.f32.partialorder %v1146_v47, 0.0  ;;  %v1381_v49 = vmul.f32 0.2, %v1146_v47  ;;  %1637 = vmax.xlane.f32.xlu1 %v1636_v46  ;;  %v1444_v51 = vsel %vm1316_vm12, %v1142_v27, %v1380_v35 }
 0x291   : > { %v1148_v53 = vpop.f32.mrf.mxu1  ;;  %v6409_v28 = vsel %vm1508_vm11, %v1444_v51, -1e+30 }
 0x292   : > { %v1382_v33 = vmul.f32 0.2, %v1148_v53  ;;  %v1639_v0 = vmax.f32 %v6407_v55, %v6409_v28  ;;  %vm1318_vm0 = vcmp.ge.f32.partialorder %v1148_v53, 0.0  ;;  %v1445_v39 = vsel %vm1317_vm13, %v1146_v47, %v1381_v49  ;;  %v392_v47 = vld [vmem:[%s5855_s24 + $0x148] sm:$0xff] }
 0x293   : > { %v1152_v48 = vpop.f32.mrf.mxu1  ;;  %v6415_v41 = vsel %vm1509_vm14, %v1445_v39, -1e+30  ;;  %vm1515_vm13 = vcmp.gt.f32.partialorder %v383_v24, 0.0  ;;  %vm1516_vm14 = vcmp.gt.f32.partialorder %v384_v29, 0.0 }
 0x294   : > { %vm1319_vm1 = vcmp.ge.f32.partialorder %v1152_v48, 0.0  ;;  %v1383_v14 = vmul.f32 0.2, %v1152_v48  ;;  %1640 = vmax.xlane.f32.xlu0 %v1639_v0  ;;  %v1446_v6 = vsel %vm1318_vm0, %v1148_v53, %v1382_v33 }
 0x295   : > { %v1154_v8 = vpop.f32.mrf.mxu1  ;;  %v6417_v60 = vsel %vm1510_vm15, %v1446_v6, -1e+30  ;;  %v396_v6 = vld [vmem:[%s5855_s24 + $0x168] sm:$0xff] }
 0x296   : > { %vm1320_vm7 = vcmp.ge.f32.partialorder %v1154_v8, 0.0  ;;  %v1384_v43 = vmul.f32 0.2, %v1154_v8  ;;  %v1642_v1 = vmax.f32 %v6415_v41, %v6417_v60  ;;  %v1447_v3 = vsel %vm1319_vm1, %v1152_v48, %v1383_v14  ;;  %v395_v14 = vld [vmem:[%s5855_s24 + $0x160] sm:$0xff] }
 0x297   : > { %v1158_v52 = vpop.f32.mrf.mxu1  ;;  %v6423_v9 = vsel %vm1511_vm2, %v1447_v3, -1e+30  ;;  %vm1517_vm1 = vcmp.gt.f32.partialorder %v387_v12, 0.0  ;;  %vm1518_vm2 = vcmp.gt.f32.partialorder %v388_v15, 0.0 }
 0x298   : > { %vm1321_vm8 = vcmp.ge.f32.partialorder %v1158_v52, 0.0  ;;  %v1385_v54 = vmul.f32 0.2, %v1158_v52  ;;  %1643 = vmax.xlane.f32.xlu1 %v1642_v1  ;;  %v1448_v26 = vsel %vm1320_vm7, %v1154_v8, %v1384_v43 }
 0x299   : > { %v1160_v31 = vpop.f32.mrf.mxu1  ;;  %v6425_v62 = vsel %vm1512_vm6, %v1448_v26, -1e+30 }
 0x29a   : > { %v1386_v4 = vmul.f32 0.2, %v1160_v31  ;;  %v1645_v63 = vmax.f32 %v6423_v9, %v6425_v62  ;;  %vm1322_vm11 = vcmp.ge.f32.partialorder %v1160_v31, 0.0  ;;  %v1449_v59 = vsel %vm1321_vm8, %v1158_v52, %v1385_v54 }
 0x29b   : > { %v1164_v34 = vpop.f32.mrf.mxu1  ;;  %v6431_v50 = vsel %vm1513_vm9, %v1449_v59, -1e+30  ;;  %vm1519_vm8 = vcmp.gt.f32.partialorder %v391_v45, 0.0  ;;  %vm1520_vm9 = vcmp.gt.f32.partialorder %v392_v47, 0.0  ;;  %v407_v45 = vld [vmem:[%s5855_s24 + $0x1c0] sm:$0xff]  ;;  %v408_v47 = vld [vmem:[%s5855_s24 + $0x1c8] sm:$0xff] }
 0x29c   : > { %vm1323_vm12 = vcmp.ge.f32.partialorder %v1164_v34, 0.0  ;;  %v1387_v21 = vmul.f32 0.2, %v1164_v34  ;;  %1646 = vmax.xlane.f32.xlu0 %v1645_v63  ;;  %v1450_v23 = vsel %vm1322_vm11, %v1160_v31, %v1386_v4  ;;  %v399_v31 = vld [vmem:[%s5855_s24 + $0x180] sm:$0xff]  ;;  %v400_v4 = vld [vmem:[%s5855_s24 + $0x188] sm:$0xff] }
 0x29d   : > { %v1166_v37 = vpop.f32.mrf.mxu1  ;;  %v6433_v16 = vsel %vm1514_vm10, %v1450_v23, -1e+30 }
 0x29e   : > { %vm1324_vm15 = vcmp.ge.f32.partialorder %v1166_v37, 0.0  ;;  %v1388_v18 = vmul.f32 0.2, %v1166_v37  ;;  %v1648_v7 = vmax.f32 %v6431_v50, %v6433_v16  ;;  %v1451_v10 = vsel %vm1323_vm12, %v1164_v34, %v1387_v21 }
 0x29f   : > { %v1170_v17 = vpop.f32.mrf.mxu1  ;;  %v6439_v27 = vsel %vm1515_vm13, %v1451_v10, -1e+30  ;;  %vm1521_vm12 = vcmp.gt.f32.partialorder %v395_v14, 0.0  ;;  %vm1522_vm13 = vcmp.gt.f32.partialorder %v396_v6, 0.0  ;;  %v404_v10 = vld [vmem:[%s5855_s24 + $0x1a8] sm:$0xff] }
 0x2a0   : > { %vm1325_vm0 = vcmp.ge.f32.partialorder %v1170_v17, 0.0  ;;  %v1389_v20 = vmul.f32 0.2, %v1170_v17  ;;  %1649 = vmax.xlane.f32.xlu1 %v1648_v7  ;;  %v1452_v22 = vsel %vm1324_vm15, %v1166_v37, %v1388_v18  ;;  %v403_v7 = vld [vmem:[%s5855_s24 + $0x1a0] sm:$0xff] }
 0x2a1   : > { %v1172_v25 = vpop.f32.mrf.mxu1  ;;  %v6441_v35 = vsel %vm1516_vm14, %v1452_v22, -1e+30 }
 0x2a2   : > { %v1390_v46 = vmul.f32 0.2, %v1172_v25  ;;  %v1651_v40 = vmax.f32 %v6439_v27, %v6441_v35  ;;  %vm1326_vm6 = vcmp.ge.f32.partialorder %v1172_v25, 0.0  ;;  %v1453_v42 = vsel %vm1325_vm0, %v1170_v17, %v1389_v20 }
 0x2a3   : > { %v1176_v49 = vpop.f32.mrf.mxu1  ;;  %v6447_v0 = vsel %vm1517_vm1, %v1453_v42, -1e+30  ;;  %vm1523_vm0 = vcmp.gt.f32.partialorder %v399_v31, 0.0  ;;  %vm1524_vm1 = vcmp.gt.f32.partialorder %v400_v4, 0.0 }
 0x2a4   : > { %vm1327_vm7 = vcmp.ge.f32.partialorder %v1176_v49, 0.0  ;;  %v1391_v51 = vmul.f32 0.2, %v1176_v49  ;;  %1652 = vmax.xlane.f32.xlu0 %v1651_v40  ;;  %v1454_v53 = vsel %vm1326_vm6, %v1172_v25, %v1390_v46 }
 0x2a5   : > { %v1178_v33 = vpop.f32.mrf.mxu1  ;;  %v6449_v39 = vsel %vm1518_vm2, %v1454_v53, -1e+30 }
 0x2a6   : > { %vm1328_vm10 = vcmp.ge.f32.partialorder %v1178_v33, 0.0  ;;  %v1392_v11 = vmul.f32 0.2, %v1178_v33  ;;  %v1654_v13 = vmax.f32 %v6447_v0, %v6449_v39  ;;  %v1455_v48 = vsel %vm1327_vm7, %v1176_v49, %v1391_v51 }
 0x2a7   : > { %v1182_v8 = vpop.f32.mrf.mxu1  ;;  %v6455_v36 = vsel %vm1519_vm8, %v1455_v48, -1e+30  ;;  %vm1525_vm7 = vcmp.gt.f32.partialorder %v403_v7, 0.0  ;;  %vm1526_vm8 = vcmp.gt.f32.partialorder %v404_v10, 0.0 }
 0x2a8   : > { %vm1329_vm11 = vcmp.ge.f32.partialorder %v1182_v8, 0.0  ;;  %v1393_v43 = vmul.f32 0.2, %v1182_v8  ;;  %1655 = vmax.xlane.f32.xlu1 %v1654_v13  ;;  %v1456_v1 = vsel %vm1328_vm10, %v1178_v33, %v1392_v11 }
 0x2a9   : > { %v1184_v3 = vpop.f32.mrf.mxu1  ;;  %v6457_v38 = vsel %vm1520_vm9, %v1456_v1, -1e+30 }
 0x2aa   : > { %v1394_v52 = vmul.f32 0.2, %v1184_v3  ;;  %v1657_v54 = vmax.f32 %v6455_v36, %v6457_v38  ;;  %vm1330_vm14 = vcmp.ge.f32.partialorder %v1184_v3, 0.0  ;;  %v1457_v26 = vsel %vm1329_vm11, %v1182_v8, %v1393_v43  ;;  %v411_v8 = vld [vmem:[%s5855_s24 + $0x1e0] sm:$0xff]  ;;  %v412_v43 = vld [vmem:[%s5855_s24 + $0x1e8] sm:$0xff] }
 0x2ab   : > { %v1188_v63 = vpop.f32.mrf.mxu1  ;;  %v6463_v34 = vsel %vm1521_vm12, %v1457_v26, -1e+30  ;;  %vm1527_vm11 = vcmp.gt.f32.partialorder %v407_v45, 0.0  ;;  %vm1528_vm12 = vcmp.gt.f32.partialorder %v408_v47, 0.0 }
 0x2ac   : > { %vm1331_vm15 = vcmp.ge.f32.partialorder %v1188_v63, 0.0  ;;  %v1395_v59 = vmul.f32 0.2, %v1188_v63  ;;  %1658 = vmax.xlane.f32.xlu0 %v1657_v54  ;;  %v1458_v24 = vsel %vm1330_vm14, %v1184_v3, %v1394_v52 }
 0x2ad   : > { %v1190_v29 = vpop.f32.mrf.mxu1  ;;  %v6465_v21 = vsel %vm1522_vm13, %v1458_v24, -1e+30  ;;  %v415_v24 = vld [vmem:[%s5855_s24 + $0x200] sm:$0xff] }
 0x2ae   : > { %vm1332_vm2 = vcmp.ge.f32.partialorder %v1190_v29, 0.0  ;;  %v1396_v23 = vmul.f32 0.2, %v1190_v29  ;;  %v1660_v37 = vmax.f32 %v6463_v34, %v6465_v21  ;;  %v1459_v18 = vsel %vm1331_vm15, %v1188_v63, %v1395_v59 }
 0x2af   : > { %v1194_v12 = vpop.f32.mrf.mxu1  ;;  %v6471_v22 = vsel %vm1523_vm0, %v1459_v18, -1e+30  ;;  %vm1529_vm15 = vcmp.gt.f32.partialorder %v411_v8, 0.0  ;;  %vm1530_vm0 = vcmp.gt.f32.partialorder %v412_v43, 0.0  ;;  %v424_v8 = vld [vmem:[%s5855_s24 + $0x248] sm:$0xff] }
 0x2b0   : > { %vm1333_vm6 = vcmp.ge.f32.partialorder %v1194_v12, 0.0  ;;  %v1397_v15 = vmul.f32 0.2, %v1194_v12  ;;  %1661 = vmax.xlane.f32.xlu1 %v1660_v37  ;;  %v1460_v17 = vsel %vm1332_vm2, %v1190_v29, %v1396_v23  ;;  %v416_v29 = vld [vmem:[%s5855_s24 + $0x208] sm:$0xff] }
 0x2b1   : > { %v1196_v20 = vpop.f32.mrf.mxu1  ;;  %v6473_v25 = vsel %vm1524_vm1, %v1460_v17, -1e+30 }
 0x2b2   : > { %v1398_v46 = vmul.f32 0.2, %v1196_v20  ;;  %v1663_v40 = vmax.f32 %v6471_v22, %v6473_v25  ;;  %vm1334_vm9 = vcmp.ge.f32.partialorder %v1196_v20, 0.0  ;;  %v1461_v42 = vsel %vm1333_vm6, %v1194_v12, %v1397_v15 }
 0x2b3   : > { %v1200_v49 = vpop.f32.mrf.mxu1  ;;  %v6479_v11 = vsel %vm1525_vm7, %v1461_v42, -1e+30  ;;  %vm1531_vm6 = vcmp.gt.f32.partialorder %v415_v24, 0.0  ;;  %vm1532_vm7 = vcmp.gt.f32.partialorder %v416_v29, 0.0  ;;  %v427_v29 = vld [vmem:[%s5855_s24 + $0x260] sm:$0xff] }
 0x2b4   : > { %vm1335_vm10 = vcmp.ge.f32.partialorder %v1200_v49, 0.0  ;;  %v1399_v51 = vmul.f32 0.2, %v1200_v49  ;;  %1664 = vmax.xlane.f32.xlu0 %v1663_v40  ;;  %v1462_v53 = vsel %vm1334_vm9, %v1196_v20, %v1398_v46  ;;  %v419_v46 = vld [vmem:[%s5855_s24 + $0x220] sm:$0xff]  ;;  %v420_v40 = vld [vmem:[%s5855_s24 + $0x228] sm:$0xff] }
 0x2b5   : > { %v1202_v33 = vpop.f32.mrf.mxu1  ;;  %v6481_v13 = vsel %vm1526_vm8, %v1462_v53, -1e+30 }
 0x2b6   : > { %vm1336_vm13 = vcmp.ge.f32.partialorder %v1202_v33, 0.0  ;;  %v1400_v48 = vmul.f32 0.2, %v1202_v33  ;;  %v1666_v14 = vmax.f32 %v6479_v11, %v6481_v13  ;;  %v1463_v6 = vsel %vm1335_vm10, %v1200_v49, %v1399_v51 }
 0x2b7   : > { %v1206_v1 = vpop.f32.mrf.mxu1  ;;  %v6487_v26 = vsel %vm1527_vm11, %v1463_v6, -1e+30  ;;  %vm1533_vm10 = vcmp.gt.f32.partialorder %v419_v46, 0.0  ;;  %vm1534_vm11 = vcmp.gt.f32.partialorder %v420_v40, 0.0  ;;  %v423_v6 = vld [vmem:[%s5855_s24 + $0x240] sm:$0xff] }
 0x2b8   : > { %vm1337_vm14 = vcmp.ge.f32.partialorder %v1206_v1, 0.0  ;;  %v1401_v3 = vmul.f32 0.2, %v1206_v1  ;;  %1667 = vmax.xlane.f32.xlu1 %v1666_v14  ;;  %v1464_v52 = vsel %vm1336_vm13, %v1202_v33, %v1400_v48 }
 0x2b9   : > { %v1208_v54 = vpop.f32.mrf.mxu1  ;;  %v6489_v31 = vsel %vm1528_vm12, %v1464_v52, -1e+30 }
 0x2ba   : > { %v1402_v4 = vmul.f32 0.2, %v1208_v54  ;;  %v1669_v63 = vmax.f32 %v6487_v26, %v6489_v31  ;;  %vm1338_vm1 = vcmp.ge.f32.partialorder %v1208_v54, 0.0  ;;  %v1465_v59 = vsel %vm1337_vm14, %v1206_v1, %v1401_v3 }
 0x2bb   : > { %v1212_v23 = vpop.f32.mrf.mxu1  ;;  %v6495_v10 = vsel %vm1529_vm15, %v1465_v59, -1e+30  ;;  %vm1535_vm14 = vcmp.gt.f32.partialorder %v423_v6, 0.0  ;;  %vm1536_vm15 = vcmp.gt.f32.partialorder %v424_v8, 0.0 }
 0x2bc   : > { %vm1339_vm2 = vcmp.ge.f32.partialorder %v1212_v23, 0.0  ;;  %v1403_v37 = vmul.f32 0.2, %v1212_v23  ;;  %1670 = vmax.xlane.f32.xlu0 %v1669_v63  ;;  %v1466_v18 = vsel %vm1338_vm1, %v1208_v54, %v1402_v4 }
 0x2bd   : > { %v1214_v7 = vpop.f32.mrf.mxu1  ;;  %v6497_v12 = vsel %vm1530_vm0, %v1466_v18, -1e+30 }
 0x2be   : > { %vm1340_vm8 = vcmp.ge.f32.partialorder %v1214_v7, 0.0  ;;  %v1404_v15 = vmul.f32 0.2, %v1214_v7  ;;  %v1672_v17 = vmax.f32 %v6495_v10, %v6497_v12  ;;  %v1467_v20 = vsel %vm1339_vm2, %v1212_v23, %v1403_v37  ;;  %v428_v23 = vld [vmem:[%s5855_s24 + $0x268] sm:$0xff] }
 0x2bf   : > { %v1218_v42 = vpop.f32.mrf.mxu1  ;;  %v6503_v51 = vsel %vm1531_vm6, %v1467_v20, -1e+30  ;;  %vm1537_vm2 = vcmp.gt.f32.partialorder %v427_v29, 0.0  ;;  %vm1538_vm6 = vcmp.gt.f32.partialorder %v428_v23, 0.0 }
 0x2c0   : > { %vm1341_vm9 = vcmp.ge.f32.partialorder %v1218_v42, 0.0  ;;  %v1405_v45 = vmul.f32 0.2, %v1218_v42  ;;  %1673 = vmax.xlane.f32.xlu1 %v1672_v17  ;;  %v1468_v47 = vsel %vm1340_vm8, %v1214_v7, %v1404_v15 }
 0x2c1   : > { %v1220_v49 = vpop.f32.mrf.mxu1  ;;  %v6505_v53 = vsel %vm1532_vm7, %v1468_v47, -1e+30  ;;  %v432_v47 = vld [vmem:[%s5855_s24 + $0x288] sm:$0xff] }
 0x2c2   : > { %v1406_v33 = vmul.f32 0.2, %v1220_v49  ;;  %v1675_v48 = vmax.f32 %v6503_v51, %v6505_v53  ;;  %vm1342_vm12 = vcmp.ge.f32.partialorder %v1220_v49, 0.0  ;;  %v1469_v14 = vsel %vm1341_vm9, %v1218_v42, %v1405_v45  ;;  %v431_v45 = vld [vmem:[%s5855_s24 + $0x280] sm:$0xff] }
 0x2c3   : > { %v1224_v43 = vpop.f32.mrf.mxu1  ;;  %v6511_v54 = vsel %vm1533_vm10, %v1469_v14, -1e+30  ;;  %vm1539_vm9 = vcmp.gt.f32.partialorder %v431_v45, 0.0  ;;  %vm1540_vm10 = vcmp.gt.f32.partialorder %v432_v47, 0.0 }
 0x2c4   : > { %vm1343_vm13 = vcmp.ge.f32.partialorder %v1224_v43, 0.0  ;;  %v1407_v1 = vmul.f32 0.2, %v1224_v43  ;;  %1676 = vmax.xlane.f32.xlu0 %v1675_v48  ;;  %v1470_v3 = vsel %vm1342_vm12, %v1220_v49, %v1406_v33 }
 0x2c5   : > { %v1226_v52 = vpop.f32.mrf.mxu1  ;;  %v6513_v4 = vsel %vm1534_vm11, %v1470_v3, -1e+30 }
 0x2c6   : > { %vm1344_vm0 = vcmp.ge.f32.partialorder %v1226_v52, 0.0  ;;  %v1408_v63 = vmul.f32 0.2, %v1226_v52  ;;  %v1678_v59 = vmax.f32 %v6511_v54, %v6513_v4  ;;  %v1471_v24 = vsel %vm1343_vm13, %v1224_v43, %v1407_v1 }
 0x2c7   : > { %v1230_v37 = vpop.f32.mrf.mxu1  ;;  %v6519_v17 = vsel %vm1535_vm14, %v1471_v24, -1e+30 }
 0x2c8   : > { %vm1345_vm1 = vcmp.ge.f32.partialorder %v1230_v37, 0.0  ;;  %v1409_v18 = vmul.f32 0.2, %v1230_v37  ;;  %1679 = vmax.xlane.f32.xlu1 %v1678_v59  ;;  %v1472_v7 = vsel %vm1344_vm0, %v1226_v52, %v1408_v63  ;;  %v435_v52 = vld [vmem:[%s5855_s24 + $0x2a0] sm:$0xff]  ;;  %v436_v63 = vld [vmem:[%s5855_s24 + $0x2a8] sm:$0xff] }
 0x2c9   : > { %v1232_v15 = vpop.f32.mrf.mxu1  ;;  %v6521_v20 = vsel %vm1536_vm15, %v1472_v7, -1e+30  ;;  %vm1541_vm13 = vcmp.gt.f32.partialorder %v435_v52, 0.0  ;;  %vm1542_vm14 = vcmp.gt.f32.partialorder %v436_v63, 0.0  ;;  %v443_v52 = vld [vmem:[%s5855_s24 + $0x2e0] sm:$0xff]  ;;  %v444_v63 = vld [vmem:[%s5855_s24 + $0x2e8] sm:$0xff] }
 0x2ca   : > { %v1410_v46 = vmul.f32 0.2, %v1232_v15  ;;  %v1681_v40 = vmax.f32 %v6519_v17, %v6521_v20  ;;  %vm1346_vm7 = vcmp.ge.f32.partialorder %v1232_v15, 0.0  ;;  %v1473_v42 = vsel %vm1345_vm1, %v1230_v37, %v1409_v18 }
 0x2cb   : > { %v1236_v49 = vpop.f32.mrf.mxu1  ;;  %v6527_v6 = vsel %vm1537_vm2, %v1473_v42, -1e+30  ;;  %v440_v42 = vld [vmem:[%s5855_s24 + $0x2c8] sm:$0xff] }
 0x2cc   : > { %vm1347_vm8 = vcmp.ge.f32.partialorder %v1236_v49, 0.0  ;;  %v1411_v33 = vmul.f32 0.2, %v1236_v49  ;;  %1682 = vmax.xlane.f32.xlu0 %v1681_v40  ;;  %v1474_v48 = vsel %vm1346_vm7, %v1232_v15, %v1410_v46  ;;  %v439_v40 = vld [vmem:[%s5855_s24 + $0x2c0] sm:$0xff]  ;;  %vm1544_vm2 = vcmp.gt.f32.partialorder %v440_v42, 0.0 }
 0x2cd   : > { %v1238_v14 = vpop.f32.mrf.mxu1  ;;  %v6529_v8 = vsel %vm1538_vm6, %v1474_v48, -1e+30  ;;  %vm1543_vm1 = vcmp.gt.f32.partialorder %v439_v40, 0.0 }
 0x2ce   : > { %vm1348_vm11 = vcmp.ge.f32.partialorder %v1238_v14, 0.0  ;;  %v1412_v43 = vmul.f32 0.2, %v1238_v14  ;;  %v1684_v1 = vmax.f32 %v6527_v6, %v6529_v8  ;;  %v1475_v3 = vsel %vm1347_vm8, %v1236_v49, %v1411_v33 }
 0x2cf   : > { %v1242_v59 = vpop.f32.mrf.mxu1  ;;  %v6535_v37 = vsel %vm1539_vm9, %v1475_v3, -1e+30  ;;  %vm1545_vm8 = vcmp.gt.f32.partialorder %v443_v52, 0.0  ;;  %vm1546_vm9 = vcmp.gt.f32.partialorder %v444_v63, 0.0 }
 0x2d0   : > { %vm1349_vm12 = vcmp.ge.f32.partialorder %v1242_v59, 0.0  ;;  %v1413_v24 = vmul.f32 0.2, %v1242_v59  ;;  %1685 = vmax.xlane.f32.xlu1 %v1684_v1  ;;  %v1476_v29 = vsel %vm1348_vm11, %v1238_v14, %v1412_v43 }
 0x2d1   : > { %v1244_v23 = vpop.f32.mrf.mxu1  ;;  %v6537_v18 = vsel %vm1540_vm10, %v1476_v29, -1e+30 }
 0x2d2   : > { %v1414_v7 = vmul.f32 0.2, %v1244_v23  ;;  %v1687_v15 = vmax.f32 %v6535_v37, %v6537_v18  ;;  %vm1350_vm15 = vcmp.ge.f32.partialorder %v1244_v23, 0.0  ;;  %v1477_v46 = vsel %vm1349_vm12, %v1242_v59, %v1413_v24 }
 0x2d3   : > { %v1248_v45 = vpop.f32.mrf.mxu1  ;;  %v6543_v48 = vsel %vm1541_vm13, %v1477_v46, -1e+30 }
 0x2d4   : > { %vm1351_vm0 = vcmp.ge.f32.partialorder %v1248_v45, 0.0  ;;  %v1415_v47 = vmul.f32 0.2, %v1248_v45  ;;  %1688 = vmax.xlane.f32.xlu0 %v1687_v15  ;;  %v1478_v49 = vsel %vm1350_vm15, %v1244_v23, %v1414_v7 }
 0x2d5   : > { %v1250_v33 = vpop.f32.mrf.mxu1  ;;  %v6545_v14 = vsel %vm1542_vm14, %v1478_v49, -1e+30 }
 0x2d6   : > { %vm1352_vm6 = vcmp.ge.f32.partialorder %v1250_v33, 0.0  ;;  %v1416_v43 = vmul.f32 0.2, %v1250_v33  ;;  %v1690_v1 = vmax.f32 %v6543_v48, %v6545_v14  ;;  %v1479_v3 = vsel %vm1351_vm0, %v1248_v45, %v1415_v47  ;;  %v447_v45 = vld [vmem:[%s5855_s24 + $0x300] sm:$0xff]  ;;  %v448_v47 = vld [vmem:[%s5855_s24 + $0x308] sm:$0xff] }
 0x2d7   : > { %v1254_v59 = vpop.f32.mrf.mxu1  ;;  %v6551_v7 = vsel %vm1543_vm1, %v1479_v3, -1e+30  ;;  %vm1547_vm12 = vcmp.gt.f32.partialorder %v447_v45, 0.0  ;;  %vm1548_vm13 = vcmp.gt.f32.partialorder %v448_v47, 0.0  ;;  %vm1550_vm1 = vcmp.gt.f32.partialorder %v452_v57, 0.0 }
 0x2d8   : > { %vm1353_vm7 = vcmp.ge.f32.partialorder %v1254_v59, 0.0  ;;  %v1417_v24 = vmul.f32 0.2, %v1254_v59  ;;  %1691 = vmax.xlane.f32.xlu1 %v1690_v1  ;;  %v1480_v29 = vsel %vm1352_vm6, %v1250_v33, %v1416_v43 }
 0x2d9   : > { %v1256_v23 = vpop.f32.mrf.mxu1  ;;  %v6553_v15 = vsel %vm1544_vm2, %v1480_v29, -1e+30  ;;  %v451_v29 = vld [vmem:[%s5855_s24 + $0x320] sm:$0xff] }
 0x2da   : > { %7983 = vst [vmem:[#allocation8_spill] sm:$0xff] %v6553_v15  ;;  %v1418_v46 = vmul.f32 0.2, %v1256_v23  ;;  %v1693_v40 = vmax.f32 %v6551_v7, %v6553_v15  ;;  %vm1354_vm10 = vcmp.ge.f32.partialorder %v1256_v23, 0.0  ;;  %v1481_v42 = vsel %vm1353_vm7, %v1254_v59, %v1417_v24 }
 0x2db   : > { %v1260_v49 = vpop.f32.mrf.mxu1  ;;  %v6559_v3 = vsel %vm1545_vm8, %v1481_v42, -1e+30  ;;  %vm1549_vm0 = vcmp.gt.f32.partialorder %v451_v29, 0.0 }
 0x2dc   : > { %vm1355_vm11 = vcmp.ge.f32.partialorder %v1260_v49, 0.0  ;;  %v1419_v33 = vmul.f32 0.2, %v1260_v49  ;;  %1694 = vmax.xlane.f32.xlu0 %v1693_v40  ;;  %v1482_v43 = vsel %vm1354_vm10, %v1256_v23, %v1418_v46  ;;  %7984 = vst [vmem:[#allocation9_spill] sm:$0xff] %v6559_v3 }
 0x2dd   : > { %v1262_v1 = vpop.f32.mrf.mxu1  ;;  %v6561_v52 = vsel %vm1546_vm9, %v1482_v43, -1e+30  ;;  %v455_v43 = vld [vmem:[%s5855_s24 + $0x340] sm:$0xff] }
 0x2de   : > { %7985 = vst [vmem:[#allocation6_spill] sm:$0xff] %v6561_v52  ;;  %vm1356_vm14 = vcmp.ge.f32.partialorder %v1262_v1, 0.0  ;;  %v1420_v63 = vmul.f32 0.2, %v1262_v1  ;;  %v1696_v59 = vmax.f32 %v6559_v3, %v6561_v52  ;;  %v1483_v24 = vsel %vm1355_vm11, %v1260_v49, %v1419_v33  ;;  %v456_v52 = vld [vmem:[%s5855_s24 + $0x348] sm:$0xff] }
 0x2df   : > { %v1266_v44 = vpop.f32.mrf.mxu1  ;;  %v6567_v42 = vsel %vm1547_vm12, %v1483_v24, -1e+30  ;;  %vm1551_vm7 = vcmp.gt.f32.partialorder %v455_v43, 0.0  ;;  %vm1552_vm8 = vcmp.gt.f32.partialorder %v456_v52, 0.0 }
 0x2e0   : > { %vm1357_vm15 = vcmp.ge.f32.partialorder %v1266_v44, 0.0  ;;  %v1421_v23 = vmul.f32 0.2, %v1266_v44  ;;  %1697 = vmax.xlane.f32.xlu1 %v1696_v59  ;;  %v1484_v46 = vsel %vm1356_vm14, %v1262_v1, %v1420_v63  ;;  %7986 = vst [vmem:[#allocation7_spill] sm:$0xff] %v6567_v42 }
 0x2e1   : > { %v1268_v40 = vpop.f32.mrf.mxu1  ;;  %v6569_v45 = vsel %vm1548_vm13, %v1484_v46, -1e+30  ;;  %v459_v46 = vld [vmem:[%s5855_s24 + $0x360] sm:$0xff] }
 0x2e2   : > { %7987 = vst [vmem:[#allocation10_spill] sm:$0xff] %v6569_v45  ;;  %v1422_v47 = vmul.f32 0.2, %v1268_v40  ;;  %v1699_v49 = vmax.f32 %v6567_v42, %v6569_v45  ;;  %vm1358_vm2 = vcmp.ge.f32.partialorder %v1268_v40, 0.0  ;;  %v1485_v33 = vsel %vm1357_vm15, %v1266_v44, %v1421_v23  ;;  %v460_v45 = vld [vmem:[%s5855_s24 + $0x368] sm:$0xff] }
 0x2e3   : > { %v1272_v3 = vpop.f32.mrf.mxu1  ;;  %v6575_v24 = vsel %vm1549_vm0, %v1485_v33, -1e+30  ;;  %vm1553_vm11 = vcmp.gt.f32.partialorder %v459_v46, 0.0  ;;  %vm1554_vm12 = vcmp.gt.f32.partialorder %v460_v45, 0.0 }
 0x2e4   : > { %vm1359_vm6 = vcmp.ge.f32.partialorder %v1272_v3, 0.0  ;;  %v1423_v1 = vmul.f32 0.2, %v1272_v3  ;;  %1700 = vmax.xlane.f32.xlu0 %v1699_v49  ;;  %v1486_v63 = vsel %vm1358_vm2, %v1268_v40, %v1422_v47  ;;  %7988 = vst [vmem:[#allocation11_spill] sm:$0xff] %v6575_v24 }
 0x2e5   : > { %v1274_v59 = vpop.f32.mrf.mxu1  ;;  %v6577_v29 = vsel %vm1550_vm1, %v1486_v63, -1e+30  ;;  %v463_v63 = vld [vmem:[%s5855_s24 + $0x380] sm:$0xff] }
 0x2e6   : > { %7989 = vst [vmem:[#allocation12_spill] sm:$0xff] %v6577_v29  ;;  %vm1360_vm9 = vcmp.ge.f32.partialorder %v1274_v59, 0.0  ;;  %v1424_v57 = vmul.f32 0.2, %v1274_v59  ;;  %v1702_v44 = vmax.f32 %v6575_v24, %v6577_v29  ;;  %v1487_v23 = vsel %vm1359_vm6, %v1272_v3, %v1423_v1  ;;  %v464_v29 = vld [vmem:[%s5855_s24 + $0x388] sm:$0xff] }
 0x2e7   : > { %v1278_v42 = vpop.f32.mrf.mxu1  ;;  %v6583_v33 = vsel %vm1551_vm7, %v1487_v23, -1e+30  ;;  %vm1555_vm15 = vcmp.gt.f32.partialorder %v463_v63, 0.0  ;;  %vm1556_vm0 = vcmp.gt.f32.partialorder %v464_v29, 0.0 }
 0x2e8   : > { %vm1361_vm10 = vcmp.ge.f32.partialorder %v1278_v42, 0.0  ;;  %v1425_v40 = vmul.f32 0.2, %v1278_v42  ;;  %1703 = vmax.xlane.f32.xlu1 %v1702_v44  ;;  %v1488_v47 = vsel %vm1360_vm9, %v1274_v59, %v1424_v57  ;;  %7990 = vst [vmem:[#allocation13_spill] sm:$0xff] %v6583_v33 }
 0x2e9   : > { %v1280_v49 = vpop.f32.mrf.mxu1  ;;  %v6585_v43 = vsel %vm1552_vm8, %v1488_v47, -1e+30  ;;  %v467_v47 = vld [vmem:[%s5855_s24 + $0x3a0] sm:$0xff] }
 0x2ea   : > { %7991 = vst [vmem:[#allocation14_spill] sm:$0xff] %v6585_v43  ;;  %v1426_v52 = vmul.f32 0.2, %v1280_v49  ;;  %v1705_v3 = vmax.f32 %v6583_v33, %v6585_v43  ;;  %vm1362_vm13 = vcmp.ge.f32.partialorder %v1280_v49, 0.0  ;;  %v1489_v1 = vsel %vm1361_vm10, %v1278_v42, %v1425_v40  ;;  %v468_v43 = vld [vmem:[%s5855_s24 + $0x3a8] sm:$0xff] }
 0x2eb   : > { %v1284_v24 = vpop.f32.mrf.mxu1  ;;  %v6591_v23 = vsel %vm1553_vm11, %v1489_v1, -1e+30  ;;  %vm1557_vm6 = vcmp.gt.f32.partialorder %v467_v47, 0.0  ;;  %vm1558_vm7 = vcmp.gt.f32.partialorder %v468_v43, 0.0 }
 0x2ec   : > { %vm1363_vm14 = vcmp.ge.f32.partialorder %v1284_v24, 0.0  ;;  %v1427_v59 = vmul.f32 0.2, %v1284_v24  ;;  %1706 = vmax.xlane.f32.xlu0 %v1705_v3  ;;  %v1490_v57 = vsel %vm1362_vm13, %v1280_v49, %v1426_v52  ;;  %7992 = vst [vmem:[#allocation15_spill] sm:$0xff] %v6591_v23 }
 0x2ed   : > { %v1286_v44 = vpop.f32.mrf.mxu1  ;;  %v6593_v46 = vsel %vm1554_vm12, %v1490_v57, -1e+30  ;;  %v471_v57 = vld [vmem:[%s5855_s24 + $0x3c0] sm:$0xff] }
 0x2ee   : > { %7993 = vst [vmem:[#allocation16_spill] sm:$0xff] %v6593_v46  ;;  %vm1364_vm1 = vcmp.ge.f32.partialorder %v1286_v44, 0.0  ;;  %v1428_v45 = vmul.f32 0.2, %v1286_v44  ;;  %v1708_v42 = vmax.f32 %v6591_v23, %v6593_v46  ;;  %v1491_v40 = vsel %vm1363_vm14, %v1284_v24, %v1427_v59  ;;  %v472_v46 = vld [vmem:[%s5855_s24 + $0x3c8] sm:$0xff] }
 0x2ef   : > { %v1290_v33 = vpop.f32.mrf.mxu1  ;;  %v6599_v1 = vsel %vm1555_vm15, %v1491_v40, -1e+30  ;;  %vm1559_vm10 = vcmp.gt.f32.partialorder %v471_v57, 0.0  ;;  %vm1560_vm11 = vcmp.gt.f32.partialorder %v472_v46, 0.0 }
 0x2f0   : > { %vm1365_vm2 = vcmp.ge.f32.partialorder %v1290_v33, 0.0  ;;  %v1429_v49 = vmul.f32 0.2, %v1290_v33  ;;  %1709 = vmax.xlane.f32.xlu1 %v1708_v42  ;;  %v1492_v52 = vsel %vm1364_vm1, %v1286_v44, %v1428_v45  ;;  %7994 = vst [vmem:[#allocation17_spill] sm:$0xff] %v6599_v1 }
 0x2f1   : > { %v1292_v3 = vpop.f32.mrf.mxu1  ;;  %v6601_v63 = vsel %vm1556_vm0, %v1492_v52, -1e+30  ;;  %v475_v52 = vld [vmem:[%s5855_s24 + $0x3e0] sm:$0xff] }
 0x2f2   : > { %7995 = vst [vmem:[#allocation18_spill] sm:$0xff] %v6601_v63  ;;  %v1430_v29 = vmul.f32 0.2, %v1292_v3  ;;  %v1711_v24 = vmax.f32 %v6599_v1, %v6601_v63  ;;  %vm1366_vm8 = vcmp.ge.f32.partialorder %v1292_v3, 0.0  ;;  %v1493_v59 = vsel %vm1365_vm2, %v1290_v33, %v1429_v49  ;;  %v476_v63 = vld [vmem:[%s5855_s24 + $0x3e8] sm:$0xff] }
 0x2f3   : > { %v1296_v23 = vpop.f32.mrf.mxu1  ;;  %v6607_v40 = vsel %vm1557_vm6, %v1493_v59, -1e+30  ;;  %vm1561_vm14 = vcmp.gt.f32.partialorder %v475_v52, 0.0  ;;  %vm1562_vm15 = vcmp.gt.f32.partialorder %v476_v63, 0.0 }
 0x2f4   : > { %vm1367_vm9 = vcmp.ge.f32.partialorder %v1296_v23, 0.0  ;;  %v1431_v44 = vmul.f32 0.2, %v1296_v23  ;;  %1712 = vmax.xlane.f32.xlu0 %v1711_v24  ;;  %v1494_v45 = vsel %vm1366_vm8, %v1292_v3, %v1430_v29 }
 0x2f5   : > { %v1298_v42 = vpop.f32.mrf.mxu1  ;;  %v6609_v47 = vsel %vm1558_vm7, %v1494_v45, -1e+30 }
 0x2f6   : > { %7996 = vst [vmem:[#allocation19_spill] sm:$0xff] %v6609_v47  ;;  %vm1368_vm12 = vcmp.ge.f32.partialorder %v1298_v42, 0.0  ;;  %v1432_v43 = vmul.f32 0.2, %v1298_v42  ;;  %v1714_v33 = vmax.f32 %v6607_v40, %v6609_v47  ;;  %v1495_v49 = vsel %vm1367_vm9, %v1296_v23, %v1431_v44 }
 0x2f7   : > { %v1302_v1 = vpop.f32.mrf.mxu1  ;;  %v6615_v24 = vsel %vm1559_vm10, %v1495_v49, -1e+30 }
 0x2f8   : > { %vm1369_vm13 = vcmp.ge.f32.partialorder %v1302_v1, 0.0  ;;  %v1433_v15 = vmul.f32 0.2, %v1302_v1  ;;  %1715 = vmax.xlane.f32.xlu1 %v1714_v33  ;;  %v1496_v3 = vsel %vm1368_vm12, %v1298_v42, %v1432_v43 }
 0x2f9   : > { %v1304_v29 = vpop.f32.mrf.mxu1  ;;  %v6617_v59 = vsel %vm1560_vm11, %v1496_v3, -1e+30 }
 0x2fa   : > { %v1434_v46 = vmul.f32 0.2, %v1304_v29  ;;  %v1717_v57 = vmax.f32 %v6615_v24, %v6617_v59  ;;  %vm1370_vm0 = vcmp.ge.f32.partialorder %v1304_v29, 0.0  ;;  %v1497_v23 = vsel %vm1369_vm13, %v1302_v1, %v1433_v15 }
 0x2fb   : > { %v6621_v45 = vsel %vm1561_vm14, %v1497_v23, -1e+30 }
 0x2fc   : > { %1718 = vmax.xlane.f32.xlu0 %v1717_v57  ;;  %v1498_v44 = vsel %vm1370_vm0, %v1304_v29, %v1434_v46 }
 0x2fd   : > { %v6623_v47 = vsel %vm1562_vm15, %v1498_v44, -1e+30 }
 0x2fe   : > { %v1720_v42 = vmax.f32 %v6621_v45, %v6623_v47 }
 0x300   : > { %1721 = vmax.xlane.f32.xlu1 %v1720_v42 }
 0x30d   : > { %v1629_v43 = vpop.xlane.xlu0 %1628 }
 0x30e   : > { %v1723_v33 = vsub.f32 %v6375_v58, %v1629_v43  ;;  %v1724_v63 = vsub.f32 %v6377_v61, %v1629_v43 }
 0x310   : > { %v1787_v49 = vmul.f32 1.442695, %v1723_v33  ;;  %v1789_v52 = vmul.f32 1.442695, %v1724_v63 }
 0x311   : > { %v1632_v3 = vpop.xlane.xlu0 %1631 }
 0x312   : > { %5266 = vpow2.f32 %v1787_v49  ;;  %v1725_v15 = vsub.f32 %v6383_v19, %v1632_v3  ;;  %v1726_v1 = vsub.f32 %v6385_v56, %v1632_v3 }
 0x313   : > { %5268 = vpow2.f32 %v1789_v52 }
 0x314   : > { %v1791_v29 = vmul.f32 1.442695, %v1725_v15  ;;  %v1793_v46 = vmul.f32 1.442695, %v1726_v1 }
 0x315   : > { %v1635_v57 = vpop.xlane.xlu1 %1634 }
 0x316   : > { %5270 = vpow2.f32 %v1791_v29  ;;  %v1727_v23 = vsub.f32 %v6391_v2, %v1635_v57  ;;  %v1728_v44 = vsub.f32 %v6393_v5, %v1635_v57 }
 0x317   : > { %5272 = vpow2.f32 %v1793_v46 }
 0x318   : > { %v1795_v58 = vmul.f32 1.442695, %v1727_v23  ;;  %v1797_v61 = vmul.f32 1.442695, %v1728_v44 }
 0x319   : > { %v1638_v42 = vpop.xlane.xlu1 %1637 }
 0x31a   : > { %5274 = vpow2.f32 %v1795_v58  ;;  %v1729_v43 = vsub.f32 %v6399_v30, %v1638_v42  ;;  %v1730_v19 = vsub.f32 %v6401_v32, %v1638_v42 }
 0x31b   : > { %5276 = vpow2.f32 %v1797_v61 }
 0x31c   : > { %v1799_v56 = vmul.f32 1.442695, %v1729_v43  ;;  %v1801_v33 = vmul.f32 1.442695, %v1730_v19 }
 0x31d   : > { %v1641_v63 = vpop.xlane.xlu0 %1640 }
 0x31e   : > { %5278 = vpow2.f32 %v1799_v56  ;;  %v1731_v49 = vsub.f32 %v6407_v55, %v1641_v63  ;;  %v1732_v2 = vsub.f32 %v6409_v28, %v1641_v63 }
 0x31f   : > { %v5267_v52 = vpop.eup %5266  ;;  %5280 = vpow2.f32 %v1801_v33 }
 0x320   : > { %v5269_v5 = vpop.eup %5268  ;;  %v1803_v3 = vmul.f32 1.442695, %v1731_v49  ;;  %v1805_v15 = vmul.f32 1.442695, %v1732_v2 }
 0x321   : > { %v1644_v1 = vpop.xlane.xlu1 %1643  ;;  %v1915_v29 = vadd.f32 %v5269_v5, %v5267_v52 }
 0x322   : > { %5282 = vpow2.f32 %v1803_v3  ;;  %v1733_v30 = vsub.f32 %v6415_v41, %v1644_v1  ;;  %v1734_v32 = vsub.f32 %v6417_v60, %v1644_v1 }
 0x323   : > { %v5271_v46 = vpop.eup %5270  ;;  %5284 = vpow2.f32 %v1805_v15  ;;  %1916 = vadd.xlane.f32.xlu0 %v1915_v29 }
 0x324   : > { %v5273_v57 = vpop.eup %5272  ;;  %v1807_v23 = vmul.f32 1.442695, %v1733_v30  ;;  %v1809_v55 = vmul.f32 1.442695, %v1734_v32  ;;  %v2011_v44 = vpack.c.bf16 %v5271_v46, %v5267_v52 }
 0x325   : > { %v1647_v28 = vpop.xlane.xlu0 %1646  ;;  %v2012_v58 = vpack.c.bf16 %v5273_v57, %v5269_v5  ;;  %v1918_v61 = vadd.f32 %v5273_v57, %v5271_v46 }
 0x326   : > { %5286 = vpow2.f32 %v1807_v23  ;;  %v1735_v42 = vsub.f32 %v6423_v9, %v1647_v28  ;;  %v1736_v43 = vsub.f32 %v6425_v62, %v1647_v28 }
 0x327   : > { %v5275_v19 = vpop.eup %5274  ;;  %5288 = vpow2.f32 %v1809_v55  ;;  %2091 = vmatprep.mubr.bf16.mxu0 %v2012_v58  ;;  %1919 = vadd.xlane.f32.xlu1 %v1918_v61 }
 0x328   : > { %v5277_v41 = vpop.eup %5276  ;;  %v1811_v60 = vmul.f32 1.442695, %v1735_v42  ;;  %v1813_v56 = vmul.f32 1.442695, %v1736_v43  ;;  %2092 = vmatmul.mubr.bf16.vlgmr.msra.gmra.mxu0 %v2011_v44 }
 0x329   : > { %v1650_v33 = vpop.xlane.xlu1 %1649  ;;  %v1921_v63 = vadd.f32 %v5277_v41, %v5275_v19 }
 0x32a   : > { %5290 = vpow2.f32 %v1811_v60  ;;  %v1737_v49 = vsub.f32 %v6431_v50, %v1650_v33  ;;  %v1738_v2 = vsub.f32 %v6433_v16, %v1650_v33 }
 0x32b   : > { %v5279_v52 = vpop.eup %5278  ;;  %5292 = vpow2.f32 %v1813_v56  ;;  %1922 = vadd.xlane.f32.xlu0 %v1921_v63 }
 0x32c   : > { %v5281_v9 = vpop.eup %5280  ;;  %v1815_v62 = vmul.f32 1.442695, %v1737_v49  ;;  %v1817_v5 = vmul.f32 1.442695, %v1738_v2  ;;  %v2013_v3 = vpack.c.bf16 %v5279_v52, %v5275_v19 }
 0x32d   : > { %v1653_v15 = vpop.xlane.xlu0 %1652  ;;  %v2014_v1 = vpack.c.bf16 %v5281_v9, %v5277_v41  ;;  %v1924_v29 = vadd.f32 %v5281_v9, %v5279_v52 }
 0x32e   : > { %5294 = vpow2.f32 %v1815_v62  ;;  %v1739_v30 = vsub.f32 %v6439_v27, %v1653_v15  ;;  %v1740_v32 = vsub.f32 %v6441_v35, %v1653_v15 }
 0x32f   : > { %v5283_v46 = vpop.eup %5282  ;;  %5296 = vpow2.f32 %v1817_v5  ;;  %2099 = vmatprep.mubr.bf16.mxu0 %v2014_v1  ;;  %1925 = vadd.xlane.f32.xlu1 %v1924_v29 }
 0x330   : > { %v5285_v50 = vpop.eup %5284  ;;  %v1819_v16 = vmul.f32 1.442695, %v1739_v30  ;;  %v1821_v57 = vmul.f32 1.442695, %v1740_v32  ;;  %2100 = vmatmul.mubr.bf16.gmra.mxu0 %v2013_v3 }
 0x331   : > { %v1656_v23 = vpop.xlane.xlu1 %1655  ;;  %v1927_v55 = vadd.f32 %v5285_v50, %v5283_v46 }
 0x332   : > { %5298 = vpow2.f32 %v1819_v16  ;;  %v1741_v44 = vsub.f32 %v6447_v0, %v1656_v23  ;;  %v1742_v28 = vsub.f32 %v6449_v39, %v1656_v23 }
 0x333   : > { %v5287_v58 = vpop.eup %5286  ;;  %5300 = vpow2.f32 %v1821_v57  ;;  %1928 = vadd.xlane.f32.xlu0 %v1927_v55 }
 0x334   : > { %v5289_v27 = vpop.eup %5288  ;;  %v1823_v35 = vmul.f32 1.442695, %v1741_v44  ;;  %v1825_v61 = vmul.f32 1.442695, %v1742_v28  ;;  %v2015_v42 = vpack.c.bf16 %v5287_v58, %v5283_v46 }
 0x335   : > { %v1659_v43 = vpop.xlane.xlu0 %1658  ;;  %v1930_v19 = vadd.f32 %v5289_v27, %v5287_v58  ;;  %v2016_v41 = vpack.c.bf16 %v5289_v27, %v5285_v50 }
 0x336   : > { %5302 = vpow2.f32 %v1823_v35  ;;  %v1743_v60 = vsub.f32 %v6455_v36, %v1659_v43  ;;  %v1744_v56 = vsub.f32 %v6457_v38, %v1659_v43 }
 0x337   : > { %v5291_v33 = vpop.eup %5290  ;;  %5304 = vpow2.f32 %v1825_v61  ;;  %1931 = vadd.xlane.f32.xlu1 %v1930_v19  ;;  %2107 = vmatprep.mubr.bf16.mxu0 %v2016_v41 }
 0x338   : > { %v5293_v0 = vpop.eup %5292  ;;  %v1827_v39 = vmul.f32 1.442695, %v1743_v60  ;;  %v1829_v63 = vmul.f32 1.442695, %v1744_v56  ;;  %2108 = vmatmul.mubr.bf16.gmra.mxu0 %v2015_v42 }
 0x339   : > { %v1662_v49 = vpop.xlane.xlu1 %1661  ;;  %v1933_v2 = vadd.f32 %v5293_v0, %v5291_v33 }
 0x33a   : > { %5306 = vpow2.f32 %v1827_v39  ;;  %v1745_v52 = vsub.f32 %v6463_v34, %v1662_v49  ;;  %v1746_v9 = vsub.f32 %v6465_v21, %v1662_v49 }
 0x33b   : > { %v5295_v62 = vpop.eup %5294  ;;  %5308 = vpow2.f32 %v1829_v63  ;;  %1934 = vadd.xlane.f32.xlu0 %v1933_v2 }
 0x33c   : > { %v5297_v36 = vpop.eup %5296  ;;  %v1831_v38 = vmul.f32 1.442695, %v1745_v52  ;;  %v1833_v5 = vmul.f32 1.442695, %v1746_v9  ;;  %v2017_v3 = vpack.c.bf16 %v5295_v62, %v5291_v33 }
 0x33d   : > { %v1665_v15 = vpop.xlane.xlu0 %1664  ;;  %v1936_v1 = vadd.f32 %v5297_v36, %v5295_v62  ;;  %v2018_v29 = vpack.c.bf16 %v5297_v36, %v5293_v0 }
 0x33e   : > { %5310 = vpow2.f32 %v1831_v38  ;;  %v1747_v30 = vsub.f32 %v6471_v22, %v1665_v15  ;;  %v1748_v32 = vsub.f32 %v6473_v25, %v1665_v15 }
 0x33f   : > { %v5299_v46 = vpop.eup %5298  ;;  %5312 = vpow2.f32 %v1833_v5  ;;  %1937 = vadd.xlane.f32.xlu1 %v1936_v1  ;;  %2115 = vmatprep.mubr.bf16.mxu0 %v2018_v29 }
 0x340   : > { %v5301_v34 = vpop.eup %5300  ;;  %v1835_v21 = vmul.f32 1.442695, %v1747_v30  ;;  %v1837_v50 = vmul.f32 1.442695, %v1748_v32  ;;  %2116 = vmatmul.mubr.bf16.gmra.mxu0 %v2017_v3 }
 0x341   : > { %v1668_v16 = vpop.xlane.xlu1 %1667  ;;  %v1939_v57 = vadd.f32 %v5301_v34, %v5299_v46 }
 0x342   : > { %5314 = vpow2.f32 %v1835_v21  ;;  %v1749_v23 = vsub.f32 %v6479_v11, %v1668_v16  ;;  %v1750_v55 = vsub.f32 %v6481_v13, %v1668_v16 }
 0x343   : > { %v5303_v44 = vpop.eup %5302  ;;  %5316 = vpow2.f32 %v1837_v50  ;;  %1940 = vadd.xlane.f32.xlu0 %v1939_v57 }
 0x344   : > { %v5305_v22 = vpop.eup %5304  ;;  %v1839_v25 = vmul.f32 1.442695, %v1749_v23  ;;  %v1841_v28 = vmul.f32 1.442695, %v1750_v55  ;;  %v2019_v58 = vpack.c.bf16 %v5303_v44, %v5299_v46 }
 0x345   : > { %v1671_v27 = vpop.xlane.xlu0 %1670  ;;  %v1942_v35 = vadd.f32 %v5305_v22, %v5303_v44  ;;  %v2020_v61 = vpack.c.bf16 %v5305_v22, %v5301_v34  ;;  %v5234_v22 = vld [vmem:[%s7912_s4 + $0x70] ss:$8 sps:$4 sm:$0xff]  }
 0x346   : > { %5318 = vpow2.f32 %v1839_v25  ;;  %v1751_v42 = vsub.f32 %v6487_v26, %v1671_v27  ;;  %v1752_v43 = vsub.f32 %v6489_v31, %v1671_v27  ;;  %v5239_v27 = vld [vmem:[%s7912_s4 + $0x64] ss:$8 sps:$4 sm:$0xff]  }
 0x347   : > { %v5307_v19 = vpop.eup %5306  ;;  %5320 = vpow2.f32 %v1841_v28  ;;  %1943 = vadd.xlane.f32.xlu1 %v1942_v35  ;;  %2123 = vmatprep.mubr.bf16.mxu0 %v2020_v61 }
 0x348   : > { %v5309_v11 = vpop.eup %5308  ;;  %v1843_v13 = vmul.f32 1.442695, %v1751_v42  ;;  %v1845_v41 = vmul.f32 1.442695, %v1752_v43  ;;  %2124 = vmatmul.mubr.bf16.gmra.mxu0 %v2019_v58 }
 0x349   : > { %v1674_v60 = vpop.xlane.xlu1 %1673  ;;  %v1945_v56 = vadd.f32 %v5309_v11, %v5307_v19 }
 0x34a   : > { %5322 = vpow2.f32 %v1843_v13  ;;  %v1753_v33 = vsub.f32 %v6495_v10, %v1674_v60  ;;  %v1754_v0 = vsub.f32 %v6497_v12, %v1674_v60 }
 0x34b   : > { %v5311_v39 = vpop.eup %5310  ;;  %5324 = vpow2.f32 %v1845_v41  ;;  %1946 = vadd.xlane.f32.xlu0 %v1945_v56  ;;  %v5242_v56 = vld [vmem:[%s7912_s4 + $0x54] ss:$8 sps:$4 sm:$0xff]  }
 0x34c   : > { %v5313_v26 = vpop.eup %5312  ;;  %v1847_v31 = vmul.f32 1.442695, %v1753_v33  ;;  %v1849_v63 = vmul.f32 1.442695, %v1754_v0  ;;  %v2021_v49 = vpack.c.bf16 %v5311_v39, %v5307_v19  ;;  %v5237_v19 = vld [vmem:[%s7912_s4 + $0x60] ss:$8 sps:$4 sm:$0xff]  }
 0x34d   : > { %v1677_v2 = vpop.xlane.xlu0 %1676  ;;  %v1948_v52 = vadd.f32 %v5313_v26, %v5311_v39  ;;  %v2022_v9 = vpack.c.bf16 %v5313_v26, %v5309_v11  ;;  %v5240_v26 = vld [vmem:[%s7912_s4 + $0x50] ss:$8 sps:$4 sm:$0xff]  }
 0x34e   : > { %5326 = vpow2.f32 %v1847_v31  ;;  %v1755_v62 = vsub.f32 %v6503_v51, %v1677_v2  ;;  %v1756_v36 = vsub.f32 %v6505_v53, %v1677_v2  ;;  %v5245_v2 = vld [vmem:[%s7912_s4 + $0x44] ss:$8 sps:$4 sm:$0xff]  }
 0x34f   : > { %v5315_v38 = vpop.eup %5314  ;;  %5328 = vpow2.f32 %v1849_v63  ;;  %1949 = vadd.xlane.f32.xlu1 %v1948_v52  ;;  %2131 = vmatprep.mubr.bf16.mxu0 %v2022_v9 }
 0x350   : > { %v5317_v10 = vpop.eup %5316  ;;  %v1851_v12 = vmul.f32 1.442695, %v1755_v62  ;;  %v1853_v5 = vmul.f32 1.442695, %v1756_v36  ;;  %2132 = vmatmul.mubr.bf16.gmra.mxu0 %v2021_v49 }
 0x351   : > { %v1680_v3 = vpop.xlane.xlu1 %1679  ;;  %v1951_v15 = vadd.f32 %v5317_v10, %v5315_v38 }
 0x352   : > { %5330 = vpow2.f32 %v1851_v12  ;;  %v1757_v1 = vsub.f32 %v6511_v54, %v1680_v3  ;;  %v1758_v29 = vsub.f32 %v6513_v4, %v1680_v3  ;;  %v5236_v54 = vld [vmem:[%s7912_s4 + $0x74] ss:$8 sps:$4 sm:$0xff]  }
 0x353   : > { %v5319_v30 = vpop.eup %5318  ;;  %5332 = vpow2.f32 %v1853_v5  ;;  %1952 = vadd.xlane.f32.xlu0 %v1951_v15  ;;  %2464 = vmatprep.subr.bf16.mxu1 %v5236_v54  ;;  %v7997_v5 = vld [vmem:[#allocation8_spill] sm:$0xff] }
 0x354   : > { %v5321_v51 = vpop.eup %5320  ;;  %v1855_v53 = vmul.f32 1.442695, %v1757_v1  ;;  %v1857_v32 = vmul.f32 1.442695, %v1758_v29  ;;  %v2023_v46 = vpack.c.bf16 %v5319_v30, %v5315_v38  ;;  %2465 = vmatpush1.bf16.msra.mxu1 %v5234_v22  ;;  %v5243_v38 = vld [vmem:[%s7912_s4 + $0x40] ss:$8 sps:$4 sm:$0xff]  }
 0x355   : > { %v1683_v34 = vpop.xlane.xlu0 %1682  ;;  %v1954_v21 = vadd.f32 %v5321_v51, %v5319_v30  ;;  %v2024_v50 = vpack.c.bf16 %v5321_v51, %v5317_v10  ;;  %2466 = vmatprep.subr.bf16.mxu1 %v5239_v27  ;;  %v5248_v1 = vld [vmem:[%s7912_s4 + $0x34] ss:$8 sps:$4 sm:$0xff]  }
 0x356   : > { %5334 = vpow2.f32 %v1855_v53  ;;  %v1759_v16 = vsub.f32 %v6519_v17, %v1683_v34  ;;  %v1760_v57 = vsub.f32 %v6521_v20, %v1683_v34  ;;  %v5246_v53 = vld [vmem:[%s7912_s4 + $0x30] ss:$8 sps:$4 sm:$0xff]  }
 0x357   : > { %v5323_v23 = vpop.eup %5322  ;;  %5336 = vpow2.f32 %v1857_v32  ;;  %1955 = vadd.xlane.f32.xlu1 %v1954_v21  ;;  %2139 = vmatprep.mubr.bf16.mxu0 %v2024_v50  ;;  %v7999_v21 = vld [vmem:[#allocation6_spill] sm:$0xff] }
 0x358   : > { %v5325_v4 = vpop.eup %5324  ;;  %v1859_v55 = vmul.f32 1.442695, %v1759_v16  ;;  %v1861_v44 = vmul.f32 1.442695, %v1760_v57  ;;  %2140 = vmatmul.mubr.bf16.gmra.mxu0 %v2023_v46  ;;  %2467 = vmatpush1.bf16.msra.mxu1 %v5237_v19  ;;  %v7998_v46 = vld [vmem:[#allocation9_spill] sm:$0xff] }
 0x359   : > { %v1686_v25 = vpop.xlane.xlu1 %1685  ;;  %v1957_v17 = vadd.f32 %v5325_v4, %v5323_v23  ;;  %2468 = vmatprep.subr.bf16.mxu1 %v5242_v56  ;;  %v5251_v57 = vld [vmem:[%s7912_s4 + $0x24] ss:$8 sps:$4 sm:$0xff]  }
 0x35a   : > { %5338 = vpow2.f32 %v1859_v55  ;;  %v1761_v20 = vsub.f32 %v6527_v6, %v1686_v25  ;;  %v1762_v28 = vsub.f32 %v6529_v8, %v1686_v25 }
 0x35b   : > { %v5327_v58 = vpop.eup %5326  ;;  %5340 = vpow2.f32 %v1861_v44  ;;  %1958 = vadd.xlane.f32.xlu0 %v1957_v17  ;;  %v5249_v44 = vld [vmem:[%s7912_s4 + $0x20] ss:$8 sps:$4 sm:$0xff]  }
 0x35c   : > { %v5329_v35 = vpop.eup %5328  ;;  %v1863_v61 = vmul.f32 1.442695, %v1761_v20  ;;  %v1865_v42 = vmul.f32 1.442695, %v1762_v28  ;;  %v2025_v43 = vpack.c.bf16 %v5327_v58, %v5323_v23  ;;  %2469 = vmatpush1.bf16.msra.mxu1 %v5240_v26  ;;  %v8000_v20 = vld [vmem:[#allocation7_spill] sm:$0xff] }
 0x35d   : > { %v1689_v11 = vpop.xlane.xlu0 %1688  ;;  %v1960_v6 = vadd.f32 %v5329_v35, %v5327_v58  ;;  %v2026_v13 = vpack.c.bf16 %v5329_v35, %v5325_v4  ;;  %2470 = vmatprep.subr.bf16.mxu1 %v5245_v2  ;;  %v8001_v58 = vld [vmem:[#allocation10_spill] sm:$0xff] }
 0x35e   : > { %5342 = vpow2.f32 %v1863_v61  ;;  %v1763_v8 = vsub.f32 %v6535_v37, %v1689_v11  ;;  %v1764_v41 = vsub.f32 %v6537_v18, %v1689_v11  ;;  %v5254_v61 = vld [vmem:[%s7912_s4 + $0x14] ss:$8 sps:$4 sm:$0xff]   ;;  %v5252_v11 = vld [vmem:[%s7912_s4 + $0x10] ss:$8 sps:$4 sm:$0xff]  }
 0x35f   : > { %v5331_v60 = vpop.eup %5330  ;;  %5344 = vpow2.f32 %v1865_v42  ;;  %1961 = vadd.xlane.f32.xlu1 %v1960_v6  ;;  %2147 = vmatprep.mubr.bf16.mxu0 %v2026_v13 }
 0x360   : > { %v5333_v33 = vpop.eup %5332  ;;  %v1867_v0 = vmul.f32 1.442695, %v1763_v8  ;;  %v1869_v39 = vmul.f32 1.442695, %v1764_v41  ;;  %2148 = vmatmul.mubr.bf16.gmra.mxu0 %v2025_v43  ;;  %2471 = vmatpush1.bf16.msra.mxu1 %v5243_v38  ;;  %v8002_v8 = vld [vmem:[#allocation11_spill] sm:$0xff] }
 0x361   : > { %v1692_v37 = vpop.xlane.xlu1 %1691  ;;  %v1963_v31 = vadd.f32 %v5333_v33, %v5331_v60  ;;  %2472 = vmatprep.subr.bf16.mxu1 %v5248_v1  ;;  %v8007_v1 = vld [vmem:[#allocation16_spill] sm:$0xff] }
 0x362   : > { %5346 = vpow2.f32 %v1867_v0  ;;  %v1765_v18 = vsub.f32 %v6543_v48, %v1692_v37  ;;  %v1766_v63 = vsub.f32 %v6545_v14, %v1692_v37  ;;  %v5257_v0 = vld [vmem:[%s7912_s4 + $0x4] ss:$8 sps:$4 sm:$0xff]  }
 0x363   : > { %v5335_v49 = vpop.eup %5334  ;;  %5348 = vpow2.f32 %v1869_v39  ;;  %1964 = vadd.xlane.f32.xlu0 %v1963_v31 }
 0x364   : > { %v5337_v52 = vpop.eup %5336  ;;  %v1871_v9 = vmul.f32 1.442695, %v1765_v18  ;;  %v1873_v62 = vmul.f32 1.442695, %v1766_v63  ;;  %v2027_v36 = vpack.c.bf16 %v5335_v49, %v5331_v60  ;;  %2473 = vmatpush1.bf16.msra.mxu1 %v5246_v53  ;;  %v8003_v60 = vld [vmem:[#allocation12_spill] sm:$0xff] }
 0x365   : > { %v1695_v10 = vpop.xlane.xlu0 %1694  ;;  %v1966_v48 = vadd.f32 %v5337_v52, %v5335_v49  ;;  %v2028_v12 = vpack.c.bf16 %v5337_v52, %v5333_v33  ;;  %2474 = vmatprep.subr.bf16.mxu1 %v5251_v57  ;;  %v5255_v18 = vld [vmem:[%s7912_s4] ss:$8 sps:$4 sm:$0xff]  }
 0x366   : > { %5350 = vpow2.f32 %v1871_v9  ;;  %v1767_v14 = vsub.f32 %v6551_v7, %v1695_v10  ;;  %v1768_v3 = vsub.f32 %v7997_v5, %v1695_v10  ;;  %v8004_v52 = vld [vmem:[#allocation13_spill] sm:$0xff]  ;;  %v8009_v57 = vld [vmem:[#allocation18_spill] sm:$0xff] }
 0x367   : > { %v5339_v15 = vpop.eup %5338  ;;  %5352 = vpow2.f32 %v1873_v62  ;;  %1967 = vadd.xlane.f32.xlu1 %v1966_v48  ;;  %2155 = vmatprep.mubr.bf16.mxu0 %v2028_v12  ;;  %v8005_v62 = vld [vmem:[#allocation14_spill] sm:$0xff] }
 0x368   : > { %v5341_v29 = vpop.eup %5340  ;;  %v1875_v30 = vmul.f32 1.442695, %v1767_v14  ;;  %v1877_v51 = vmul.f32 1.442695, %v1768_v3  ;;  %2156 = vmatmul.mubr.bf16.gmra.mxu0 %v2027_v36  ;;  %2475 = vmatpush1.bf16.msra.mxu1 %v5249_v44  ;;  %v8006_v3 = vld [vmem:[#allocation15_spill] sm:$0xff] }
 0x369   : > { %v1698_v7 = vpop.xlane.xlu1 %1697  ;;  %v1969_v32 = vadd.f32 %v5341_v29, %v5339_v15  ;;  %2476 = vmatprep.subr.bf16.mxu1 %v5254_v61 }
 0x36a   : > { %5354 = vpow2.f32 %v1875_v30  ;;  %v1769_v34 = vsub.f32 %v7998_v46, %v1698_v7  ;;  %v1770_v50 = vsub.f32 %v7999_v21, %v1698_v7 }
 0x36b   : > { %v5343_v16 = vpop.eup %5342  ;;  %5356 = vpow2.f32 %v1877_v51  ;;  %1970 = vadd.xlane.f32.xlu0 %v1969_v32 }
 0x36c   : > { %v5345_v23 = vpop.eup %5344  ;;  %v1879_v54 = vmul.f32 1.442695, %v1769_v34  ;;  %v1881_v4 = vmul.f32 1.442695, %v1770_v50  ;;  %v2029_v55 = vpack.c.bf16 %v5343_v16, %v5339_v15  ;;  %2477 = vmatpush1.bf16.msra.mxu1 %v5252_v11  ;;  %v8008_v50 = vld [vmem:[#allocation17_spill] sm:$0xff] }
 0x36d   : > { %v1701_v22 = vpop.xlane.xlu0 %1700  ;;  %v1972_v25 = vadd.f32 %v5345_v23, %v5343_v16  ;;  %v2030_v17 = vpack.c.bf16 %v5345_v23, %v5341_v29  ;;  %2478 = vmatprep.subr.bf16.mxu1 %v5257_v0 }
 0x36e   : > { %5358 = vpow2.f32 %v1879_v54  ;;  %v1771_v28 = vsub.f32 %v8000_v20, %v1701_v22  ;;  %v1772_v27 = vsub.f32 %v8001_v58, %v1701_v22  ;;  %v8010_v20 = vld [vmem:[#allocation19_spill] sm:$0xff] }
 0x36f   : > { %v5347_v35 = vpop.eup %5346  ;;  %5360 = vpow2.f32 %v1881_v4  ;;  %1973 = vadd.xlane.f32.xlu1 %v1972_v25  ;;  %2163 = vmatprep.mubr.bf16.mxu0 %v2030_v17 }
 0x370   : > { %v5349_v42 = vpop.eup %5348  ;;  %v1883_v43 = vmul.f32 1.442695, %v1771_v28  ;;  %v1885_v19 = vmul.f32 1.442695, %v1772_v27  ;;  %2164 = vmatmul.mubr.bf16.gmra.mxu0 %v2029_v55  ;;  %2479 = vmatpush1.bf16.msra.mxu1 %v5255_v18 }
 0x371   : > { %v1704_v6 = vpop.xlane.xlu1 %1703  ;;  %v1975_v13 = vadd.f32 %v5349_v42, %v5347_v35 }
 0x372   : > { %5362 = vpow2.f32 %v1883_v43  ;;  %v1773_v41 = vsub.f32 %v8002_v8, %v1704_v6  ;;  %v1774_v56 = vsub.f32 %v8003_v60, %v1704_v6 }
 0x373   : > { %v5351_v33 = vpop.eup %5350  ;;  %5364 = vpow2.f32 %v1885_v19  ;;  %1976 = vadd.xlane.f32.xlu0 %v1975_v13 }
 0x374   : > { %v5353_v39 = vpop.eup %5352  ;;  %v1887_v26 = vmul.f32 1.442695, %v1773_v41  ;;  %v1889_v37 = vmul.f32 1.442695, %v1774_v56  ;;  %v2031_v31 = vpack.c.bf16 %v5351_v33, %v5347_v35 }
 0x375   : > { %v1707_v63 = vpop.xlane.xlu0 %1706  ;;  %v1978_v49 = vadd.f32 %v5353_v39, %v5351_v33  ;;  %v2032_v2 = vpack.c.bf16 %v5353_v39, %v5349_v42 }
 0x376   : > { %5366 = vpow2.f32 %v1887_v26  ;;  %v1775_v9 = vsub.f32 %v8004_v52, %v1707_v63  ;;  %v1776_v36 = vsub.f32 %v8005_v62, %v1707_v63 }
 0x377   : > { %v5355_v38 = vpop.eup %5354  ;;  %5368 = vpow2.f32 %v1889_v37  ;;  %1979 = vadd.xlane.f32.xlu1 %v1978_v49  ;;  %2171 = vmatprep.mubr.bf16.mxu0 %v2032_v2 }
 0x378   : > { %v5357_v10 = vpop.eup %5356  ;;  %v1891_v48 = vmul.f32 1.442695, %v1775_v9  ;;  %v1893_v12 = vmul.f32 1.442695, %v1776_v36  ;;  %2172 = vmatmul.mubr.bf16.gmra.mxu0 %v2031_v31 }
 0x379   : > { %v1710_v14 = vpop.xlane.xlu1 %1709  ;;  %v1981_v5 = vadd.f32 %v5357_v10, %v5355_v38 }
 0x37a   : > { %5370 = vpow2.f32 %v1891_v48  ;;  %v1777_v15 = vsub.f32 %v8006_v3, %v1710_v14  ;;  %v1778_v29 = vsub.f32 %v8007_v1, %v1710_v14 }
 0x37b   : > { %v5359_v30 = vpop.eup %5358  ;;  %5372 = vpow2.f32 %v1893_v12  ;;  %1982 = vadd.xlane.f32.xlu0 %v1981_v5 }
 0x37c   : > { %v5361_v51 = vpop.eup %5360  ;;  %v1895_v53 = vmul.f32 1.442695, %v1777_v15  ;;  %v1897_v7 = vmul.f32 1.442695, %v1778_v29  ;;  %v2033_v32 = vpack.c.bf16 %v5359_v30, %v5355_v38 }
 0x37d   : > { %v1713_v46 = vpop.xlane.xlu0 %1712  ;;  %v1984_v34 = vadd.f32 %v5361_v51, %v5359_v30  ;;  %v2034_v21 = vpack.c.bf16 %v5361_v51, %v5357_v10  ;;  %v8011_v51 = vlaneseq }
 0x37e   : > { %5374 = vpow2.f32 %v1895_v53  ;;  %v1779_v16 = vsub.f32 %v8008_v50, %v1713_v46  ;;  %v1780_v23 = vsub.f32 %v8009_v57, %v1713_v46 }
 0x37f   : > { %v5363_v54 = vpop.eup %5362  ;;  %5376 = vpow2.f32 %v1897_v7  ;;  %1985 = vadd.xlane.f32.xlu1 %v1984_v34  ;;  %2179 = vmatprep.mubr.bf16.mxu0 %v2034_v21  ;;  %v6740_v53 = vshrl.u32 %v8011_v51, 7  ;;  %v350_v34 = vld [vmem:[%s7914_s6] sm:$0xff] }
 0x380   : > { %v5365_v4 = vpop.eup %5364  ;;  %v1899_v55 = vmul.f32 1.442695, %v1779_v16  ;;  %v1901_v44 = vmul.f32 1.442695, %v1780_v23  ;;  %2180 = vmatmul.mubr.bf16.gmra.mxu0 %v2033_v32 }
 0x381   : > { %v1716_v22 = vpop.xlane.xlu1 %1715  ;;  %v1987_v25 = vadd.f32 %v5365_v4, %v5363_v54  ;;  %8012 = vst [vmem:[#allocation8_spill] sm:$0xff] %v6740_v53  ;;  %v2286_v46 = vsub.s32 0, %v6740_v53 }
 0x382   : > { %5378 = vpow2.f32 %v1899_v55  ;;  %v1781_v17 = vsub.f32 %v6607_v40, %v1716_v22  ;;  %v1782_v28 = vsub.f32 %v8010_v20, %v1716_v22 }
 0x383   : > { %v5367_v58 = vpop.eup %5366  ;;  %5380 = vpow2.f32 %v1901_v44  ;;  %1988 = vadd.xlane.f32.xlu0 %v1987_v25 }
 0x384   : > { %v5369_v27 = vpop.eup %5368  ;;  %v1903_v35 = vmul.f32 1.442695, %v1781_v17  ;;  %v1905_v61 = vmul.f32 1.442695, %v1782_v28  ;;  %v2035_v42 = vpack.c.bf16 %v5367_v58, %v5363_v54 }
 0x385   : > { %v1719_v43 = vpop.xlane.xlu0 %1718  ;;  %v1990_v19 = vadd.f32 %v5369_v27, %v5367_v58  ;;  %v2036_v11 = vpack.c.bf16 %v5369_v27, %v5365_v4  ;;  %v6746_v4 = vrot.slane %v350_v34, %v2286_v46 }
 0x386   : > { %5382 = vpow2.f32 %v1903_v35  ;;  %v1783_v6 = vsub.f32 %v6615_v24, %v1719_v43  ;;  %v1784_v13 = vsub.f32 %v6617_v59, %v1719_v43 }
 0x387   : > { %v5371_v8 = vpop.eup %5370  ;;  %5384 = vpow2.f32 %v1905_v61  ;;  %1991 = vadd.xlane.f32.xlu1 %v1990_v19  ;;  %2187 = vmatprep.mubr.bf16.mxu0 %v2036_v11 }
 0x388   : > { %v5373_v40 = vpop.eup %5372  ;;  %v1907_v41 = vmul.f32 1.442695, %v1783_v6  ;;  %v1909_v60 = vmul.f32 1.442695, %v1784_v13  ;;  %2188 = vmatmul.mubr.bf16.gmra.mxu0 %v2035_v42 }
 0x389   : > { %v1722_v56 = vpop.xlane.xlu1 %1721  ;;  %v1993_v33 = vadd.f32 %v5373_v40, %v5371_v8 }
 0x38a   : > { %5386 = vpow2.f32 %v1907_v41  ;;  %v1785_v0 = vsub.f32 %v6621_v45, %v1722_v56  ;;  %v1786_v39 = vsub.f32 %v6623_v47, %v1722_v56 }
 0x38b   : > { %v5375_v26 = vpop.eup %5374  ;;  %5388 = vpow2.f32 %v1909_v60  ;;  %1994 = vadd.xlane.f32.xlu0 %v1993_v33 }
 0x38c   : > { %v5377_v24 = vpop.eup %5376  ;;  %v1911_v59 = vmul.f32 1.442695, %v1785_v0  ;;  %v1913_v37 = vmul.f32 1.442695, %v1786_v39  ;;  %v2037_v31 = vpack.c.bf16 %v5375_v26, %v5371_v8 }
 0x38d   : > { %v1996_v18 = vadd.f32 %v5377_v24, %v5375_v26  ;;  %v2038_v63 = vpack.c.bf16 %v5377_v24, %v5373_v40  ;;  %v8013_v26 = vmov 0  }
 0x38e   : > { %5390 = vpow2.f32 %v1911_v59 }
 0x38f   : > { %v5379_v49 = vpop.eup %5378  ;;  %5392 = vpow2.f32 %v1913_v37  ;;  %1997 = vadd.xlane.f32.xlu1 %v1996_v18  ;;  %2195 = vmatprep.mubr.bf16.mxu0 %v2038_v63 }
 0x390   : > { %v5381_v2 = vpop.eup %5380  ;;  %2196 = vmatmul.mubr.bf16.gmra.mxu0 %v2037_v31 }
 0x391   : > { %v1999_v52 = vadd.f32 %v5381_v2, %v5379_v49 }
 0x393   : > { %v5383_v45 = vpop.eup %5382  ;;  %2000 = vadd.xlane.f32.xlu0 %v1999_v52 }
 0x394   : > { %v5385_v47 = vpop.eup %5384  ;;  %v2039_v9 = vpack.c.bf16 %v5383_v45, %v5379_v49 }
 0x395   : > { %v2002_v62 = vadd.f32 %v5385_v47, %v5383_v45  ;;  %v2040_v36 = vpack.c.bf16 %v5385_v47, %v5381_v2 }
 0x397   : > { %v5387_v38 = vpop.eup %5386  ;;  %2003 = vadd.xlane.f32.xlu1 %v2002_v62  ;;  %2203 = vmatprep.mubr.bf16.mxu0 %v2040_v36 }
 0x398   : > { %v5389_v10 = vpop.eup %5388  ;;  %2204 = vmatmul.mubr.bf16.gmra.mxu0 %v2039_v9 }
 0x399   : > { %v2005_v48 = vadd.f32 %v5389_v10, %v5387_v38 }
 0x39b   : > { %v5391_v12 = vpop.eup %5390  ;;  %2006 = vadd.xlane.f32.xlu0 %v2005_v48 }
 0x39c   : > { %v5393_v14 = vpop.eup %5392  ;;  %v2041_v5 = vpack.c.bf16 %v5391_v12, %v5387_v38 }
 0x39d   : > { %v2008_v3 = vadd.f32 %v5393_v14, %v5391_v12  ;;  %v2042_v15 = vpack.c.bf16 %v5393_v14, %v5389_v10 }
 0x39f   : > { %2009 = vadd.xlane.f32.xlu1 %v2008_v3  ;;  %2211 = vmatprep.mubr.bf16.mxu0 %v2042_v15 }
 0x3a0   : > { %2212 = vmatmul.mubr.bf16.gmra.mxu0 %v2041_v5 }
 0x3ac   : > { %v1917_v1 = vpop.xlane.xlu0 %1916 }
 0x3ad   : > { %5394 = vrcp.f32 %v1917_v1 }
 0x3b0   : > { %v1920_v29 = vpop.xlane.xlu1 %1919 }
 0x3b1   : > { %5396 = vrcp.f32 %v1920_v29 }
 0x3b4   : > { %v1923_v30 = vpop.xlane.xlu0 %1922 }
 0x3b5   : > { %5398 = vrcp.f32 %v1923_v30 }
 0x3b8   : > { %v1926_v7 = vpop.xlane.xlu1 %1925 }
 0x3b9   : > { %5400 = vrcp.f32 %v1926_v7 }
 0x3ba   : > { %v5395_v16 = vpop.eup %5394 }
 0x3bc   : > { %v1929_v57 = vpop.xlane.xlu0 %1928 }
 0x3bd   : > { %5402 = vrcp.f32 %v1929_v57 }
 0x3be   : > { %v5397_v22 = vpop.eup %5396 }
 0x3c0   : > { %v1932_v25 = vpop.xlane.xlu1 %1931 }
 0x3c1   : > { %5404 = vrcp.f32 %v1932_v25 }
 0x3c2   : > { %v5399_v61 = vpop.eup %5398 }
 0x3c4   : > { %v1935_v42 = vpop.xlane.xlu0 %1934 }
 0x3c5   : > { %5406 = vrcp.f32 %v1935_v42 }
 0x3c6   : > { %v5401_v41 = vpop.eup %5400 }
 0x3c8   : > { %v1938_v60 = vpop.xlane.xlu1 %1937 }
 0x3c9   : > { %5408 = vrcp.f32 %v1938_v60 }
 0x3ca   : > { %v5403_v37 = vpop.eup %5402 }
 0x3cc   : > { %v1941_v31 = vpop.xlane.xlu0 %1940 }
 0x3cd   : > { %5410 = vrcp.f32 %v1941_v31 }
 0x3ce   : > { %v5405_v9 = vpop.eup %5404 }
 0x3d0   : > { %v1944_v62 = vpop.xlane.xlu1 %1943 }
 0x3d1   : > { %5412 = vrcp.f32 %v1944_v62 }
 0x3d2   : > { %v5407_v5 = vpop.eup %5406 }
 0x3d4   : > { %v1947_v3 = vpop.xlane.xlu0 %1946 }
 0x3d5   : > { %5414 = vrcp.f32 %v1947_v3 }
 0x3d6   : > { %v5409_v46 = vpop.eup %5408 }
 0x3d8   : > { %v1950_v34 = vpop.xlane.xlu1 %1949 }
 0x3d9   : > { %5416 = vrcp.f32 %v1950_v34 }
 0x3e8   : > { %v4826_v32 = vpop.f32.mrf.mxu0 }
 0x3ea   : > { %v4827_v21 = vpop.f32.mrf.mxu0 }
 0x3eb   : > { %v4828_v50 = vadd.f32 %v4827_v21, %v4826_v32 }
 0x3ec   : > { %v4829_v23 = vpop.f32.mrf.mxu0 }
 0x3ed   : > { %v2252_v54 = vmul.f32 %v5395_v16, %v4828_v50 }
 0x3ee   : > { %v4830_v55 = vpop.f32.mrf.mxu0 }
 0x3ef   : > { %v4831_v44 = vadd.f32 %v4830_v55, %v4829_v23  ;;  %v2288_v20 = vadd.f32 %v6746_v4, %v2252_v54  ;;  %v5411_v55 = vpop.eup %5410 }
 0x3f0   : > { %v4832_v17 = vpop.f32.mrf.mxu0 }
 0x3f1   : > { %v2253_v28 = vmul.f32 %v5397_v22, %v4831_v44  ;;  %v2320_v19 = vmax.f32 %v2288_v20, 0.0  ;;  %v1953_v44 = vpop.xlane.xlu0 %1952 }
 0x3f2   : > { %v4833_v58 = vpop.f32.mrf.mxu0  ;;  %5418 = vrcp.f32 %v1953_v44 }
 0x3f3   : > { %v2289_v27 = vadd.f32 %v6746_v4, %v2253_v28  ;;  %v4834_v35 = vadd.f32 %v4833_v58, %v4832_v17 }
 0x3f4   : > { %v4835_v43 = vpop.f32.mrf.mxu0 }
 0x3f5   : > { %v2321_v11 = vmax.f32 %v2289_v27, 0.0  ;;  %v2254_v6 = vmul.f32 %v5399_v61, %v4834_v35  ;;  %v5413_v35 = vpop.eup %5412  ;;  %v1956_v61 = vpop.xlane.xlu1 %1955 }
 0x3f6   : > { %v4836_v13 = vpop.f32.mrf.mxu0  ;;  %5420 = vrcp.f32 %v1956_v61 }
 0x3f7   : > { %v2368_v8 = vpack.c.bf16 %v2321_v11, %v2320_v19  ;;  %v4837_v40 = vadd.f32 %v4836_v13, %v4835_v43  ;;  %v2290_v33 = vadd.f32 %v6746_v4, %v2254_v6 }
 0x3f8   : > { %v4838_v56 = vpop.f32.mrf.mxu0 }
 0x3f9   : > { %v2255_v0 = vmul.f32 %v5401_v41, %v4837_v40  ;;  %2497 = vmatmul.mubr.bf16.vlgmr.msra.gmra.mxu1 %v2368_v8  ;;  %v2322_v49 = vmax.f32 %v2290_v33, 0.0  ;;  %v5415_v8 = vpop.eup %5414  ;;  %v1959_v40 = vpop.xlane.xlu0 %1958 }
 0x3fa   : > { %v4839_v39 = vpop.f32.mrf.mxu0  ;;  %2506 = vmatprep.mubr.bf16.mxu1 %v8013_v26  ;;  %5422 = vrcp.f32 %v1959_v40 }
 0x3fb   : > { %v2291_v24 = vadd.f32 %v6746_v4, %v2255_v0  ;;  %v4840_v59 = vadd.f32 %v4839_v39, %v4838_v56 }
 0x3fc   : > { %v4841_v18 = vpop.f32.mrf.mxu0 }
 0x3fd   : > { %v2256_v63 = vmul.f32 %v5403_v37, %v4840_v59  ;;  %v2323_v2 = vmax.f32 %v2291_v24, 0.0  ;;  %v5417_v59 = vpop.eup %5416  ;;  %v1962_v37 = vpop.xlane.xlu1 %1961 }
 0x3fe   : > { %v4842_v52 = vpop.f32.mrf.mxu0  ;;  %5424 = vrcp.f32 %v1962_v37 }
 0x3ff   : > { %v4843_v45 = vadd.f32 %v4842_v52, %v4841_v18  ;;  %v2369_v47 = vpack.c.bf16 %v2323_v2, %v2322_v49  ;;  %v2292_v38 = vadd.f32 %v6746_v4, %v2256_v63 }
 0x400   : > { %v4844_v36 = vpop.f32.mrf.mxu0 }
 0x401   : > { %v2257_v10 = vmul.f32 %v5405_v9, %v4843_v45  ;;  %2507 = vmatmul.mubr.bf16.gmra.mxu1 %v2369_v47  ;;  %v2324_v29 = vmax.f32 %v2292_v38, 0.0  ;;  %v5419_v45 = vpop.eup %5418  ;;  %v1965_v47 = vpop.xlane.xlu0 %1964 }
 0x402   : > { %v4845_v48 = vpop.f32.mrf.mxu0  ;;  %2516 = vmatprep.mubr.bf16.mxu1 %v8013_v26  ;;  %5426 = vrcp.f32 %v1965_v47 }
 0x403   : > { %v2293_v12 = vadd.f32 %v6746_v4, %v2257_v10  ;;  %v4846_v14 = vadd.f32 %v4845_v48, %v4844_v36 }
 0x404   : > { %v4847_v15 = vpop.f32.mrf.mxu0 }
 0x405   : > { %v2258_v1 = vmul.f32 %v5407_v5, %v4846_v14  ;;  %v2325_v30 = vmax.f32 %v2293_v12, 0.0  ;;  %v5421_v14 = vpop.eup %5420  ;;  %v1968_v5 = vpop.xlane.xlu1 %1967 }
 0x406   : > { %v4848_v51 = vpop.f32.mrf.mxu0  ;;  %5428 = vrcp.f32 %v1968_v5 }
 0x407   : > { %v4849_v7 = vadd.f32 %v4848_v51, %v4847_v15  ;;  %v2370_v32 = vpack.c.bf16 %v2325_v30, %v2324_v29  ;;  %v2294_v50 = vadd.f32 %v6746_v4, %v2258_v1 }
 0x408   : > { %v4850_v21 = vpop.f32.mrf.mxu0 }
 0x409   : > { %v2259_v16 = vmul.f32 %v5409_v46, %v4849_v7  ;;  %2517 = vmatmul.mubr.bf16.gmra.mxu1 %v2370_v32  ;;  %v2326_v17 = vmax.f32 %v2294_v50, 0.0  ;;  %v5423_v7 = vpop.eup %5422  ;;  %v1971_v32 = vpop.xlane.xlu0 %1970 }
 0x40a   : > { %v4851_v57 = vpop.f32.mrf.mxu0  ;;  %2526 = vmatprep.mubr.bf16.mxu1 %v8013_v26  ;;  %5430 = vrcp.f32 %v1971_v32 }
 0x40b   : > { %v2295_v23 = vadd.f32 %v6746_v4, %v2259_v16  ;;  %v4852_v54 = vadd.f32 %v4851_v57, %v4850_v21 }
 0x40c   : > { %v4853_v22 = vpop.f32.mrf.mxu0 }
 0x40d   : > { %v2260_v25 = vmul.f32 %v5411_v55, %v4852_v54  ;;  %v2327_v20 = vmax.f32 %v2295_v23, 0.0  ;;  %v5425_v54 = vpop.eup %5424  ;;  %v1974_v55 = vpop.xlane.xlu1 %1973 }
 0x40e   : > { %v4854_v28 = vpop.f32.mrf.mxu0  ;;  %5432 = vrcp.f32 %v1974_v55 }
 0x40f   : > { %v4855_v58 = vadd.f32 %v4854_v28, %v4853_v22  ;;  %v2371_v27 = vpack.c.bf16 %v2327_v20, %v2326_v17  ;;  %v2296_v43 = vadd.f32 %v6746_v4, %v2260_v25 }
 0x410   : > { %v4856_v42 = vpop.f32.mrf.mxu0 }
 0x411   : > { %v2261_v19 = vmul.f32 %v5413_v35, %v4855_v58  ;;  %2527 = vmatmul.mubr.bf16.gmra.mxu1 %v2371_v27  ;;  %v2328_v60 = vmax.f32 %v2296_v43, 0.0  ;;  %v5427_v58 = vpop.eup %5426  ;;  %v1977_v27 = vpop.xlane.xlu0 %1976 }
 0x412   : > { %v4857_v11 = vpop.f32.mrf.mxu0  ;;  %2536 = vmatprep.mubr.bf16.mxu1 %v8013_v26  ;;  %5434 = vrcp.f32 %v1977_v27 }
 0x413   : > { %v2297_v6 = vadd.f32 %v6746_v4, %v2261_v19  ;;  %v4858_v13 = vadd.f32 %v4857_v11, %v4856_v42 }
 0x414   : > { %v4859_v41 = vpop.f32.mrf.mxu0 }
 0x415   : > { %v2262_v56 = vmul.f32 %v5415_v8, %v4858_v13  ;;  %v2329_v33 = vmax.f32 %v2297_v6, 0.0  ;;  %v5429_v13 = vpop.eup %5428  ;;  %v1980_v8 = vpop.xlane.xlu1 %1979 }
 0x416   : > { %v4860_v0 = vpop.f32.mrf.mxu0  ;;  %5436 = vrcp.f32 %v1980_v8 }
 0x417   : > { %v4861_v39 = vadd.f32 %v4860_v0, %v4859_v41  ;;  %v2372_v24 = vpack.c.bf16 %v2329_v33, %v2328_v60  ;;  %v2298_v18 = vadd.f32 %v6746_v4, %v2262_v56 }
 0x418   : > { %v4862_v31 = vpop.f32.mrf.mxu0 }
 0x419   : > { %v2263_v63 = vmul.f32 %v5417_v59, %v4861_v39  ;;  %2537 = vmatmul.mubr.bf16.gmra.mxu1 %v2372_v24  ;;  %v2330_v62 = vmax.f32 %v2298_v18, 0.0  ;;  %v5431_v39 = vpop.eup %5430  ;;  %v1983_v24 = vpop.xlane.xlu0 %1982 }
 0x41a   : > { %v4863_v49 = vpop.f32.mrf.mxu0  ;;  %2546 = vmatprep.mubr.bf16.mxu1 %v8013_v26  ;;  %5438 = vrcp.f32 %v1983_v24 }
 0x41b   : > { %v2299_v2 = vadd.f32 %v6746_v4, %v2263_v63  ;;  %v4864_v52 = vadd.f32 %v4863_v49, %v4862_v31 }
 0x41c   : > { %v4865_v9 = vpop.f32.mrf.mxu0 }
 0x41d   : > { %v2264_v36 = vmul.f32 %v5419_v45, %v4864_v52  ;;  %v2331_v38 = vmax.f32 %v2299_v2, 0.0  ;;  %v5433_v52 = vpop.eup %5432  ;;  %v1986_v45 = vpop.xlane.xlu1 %1985 }
 0x41e   : > { %v4866_v10 = vpop.f32.mrf.mxu0  ;;  %5440 = vrcp.f32 %v1986_v45 }
 0x41f   : > { %v4867_v48 = vadd.f32 %v4866_v10, %v4865_v9  ;;  %v2373_v12 = vpack.c.bf16 %v2331_v38, %v2330_v62  ;;  %v2300_v15 = vadd.f32 %v6746_v4, %v2264_v36 }
 0x420   : > { %v4868_v3 = vpop.f32.mrf.mxu0 }
 0x421   : > { %v2265_v1 = vmul.f32 %v5421_v14, %v4867_v48  ;;  %2547 = vmatmul.mubr.bf16.gmra.mxu1 %v2373_v12  ;;  %v2332_v34 = vmax.f32 %v2300_v15, 0.0  ;;  %v5435_v48 = vpop.eup %5434  ;;  %v1989_v12 = vpop.xlane.xlu0 %1988 }
 0x422   : > { %v4869_v29 = vpop.f32.mrf.mxu0  ;;  %2556 = vmatprep.mubr.bf16.mxu1 %v8013_v26  ;;  %5442 = vrcp.f32 %v1989_v12 }
 0x423   : > { %v2301_v30 = vadd.f32 %v6746_v4, %v2265_v1  ;;  %v4870_v51 = vadd.f32 %v4869_v29, %v4868_v3 }
 0x424   : > { %v4871_v46 = vpop.f32.mrf.mxu0 }
 0x425   : > { %v2266_v21 = vmul.f32 %v5423_v7, %v4870_v51  ;;  %v2333_v50 = vmax.f32 %v2301_v30, 0.0  ;;  %v5437_v51 = vpop.eup %5436  ;;  %v1992_v7 = vpop.xlane.xlu1 %1991 }
 0x426   : > { %v4872_v16 = vpop.f32.mrf.mxu0  ;;  %5444 = vrcp.f32 %v1992_v7 }
 0x427   : > { %v4873_v57 = vadd.f32 %v4872_v16, %v4871_v46  ;;  %v2374_v23 = vpack.c.bf16 %v2333_v50, %v2332_v34  ;;  %v2302_v22 = vadd.f32 %v6746_v4, %v2266_v21 }
 0x428   : > { %v4874_v44 = vpop.f32.mrf.mxu0 }
 0x429   : > { %v2267_v25 = vmul.f32 %v5425_v54, %v4873_v57  ;;  %2557 = vmatmul.mubr.bf16.gmra.mxu1 %v2374_v23  ;;  %v2334_v61 = vmax.f32 %v2302_v22, 0.0  ;;  %v5439_v57 = vpop.eup %5438  ;;  %v1995_v23 = vpop.xlane.xlu0 %1994 }
 0x42a   : > { %v4875_v17 = vpop.f32.mrf.mxu0  ;;  %2566 = vmatprep.mubr.bf16.mxu1 %v8013_v26  ;;  %5446 = vrcp.f32 %v1995_v23 }
 0x42b   : > { %v2303_v20 = vadd.f32 %v6746_v4, %v2267_v25  ;;  %v4876_v28 = vadd.f32 %v4875_v17, %v4874_v44 }
 0x42c   : > { %v4877_v35 = vpop.f32.mrf.mxu0 }
 0x42d   : > { %v2335_v42 = vmax.f32 %v2303_v20, 0.0  ;;  %v2268_v43 = vmul.f32 %v5427_v58, %v4876_v28  ;;  %v5441_v28 = vpop.eup %5440  ;;  %v1998_v58 = vpop.xlane.xlu1 %1997 }
 0x42e   : > { %v4878_v19 = vpop.f32.mrf.mxu0  ;;  %5448 = vrcp.f32 %v1998_v58 }
 0x42f   : > { %v4879_v11 = vadd.f32 %v4878_v19, %v4877_v35  ;;  %v2375_v6 = vpack.c.bf16 %v2335_v42, %v2334_v61  ;;  %v2304_v41 = vadd.f32 %v6746_v4, %v2268_v43 }
 0x430   : > { %v4880_v40 = vpop.f32.mrf.mxu0 }
 0x431   : > { %v2269_v60 = vmul.f32 %v5429_v13, %v4879_v11  ;;  %2567 = vmatmul.mubr.bf16.gmra.mxu1 %v2375_v6  ;;  %v2336_v37 = vmax.f32 %v2304_v41, 0.0  ;;  %v5443_v11 = vpop.eup %5442  ;;  %v2001_v6 = vpop.xlane.xlu0 %2000 }
 0x432   : > { %v4881_v56 = vpop.f32.mrf.mxu0  ;;  %2576 = vmatprep.mubr.bf16.mxu1 %v8013_v26  ;;  %5450 = vrcp.f32 %v2001_v6 }
 0x433   : > { %v2305_v33 = vadd.f32 %v6746_v4, %v2269_v60  ;;  %v4882_v0 = vadd.f32 %v4881_v56, %v4880_v40 }
 0x434   : > { %v4883_v59 = vpop.f32.mrf.mxu0 }
 0x435   : > { %v2337_v31 = vmax.f32 %v2305_v33, 0.0  ;;  %v2270_v18 = vmul.f32 %v5431_v39, %v4882_v0  ;;  %v5445_v0 = vpop.eup %5444  ;;  %v2004_v39 = vpop.xlane.xlu1 %2003 }
 0x436   : > { %v4884_v63 = vpop.f32.mrf.mxu0  ;;  %5452 = vrcp.f32 %v2004_v39 }
 0x437   : > { %v4885_v49 = vadd.f32 %v4884_v63, %v4883_v59  ;;  %v2376_v2 = vpack.c.bf16 %v2337_v31, %v2336_v37  ;;  %v2306_v9 = vadd.f32 %v6746_v4, %v2270_v18 }
 0x438   : > { %v4886_v47 = vpop.f32.mrf.mxu0 }
 0x439   : > { %v2271_v62 = vmul.f32 %v5433_v52, %v4885_v49  ;;  %2577 = vmatmul.mubr.bf16.gmra.mxu1 %v2376_v2  ;;  %v2338_v5 = vmax.f32 %v2306_v9, 0.0  ;;  %v5447_v49 = vpop.eup %5446  ;;  %v2007_v2 = vpop.xlane.xlu0 %2006 }
 0x43a   : > { %v4887_v36 = vpop.f32.mrf.mxu0  ;;  %2586 = vmatprep.mubr.bf16.mxu1 %v8013_v26  ;;  %5454 = vrcp.f32 %v2007_v2 }
 0x43b   : > { %v2307_v38 = vadd.f32 %v6746_v4, %v2271_v62  ;;  %v4888_v10 = vadd.f32 %v4887_v36, %v4886_v47 }
 0x43c   : > { %v4889_v14 = vpop.f32.mrf.mxu0 }
 0x43d   : > { %v2339_v3 = vmax.f32 %v2307_v38, 0.0  ;;  %v2272_v15 = vmul.f32 %v5435_v48, %v4888_v10  ;;  %v5449_v10 = vpop.eup %5448  ;;  %v2010_v48 = vpop.xlane.xlu1 %2009 }
 0x43e   : > { %v4890_v1 = vpop.f32.mrf.mxu0  ;;  %5456 = vrcp.f32 %v2010_v48 }
 0x43f   : > { %v4891_v29 = vadd.f32 %v4890_v1, %v4889_v14  ;;  %v2377_v30 = vpack.c.bf16 %v2339_v3, %v2338_v5  ;;  %v2308_v46 = vadd.f32 %v6746_v4, %v2272_v15 }
 0x440   : > { %v4892_v32 = vpop.f32.mrf.mxu0 }
 0x441   : > { %v2273_v34 = vmul.f32 %v5437_v51, %v4891_v29  ;;  %2587 = vmatmul.mubr.bf16.gmra.mxu1 %v2377_v30  ;;  %v2340_v55 = vmax.f32 %v2308_v46, 0.0  ;;  %v5451_v29 = vpop.eup %5450 }
 0x442   : > { %v4893_v21 = vpop.f32.mrf.mxu0  ;;  %2596 = vmatprep.mubr.bf16.mxu1 %v8013_v26 }
 0x443   : > { %v2309_v50 = vadd.f32 %v6746_v4, %v2273_v34  ;;  %v4894_v16 = vadd.f32 %v4893_v21, %v4892_v32 }
 0x444   : > { %v4895_v54 = vpop.f32.mrf.mxu0 }
 0x445   : > { %v2341_v44 = vmax.f32 %v2309_v50, 0.0  ;;  %v2274_v22 = vmul.f32 %v5439_v57, %v4894_v16  ;;  %v5453_v50 = vpop.eup %5452 }
 0x446   : > { %v4896_v25 = vpop.f32.mrf.mxu0 }
 0x447   : > { %v4897_v17 = vadd.f32 %v4896_v25, %v4895_v54  ;;  %v2378_v20 = vpack.c.bf16 %v2341_v44, %v2340_v55  ;;  %v2310_v35 = vadd.f32 %v6746_v4, %v2274_v22  ;;  %v5455_v22 = vpop.eup %5454 }
 0x448   : > { %v4898_v27 = vpop.f32.mrf.mxu0 }
 0x449   : > { %v2275_v61 = vmul.f32 %v5441_v28, %v4897_v17  ;;  %2597 = vmatmul.mubr.bf16.gmra.mxu1 %v2378_v20  ;;  %v2342_v8 = vmax.f32 %v2310_v35, 0.0 }
 0x44a   : > { %v4899_v42 = vpop.f32.mrf.mxu0  ;;  %2606 = vmatprep.mubr.bf16.mxu1 %v8013_v26 }
 0x44b   : > { %v2311_v43 = vadd.f32 %v6746_v4, %v2275_v61  ;;  %v4900_v19 = vadd.f32 %v4899_v42, %v4898_v27  ;;  %v5457_v61 = vpop.eup %5456 }
 0x44c   : > { %v4901_v13 = vpop.f32.mrf.mxu0 }
 0x44d   : > { %v2343_v40 = vmax.f32 %v2311_v43, 0.0  ;;  %v2276_v41 = vmul.f32 %v5443_v11, %v4900_v19 }
 0x44e   : > { %v4902_v60 = vpop.f32.mrf.mxu0 }
 0x44f   : > { %v4903_v56 = vadd.f32 %v4902_v60, %v4901_v13  ;;  %v2379_v33 = vpack.c.bf16 %v2343_v40, %v2342_v8  ;;  %v2312_v59 = vadd.f32 %v6746_v4, %v2276_v41  ;;  %v357_v41 = vld [vmem:[%s5855_s24 + $0x30] sm:$0xff] }
 0x450   : > { %v4904_v24 = vpop.f32.mrf.mxu0  ;;  %vm3364_vm7 = vcmp.gt.f32.partialorder %v357_v41, 0.0 }
 0x451   : > { %v2277_v37 = vmul.f32 %v5445_v0, %v4903_v56  ;;  %2607 = vmatmul.mubr.bf16.gmra.mxu1 %v2379_v33  ;;  %v2344_v45 = vmax.f32 %v2312_v59, 0.0 }
 0x452   : > { %v4905_v31 = vpop.f32.mrf.mxu0  ;;  %2616 = vmatprep.mubr.bf16.mxu1 %v8013_v26 }
 0x453   : > { %v2313_v18 = vadd.f32 %v6746_v4, %v2277_v37  ;;  %v4906_v63 = vadd.f32 %v4905_v31, %v4904_v24 }
 0x454   : > { %v4907_v52 = vpop.f32.mrf.mxu0 }
 0x455   : > { %v2345_v47 = vmax.f32 %v2313_v18, 0.0  ;;  %v2278_v9 = vmul.f32 %v5447_v49, %v4906_v63 }
 0x456   : > { %v4908_v62 = vpop.f32.mrf.mxu0 }
 0x457   : > { %v2380_v36 = vpack.c.bf16 %v2345_v47, %v2344_v45  ;;  %v4909_v38 = vadd.f32 %v4908_v62, %v4907_v52  ;;  %v2314_v14 = vadd.f32 %v6746_v4, %v2278_v9 }
 0x458   : > { %v4910_v12 = vpop.f32.mrf.mxu0 }
 0x459   : > { %v2279_v5 = vmul.f32 %v5449_v10, %v4909_v38  ;;  %2617 = vmatmul.mubr.bf16.gmra.mxu1 %v2380_v36  ;;  %v2346_v51 = vmax.f32 %v2314_v14, 0.0 }
 0x45a   : > { %v4911_v3 = vpop.f32.mrf.mxu0  ;;  %2626 = vmatprep.mubr.bf16.mxu1 %v8013_v26 }
 0x45b   : > { %v2315_v15 = vadd.f32 %v6746_v4, %v2279_v5  ;;  %v4912_v1 = vadd.f32 %v4911_v3, %v4910_v12 }
 0x45c   : > { %v4913_v30 = vpop.f32.mrf.mxu0 }
 0x45d   : > { %v2347_v7 = vmax.f32 %v2315_v15, 0.0  ;;  %v2280_v32 = vmul.f32 %v5451_v29, %v4912_v1 }
 0x45e   : > { %v4914_v46 = vpop.f32.mrf.mxu0 }
 0x45f   : > { %v2381_v34 = vpack.c.bf16 %v2347_v7, %v2346_v51  ;;  %v4915_v21 = vadd.f32 %v4914_v46, %v4913_v30  ;;  %v2316_v57 = vadd.f32 %v6746_v4, %v2280_v32 }
 0x460   : > { %v4916_v16 = vpop.f32.mrf.mxu0 }
 0x461   : > { %v2281_v23 = vmul.f32 %v5453_v50, %v4915_v21  ;;  %2627 = vmatmul.mubr.bf16.gmra.mxu1 %v2381_v34  ;;  %v2348_v17 = vmax.f32 %v2316_v57, 0.0 }
 0x462   : > { %v4917_v54 = vpop.f32.mrf.mxu0  ;;  %2636 = vmatprep.mubr.bf16.mxu1 %v8013_v26 }
 0x463   : > { %v2317_v55 = vadd.f32 %v6746_v4, %v2281_v23  ;;  %v4918_v44 = vadd.f32 %v4917_v54, %v4916_v16 }
 0x464   : > { %v4919_v25 = vpop.f32.mrf.mxu0 }
 0x465   : > { %v2349_v20 = vmax.f32 %v2317_v55, 0.0  ;;  %v2282_v28 = vmul.f32 %v5455_v22, %v4918_v44 }
 0x466   : > { %v4920_v58 = vpop.f32.mrf.mxu0 }
 0x467   : > { %v2382_v27 = vpack.c.bf16 %v2349_v20, %v2348_v17  ;;  %v4921_v35 = vadd.f32 %v4920_v58, %v4919_v25  ;;  %v2318_v42 = vadd.f32 %v6746_v4, %v2282_v28 }
 0x469   : > { %v2283_v43 = vmul.f32 %v5457_v61, %v4921_v35  ;;  %2637 = vmatmul.mubr.bf16.gmra.mxu1 %v2382_v27  ;;  %v2350_v11 = vmax.f32 %v2318_v42, 0.0 }
 0x46a   : > { %2646 = vmatprep.mubr.bf16.mxu1 %v8013_v26 }
 0x46b   : > { %v2319_v19 = vadd.f32 %v6746_v4, %v2283_v43 }
 0x46d   : > { %v2351_v6 = vmax.f32 %v2319_v19, 0.0 }
 0x46f   : > { %v2383_v13 = vpack.c.bf16 %v2351_v6, %v2350_v11 }
 0x471   : > { %2647 = vmatmul.mubr.bf16.gmra.mxu1 %v2383_v13 }
 0x4b9   : > { %v6795_v8 = vpop.f32.mrf.mxu1 }
 0x4bb   : > { %v6797_v40 = vpop.f32.mrf.mxu1 }
 0x4bc   : > { %8014 = vst [vmem:[#allocation9_spill] sm:$0xff] %v6797_v40  ;;  %v6802_v60 = vsel %vm791_vm3, %v6797_v40, 1.0 }
 0x4bd   : > { %8016 = vst [vmem:[#allocation6_spill] sm:$0xff] %v6802_v60  ;;  %v6804_v56 = vpop.f32.mrf.mxu1  ;;  %4954 = vmatprep.mubr.msk.f32.mxu0 %vm857_vm4, %v6802_v60 }
 0x4bf   : > { %v6810_v26 = vpop.f32.mrf.mxu1 }
 0x4c0   : > { %8017 = vst [vmem:[#allocation7_spill] sm:$0xff] %v6810_v26 }
 0x4c1   : > { %v6812_v33 = vpop.f32.mrf.mxu1 }
 0x4c3   : > { %v6814_v0 = vpop.f32.mrf.mxu1 }
 0x4c5   : > { %v6816_v39 = vpop.f32.mrf.mxu1 }
 0x4c7   : > { %v6820_v59 = vpop.f32.mrf.mxu1 }
 0x4c9   : > { %v6822_v37 = vpop.f32.mrf.mxu1 }
 0x4cb   : > { %v6824_v31 = vpop.f32.mrf.mxu1 }
 0x4cd   : > { %v6826_v18 = vpop.f32.mrf.mxu1 }
 0x4cf   : > { %v6830_v49 = vpop.f32.mrf.mxu1 }
 0x4d1   : > { %v6832_v2 = vpop.f32.mrf.mxu1 }
 0x4d3   : > { %v6834_v52 = vpop.f32.mrf.mxu1 }
 0x4d5   : > { %v6836_v45 = vpop.f32.mrf.mxu1 }
 0x4d7   : > { %v6840_v9 = vpop.f32.mrf.mxu1 }
 0x4d9   : > { %v6842_v62 = vpop.f32.mrf.mxu1 }
 0x4db   : > { %v6844_v36 = vpop.f32.mrf.mxu1 }
 0x4dd   : > { %v6846_v38 = vpop.f32.mrf.mxu1 }
 0x4df   : > { %v6850_v48 = vpop.f32.mrf.mxu1 }
 0x4e1   : > { %v6852_v12 = vpop.f32.mrf.mxu1 }
 0x4e3   : > { %v6854_v14 = vpop.f32.mrf.mxu1 }
 0x4e5   : > { %v6856_v5 = vpop.f32.mrf.mxu1 }
 0x4e7   : > { %v6860_v15 = vpop.f32.mrf.mxu1 }
 0x4e9   : > { %v2558_v1 = vpop.f32.mrf.mxu1 }
 0x4eb   : > { %v6862_v29 = vpop.f32.mrf.mxu1 }
 0x4ed   : > { %v2562_v30 = vpop.f32.mrf.mxu1 }
 0x4ee   : > { %v3912_v51 = vpack.c.bf16 %v2562_v30, %v2558_v1 }
 0x4ef   : > { %v6864_v7 = vpop.f32.mrf.mxu1 }
 0x4f1   : > { %v2568_v32 = vpop.f32.mrf.mxu1 }
 0x4f3   : > { %v6866_v46 = vpop.f32.mrf.mxu1 }
 0x4f5   : > { %v2572_v34 = vpop.f32.mrf.mxu1 }
 0x4f6   : > { %v3913_v21 = vpack.c.bf16 %v2572_v34, %v2568_v32 }
 0x4f7   : > { %v6868_v50 = vpop.f32.mrf.mxu1 }
 0x4f8   : > { %v2704_v26 = vsel %vm824_vm5, %v6868_v50, 1.0 }
 0x4f9   : > { %v6870_v16 = vpop.f32.mrf.mxu1 }
 0x4fb   : > { %v6872_v57 = vpop.f32.mrf.mxu1 }
 0x4fc   : > { %8018 = vst [vmem:[#allocation10_spill] sm:$0xff] %v6872_v57 }
 0x4fd   : > { %v6874_v23 = vpop.f32.mrf.mxu1 }
 0x4ff   : > { %v6878_v55 = vpop.f32.mrf.mxu1 }
 0x500   : > { %8019 = vst [vmem:[#allocation11_spill] sm:$0xff] %v6878_v55 }
 0x501   : > { %v6880_v44 = vpop.f32.mrf.mxu1 }
 0x503   : > { %v6882_v22 = vpop.f32.mrf.mxu1 }
 0x505   : > { %v6884_v25 = vpop.f32.mrf.mxu1 }
 0x507   : > { %v6888_v20 = vpop.f32.mrf.mxu1 }
 0x509   : > { %v2598_v28 = vpop.f32.mrf.mxu1 }
 0x50b   : > { %v6890_v58 = vpop.f32.mrf.mxu1 }
 0x50d   : > { %v2602_v27 = vpop.f32.mrf.mxu1 }
 0x50f   : > { %v6892_v35 = vpop.f32.mrf.mxu1 }
 0x511   : > { %v2608_v61 = vpop.f32.mrf.mxu1 }
 0x513   : > { %v6894_v42 = vpop.f32.mrf.mxu1 }
 0x515   : > { %v2612_v43 = vpop.f32.mrf.mxu1 }
 0x517   : > { %v6896_v19 = vpop.f32.mrf.mxu1 }
 0x519   : > { %v2618_v11 = vpop.f32.mrf.mxu1 }
 0x51b   : > { %v6898_v6 = vpop.f32.mrf.mxu1 }
 0x51d   : > { %v2622_v13 = vpop.f32.mrf.mxu1 }
 0x51f   : > { %v6900_v1 = vpop.f32.mrf.mxu1 }
 0x521   : > { %v2628_v30 = vpop.f32.mrf.mxu1 }
 0x523   : > { %v6902_v32 = vpop.f32.mrf.mxu1 }
 0x525   : > { %v2632_v34 = vpop.f32.mrf.mxu1 }
 0x527   : > { %v6904_v4 = vpop.f32.mrf.mxu1 }
 0x529   : > { %v2638_v54 = vpop.f32.mrf.mxu1 }
 0x52b   : > { %v6906_v24 = vpop.f32.mrf.mxu1 }
 0x52d   : > { %v2642_v17 = vpop.f32.mrf.mxu1 }
 0x52e   : > { %v3920_v40 = vpack.c.bf16 %v2642_v17, %v2638_v54  ;;  %v2701_v54 = vsel %vm824_vm5, %v6862_v29, 1.0  ;;  %v2700_v17 = vsel %vm824_vm5, %v6860_v15, 1.0 }
 0x52f   : > { %v6908_v63 = vpop.f32.mrf.mxu1 }
 0x531   : > { %v2648_v47 = vpop.f32.mrf.mxu1 }
 0x533   : > { %v6910_v10 = vpop.f32.mrf.mxu1 }
 0x534   : > { %v2719_v55 = vsel %vm824_vm5, %v6910_v10, 1.0 }
 0x535   : > { %v2652_v3 = vpop.f32.mrf.mxu1 }
 0x536   : > { %v3921_v53 = vpack.c.bf16 %v2652_v3, %v2648_v47  ;;  %v3919_v47 = vpack.c.bf16 %v2632_v34, %v2628_v30  ;;  %v2718_v3 = vsel %vm824_vm5, %v6908_v63, 1.0  ;;  %v2708_v30 = vsel %vm824_vm5, %v6888_v20, 1.0 }
 0x537   : > { %v6912_v60 = vpop.f32.mrf.mxu1  ;;  %v2692_v34 = vsel %vm824_vm5, %v6820_v59, 1.0 }
 0x538   : > { %v2720_v57 = vsel %vm824_vm5, %v6912_v60, 1.0  ;;  %5018 = vmatprep.subr.bf16.mxu1 %v3921_v53  ;;  %v2703_v53 = vsel %vm824_vm5, %v6866_v46, 1.0 }
 0x539   : > { %4922 = vmatprep.subr.msk.mxu0 %vm857_vm4, %v2720_v57  ;;  %5019 = vmatpush3.bf16.msra.mxu1 %v3913_v21  ;;  %v3918_v21 = vpack.c.bf16 %v2622_v13, %v2618_v11  ;;  %v3917_v57 = vpack.c.bf16 %v2612_v43, %v2608_v61  ;;  %v8022_v61 = vpack.c.bf16 %v6836_v45, %v6832_v2  ;;  %v2714_v2 = vsel %vm824_vm5, %v6900_v1, 1.0 }
 0x53a   : > { %4923 = vmatpush3.xpose.msk.msra.mxu0 %vm857_vm4, %v2704_v26  ;;  %5020 = vmatprep.subr.bf16.mxu1 %v3920_v40  ;;  %v2702_v40 = vsel %vm824_vm5, %v6864_v7, 1.0  ;;  %v8020_v26 = vpack.c.bf16 %v6856_v5, %v6852_v12  ;;  %v2716_v12 = vsel %vm824_vm5, %v6904_v4, 1.0  ;;  %v3916_v5 = vpack.c.bf16 %v2602_v27, %v2598_v28 }
 0x53b   : > { %4924 = vmatprep.subr.msk.mxu0 %vm857_vm4, %v2719_v55  ;;  %v8021_v55 = vpack.c.bf16 %v6846_v38, %v6842_v62  ;;  %v2715_v62 = vsel %vm824_vm5, %v6902_v32, 1.0  ;;  %v2699_v38 = vsel %vm824_vm5, %v6854_v14, 1.0  ;;  %v8023_v28 = vpack.c.bf16 %v6826_v18, %v6822_v37 }
 0x53c   : > { %v8024_v45 = vpack.c.bf16 %v6884_v25, %v6880_v44  ;;  %v2698_v27 = vsel %vm824_vm5, %v6850_v48, 1.0  ;;  %v8025_v37 = vpack.c.bf16 %v6816_v39, %v6812_v33  ;;  %v2713_v18 = vsel %vm824_vm5, %v6898_v6, 1.0 }
 0x53d   : > { %5021 = vmatpush3.bf16.msra.mxu1 %v3912_v51  ;;  %v2717_v51 = vsel %vm824_vm5, %v6906_v24, 1.0  ;;  %v8026_v44 = vpack.c.bf16 %v6874_v23, %v6870_v16  ;;  %v2697_v25 = vsel %vm824_vm5, %v6844_v36, 1.0  ;;  %v8027_v33 = vpack.c.bf16 %v6804_v56, %v6795_v8 }
 0x53e   : > { %4925 = vmatpush3.xpose.msk.msra.mxu0 %vm857_vm4, %v2703_v53  ;;  %5022 = vmatprep.subr.bf16.mxu1 %v3919_v47  ;;  %v2712_v39 = vsel %vm824_vm5, %v6896_v19, 1.0  ;;  %v2696_v16 = vsel %vm824_vm5, %v6840_v9, 1.0  ;;  %v2711_v23 = vsel %vm824_vm5, %v6894_v42, 1.0  ;;  %v2695_v8 = vsel %vm824_vm5, %v6834_v52, 1.0 }
 0x53f   : > { %4926 = vmatprep.subr.msk.mxu0 %vm857_vm4, %v2718_v3  ;;  %v2710_v56 = vsel %vm824_vm5, %v6892_v35, 1.0  ;;  %v2694_v43 = vsel %vm824_vm5, %v6830_v49, 1.0  ;;  %v2709_v11 = vsel %vm824_vm5, %v6890_v58, 1.0  ;;  %v2693_v13 = vsel %vm824_vm5, %v6824_v31, 1.0  ;;  %v8028_v3 = vld [vmem:[#allocation11_spill] sm:$0xff] }
 0x540   : > { %v2707_v47 = vsel %vm824_vm5, %v6882_v22, 1.0  ;;  %v2691_v53 = vsel %vm824_vm5, %v6814_v0, 1.0 }
 0x541   : > { %5023 = vmatpush3.bf16.msra.mxu1 %v8020_v26 }
 0x542   : > { %4927 = vmatpush3.xpose.msk.msra.mxu0 %vm857_vm4, %v2702_v40  ;;  %5024 = vmatprep.subr.bf16.mxu1 %v3918_v21  ;;  %v2706_v21 = vsel %vm824_vm5, %v8028_v3, 1.0  ;;  %v8029_v40 = vld [vmem:[#allocation7_spill] sm:$0xff] }
 0x543   : > { %4928 = vmatprep.subr.msk.mxu0 %vm857_vm4, %v2717_v51  ;;  %v2690_v26 = vsel %vm824_vm5, %v8029_v40, 1.0  ;;  %v8030_v51 = vld [vmem:[#allocation10_spill] sm:$0xff] }
 0x545   : > { %5025 = vmatpush3.bf16.msra.mxu1 %v8021_v55 }
 0x546   : > { %4929 = vmatpush3.xpose.msk.msra.mxu0 %vm857_vm4, %v2701_v54  ;;  %5026 = vmatprep.subr.bf16.mxu1 %v3917_v57  ;;  %v2705_v57 = vsel %vm824_vm5, %v8030_v51, 1.0  ;;  %v8031_v54 = vld [vmem:[#allocation9_spill] sm:$0xff] }
 0x547   : > { %4930 = vmatprep.subr.msk.mxu0 %vm857_vm4, %v2716_v12  ;;  %v2689_v55 = vsel %vm824_vm5, %v8031_v54, 1.0  ;;  %v8032_v12 = vld [vmem:[#allocation6_spill] sm:$0xff]  ;;  %v366_v54 = vld [vmem:[%s5855_s24 + $0x78] sm:$0xff] }
 0x548   : > { %vm3369_vm0 = vcmp.gt.f32.partialorder %v366_v54, 0.0 }
 0x549   : > { %5027 = vmatpush3.bf16.msra.mxu1 %v8022_v61  ;;  %v2660_v61 = vsel %vm791_vm3, %v6820_v59, 1.0  ;;  %v2663_v59 = vsel %vm791_vm3, %v6834_v52, 1.0  ;;  %v2666_v52 = vsel %vm791_vm3, %v6850_v48, 1.0  ;;  %v2669_v48 = vsel %vm791_vm3, %v6862_v29, 1.0 }
 0x54a   : > { %4931 = vmatpush3.xpose.msk.msra.mxu0 %vm857_vm4, %v2700_v17  ;;  %5028 = vmatprep.subr.bf16.mxu1 %v3916_v5  ;;  %v2658_v5 = vsel %vm791_vm3, %v8029_v40, 1.0  ;;  %v2659_v17 = vsel %vm791_vm3, %v6814_v0, 1.0  ;;  %v2662_v0 = vsel %vm791_vm3, %v6830_v49, 1.0  ;;  %v2665_v49 = vsel %vm791_vm3, %v6844_v36, 1.0 }
 0x54b   : > { %4932 = vmatprep.subr.msk.mxu0 %vm857_vm4, %v2715_v62  ;;  %v2661_v62 = vsel %vm791_vm3, %v6824_v31, 1.0  ;;  %v2664_v31 = vsel %vm791_vm3, %v6840_v9, 1.0  ;;  %v2667_v9 = vsel %vm791_vm3, %v6854_v14, 1.0  ;;  %v2668_v36 = vsel %vm791_vm3, %v6860_v15, 1.0 }
 0x54c   : > { %v2670_v14 = vsel %vm791_vm3, %v6864_v7, 1.0  ;;  %v2671_v15 = vsel %vm791_vm3, %v6866_v46, 1.0  ;;  %v2672_v29 = vsel %vm791_vm3, %v6868_v50, 1.0  ;;  %v2673_v7 = vsel %vm791_vm3, %v8030_v51, 1.0 }
 0x54d   : > { %5029 = vmatpush3.bf16.msra.mxu1 %v8023_v28  ;;  %v2674_v46 = vsel %vm791_vm3, %v8028_v3, 1.0  ;;  %v2675_v50 = vsel %vm791_vm3, %v6882_v22, 1.0  ;;  %v2677_v28 = vsel %vm791_vm3, %v6890_v58, 1.0  ;;  %v2678_v22 = vsel %vm791_vm3, %v6892_v35, 1.0 }
 0x54e   : > { %4933 = vmatpush3.xpose.msk.msra.mxu0 %vm857_vm4, %v2699_v38  ;;  %5030 = vmatprep.subr.bf16.mxu1 %v8024_v45  ;;  %v2676_v38 = vsel %vm791_vm3, %v6888_v20, 1.0  ;;  %v2679_v20 = vsel %vm791_vm3, %v6894_v42, 1.0  ;;  %v2680_v58 = vsel %vm791_vm3, %v6896_v19, 1.0  ;;  %v2681_v35 = vsel %vm791_vm3, %v6898_v6, 1.0  ;;  %v354_v45 = vld [vmem:[%s5855_s24 + $0x18] sm:$0xff] }
 0x54f   : > { %4934 = vmatprep.subr.msk.mxu0 %vm857_vm4, %v2714_v2  ;;  %v2682_v42 = vsel %vm791_vm3, %v6900_v1, 1.0  ;;  %v2683_v19 = vsel %vm791_vm3, %v6902_v32, 1.0  ;;  %v2684_v6 = vsel %vm791_vm3, %v6904_v4, 1.0  ;;  %v2685_v1 = vsel %vm791_vm3, %v6906_v24, 1.0 }
 0x550   : > { %v2686_v32 = vsel %vm791_vm3, %v6908_v63, 1.0  ;;  %v2687_v4 = vsel %vm791_vm3, %v6910_v10, 1.0  ;;  %v2688_v24 = vsel %vm791_vm3, %v6912_v60, 1.0  ;;  %v353_v63 = vld [vmem:[%s5855_s24 + $0x10] sm:$0xff]  ;;  %vm3363_vm6 = vcmp.gt.f32.partialorder %v354_v45, 0.0  ;;  %v358_v60 = vld [vmem:[%s5855_s24 + $0x38] sm:$0xff] }
 0x551   : > { %5031 = vmatpush3.bf16.msra.mxu1 %v8025_v37  ;;  %vm3362_vm1 = vcmp.gt.f32.partialorder %v353_v63, 0.0  ;;  %vm3365_vm8 = vcmp.gt.f32.partialorder %v358_v60, 0.0 }
 0x552   : > { %4935 = vmatpush3.xpose.msk.msra.mxu0 %vm857_vm4, %v2698_v27  ;;  %5032 = vmatprep.subr.bf16.mxu1 %v8026_v44 }
 0x553   : > { %4936 = vmatprep.subr.msk.mxu0 %vm857_vm4, %v2713_v18 }
 0x555   : > { %5033 = vmatpush3.bf16.msra.mxu1 %v8027_v33 }
 0x556   : > { %4937 = vmatpush3.xpose.msk.msra.mxu0 %vm857_vm4, %v2697_v25 }
 0x557   : > { %4938 = vmatprep.subr.msk.mxu0 %vm857_vm4, %v2712_v39 }
 0x55a   : > { %4939 = vmatpush3.xpose.msk.msra.mxu0 %vm857_vm4, %v2696_v16 }
 0x55b   : > { %4940 = vmatprep.subr.msk.mxu0 %vm857_vm4, %v2711_v23 }
 0x55e   : > { %4941 = vmatpush3.xpose.msk.msra.mxu0 %vm857_vm4, %v2695_v8 }
 0x55f   : > { %4942 = vmatprep.subr.msk.mxu0 %vm857_vm4, %v2710_v56 }
 0x562   : > { %4943 = vmatpush3.xpose.msk.msra.mxu0 %vm857_vm4, %v2694_v43 }
 0x563   : > { %4944 = vmatprep.subr.msk.mxu0 %vm857_vm4, %v2709_v11  ;;  %v361_v11 = vld [vmem:[%s5855_s24 + $0x50] sm:$0xff] }
 0x564   : > { %vm3366_vm11 = vcmp.gt.f32.partialorder %v361_v11, 0.0 }
 0x566   : > { %4945 = vmatpush3.xpose.msk.msra.mxu0 %vm857_vm4, %v2693_v13  ;;  %v362_v13 = vld [vmem:[%s5855_s24 + $0x58] sm:$0xff] }
 0x567   : > { %4946 = vmatprep.subr.msk.mxu0 %vm857_vm4, %v2708_v30  ;;  %vm3367_vm12 = vcmp.gt.f32.partialorder %v362_v13, 0.0 }
 0x56a   : > { %4947 = vmatpush3.xpose.msk.msra.mxu0 %vm857_vm4, %v2692_v34 }
 0x56b   : > { %4948 = vmatprep.subr.msk.mxu0 %vm857_vm4, %v2707_v47 }
 0x56e   : > { %4949 = vmatpush3.xpose.msk.msra.mxu0 %vm857_vm4, %v2691_v53 }
 0x56f   : > { %4950 = vmatprep.subr.msk.mxu0 %vm857_vm4, %v2706_v21 }
 0x572   : > { %4951 = vmatpush3.xpose.msk.msra.mxu0 %vm857_vm4, %v2690_v26 }
 0x573   : > { %4952 = vmatprep.subr.msk.mxu0 %vm857_vm4, %v2705_v57  ;;  %v365_v57 = vld [vmem:[%s5855_s24 + $0x70] sm:$0xff] }
 0x574   : > { %vm3368_vm15 = vcmp.gt.f32.partialorder %v365_v57, 0.0 }
 0x576   : > { %4953 = vmatpush3.xpose.msk.msra.mxu0 %vm857_vm4, %v2689_v55 }
 0x579   : > { %4955 = vmatmul.mubr.msk.f32.vlgmr.msra.gmra.mxu0 %vm857_vm4, %v8032_v12 }
 0x57a   : > { %4956 = vmatprep.mubr.msk.f32.mxu0 %vm857_vm4, %v2658_v5 }
 0x57d   : > { %4957 = vmatmul.mubr.msk.f32.gmra.mxu0 %vm857_vm4, %v2658_v5 }
 0x57e   : > { %4958 = vmatprep.mubr.msk.f32.mxu0 %vm857_vm4, %v2659_v17 }
 0x581   : > { %4959 = vmatmul.mubr.msk.f32.gmra.mxu0 %vm857_vm4, %v2659_v17 }
 0x582   : > { %4960 = vmatprep.mubr.msk.f32.mxu0 %vm857_vm4, %v2660_v61 }
 0x585   : > { %4961 = vmatmul.mubr.msk.f32.gmra.mxu0 %vm857_vm4, %v2660_v61 }
 0x586   : > { %4962 = vmatprep.mubr.msk.f32.mxu0 %vm857_vm4, %v2661_v62 }
 0x589   : > { %4963 = vmatmul.mubr.msk.f32.gmra.mxu0 %vm857_vm4, %v2661_v62 }
 0x58a   : > { %4964 = vmatprep.mubr.msk.f32.mxu0 %vm857_vm4, %v2662_v0 }
 0x58d   : > { %4965 = vmatmul.mubr.msk.f32.gmra.mxu0 %vm857_vm4, %v2662_v0 }
 0x58e   : > { %4966 = vmatprep.mubr.msk.f32.mxu0 %vm857_vm4, %v2663_v59 }
 0x591   : > { %4967 = vmatmul.mubr.msk.f32.gmra.mxu0 %vm857_vm4, %v2663_v59 }
 0x592   : > { %4968 = vmatprep.mubr.msk.f32.mxu0 %vm857_vm4, %v2664_v31 }
 0x595   : > { %4969 = vmatmul.mubr.msk.f32.gmra.mxu0 %vm857_vm4, %v2664_v31 }
 0x596   : > { %4970 = vmatprep.mubr.msk.f32.mxu0 %vm857_vm4, %v2665_v49 }
 0x599   : > { %4971 = vmatmul.mubr.msk.f32.gmra.mxu0 %vm857_vm4, %v2665_v49  ;;  %v369_v49 = vld [vmem:[%s5855_s24 + $0x90] sm:$0xff] }
 0x59a   : > { %4972 = vmatprep.mubr.msk.f32.mxu0 %vm857_vm4, %v2666_v52 }
 0x59d   : > { %4973 = vmatmul.mubr.msk.f32.gmra.mxu0 %vm857_vm4, %v2666_v52  ;;  %v370_v52 = vld [vmem:[%s5855_s24 + $0x98] sm:$0xff] }
 0x59e   : > { %4974 = vmatprep.mubr.msk.f32.mxu0 %vm857_vm4, %v2667_v9 }
 0x5a1   : > { %4975 = vmatmul.mubr.msk.f32.gmra.mxu0 %vm857_vm4, %v2667_v9 }
 0x5a2   : > { %4976 = vmatprep.mubr.msk.f32.mxu0 %vm857_vm4, %v2668_v36 }
 0x5a5   : > { %4977 = vmatmul.mubr.msk.f32.gmra.mxu0 %vm857_vm4, %v2668_v36 }
 0x5a6   : > { %4978 = vmatprep.mubr.msk.f32.mxu0 %vm857_vm4, %v2669_v48 }
 0x5a9   : > { %4979 = vmatmul.mubr.msk.f32.gmra.mxu0 %vm857_vm4, %v2669_v48 }
 0x5aa   : > { %4980 = vmatprep.mubr.msk.f32.mxu0 %vm857_vm4, %v2670_v14 }
 0x5ad   : > { %4981 = vmatmul.mubr.msk.f32.gmra.mxu0 %vm857_vm4, %v2670_v14 }
 0x5ae   : > { %4982 = vmatprep.mubr.msk.f32.mxu0 %vm857_vm4, %v2671_v15 }
 0x5b1   : > { %4983 = vmatmul.mubr.msk.f32.gmra.mxu0 %vm857_vm4, %v2671_v15 }
 0x5b2   : > { %4984 = vmatprep.mubr.msk.f32.mxu0 %vm857_vm4, %v2672_v29 }
 0x5b5   : > { %4985 = vmatmul.mubr.msk.f32.gmra.mxu0 %vm857_vm4, %v2672_v29 }
 0x5b6   : > { %4986 = vmatprep.mubr.msk.f32.mxu0 %vm857_vm4, %v2673_v7 }
 0x5b9   : > { %4987 = vmatmul.mubr.msk.f32.gmra.mxu0 %vm857_vm4, %v2673_v7 }
 0x5ba   : > { %4988 = vmatprep.mubr.msk.f32.mxu0 %vm857_vm4, %v2674_v46 }
 0x5bd   : > { %4989 = vmatmul.mubr.msk.f32.gmra.mxu0 %vm857_vm4, %v2674_v46 }
 0x5be   : > { %4990 = vmatprep.mubr.msk.f32.mxu0 %vm857_vm4, %v2675_v50 }
 0x5c1   : > { %4991 = vmatmul.mubr.msk.f32.gmra.mxu0 %vm857_vm4, %v2675_v50 }
 0x5c2   : > { %4992 = vmatprep.mubr.msk.f32.mxu0 %vm857_vm4, %v2676_v38 }
 0x5c5   : > { %4993 = vmatmul.mubr.msk.f32.gmra.mxu0 %vm857_vm4, %v2676_v38  ;;  %v373_v38 = vld [vmem:[%s5855_s24 + $0xb0] sm:$0xff] }
 0x5c6   : > { %4994 = vmatprep.mubr.msk.f32.mxu0 %vm857_vm4, %v2677_v28 }
 0x5c9   : > { %4995 = vmatmul.mubr.msk.f32.gmra.mxu0 %vm857_vm4, %v2677_v28  ;;  %v374_v28 = vld [vmem:[%s5855_s24 + $0xb8] sm:$0xff] }
 0x5ca   : > { %4996 = vmatprep.mubr.msk.f32.mxu0 %vm857_vm4, %v2678_v22 }
 0x5cd   : > { %4997 = vmatmul.mubr.msk.f32.gmra.mxu0 %vm857_vm4, %v2678_v22 }
 0x5ce   : > { %4998 = vmatprep.mubr.msk.f32.mxu0 %vm857_vm4, %v2679_v20 }
 0x5d1   : > { %4999 = vmatmul.mubr.msk.f32.gmra.mxu0 %vm857_vm4, %v2679_v20 }
 0x5d2   : > { %5000 = vmatprep.mubr.msk.f32.mxu0 %vm857_vm4, %v2680_v58 }
 0x5d5   : > { %5001 = vmatmul.mubr.msk.f32.gmra.mxu0 %vm857_vm4, %v2680_v58 }
 0x5d6   : > { %5002 = vmatprep.mubr.msk.f32.mxu0 %vm857_vm4, %v2681_v35 }
 0x5d9   : > { %5003 = vmatmul.mubr.msk.f32.gmra.mxu0 %vm857_vm4, %v2681_v35 }
 0x5da   : > { %5004 = vmatprep.mubr.msk.f32.mxu0 %vm857_vm4, %v2682_v42 }
 0x5dd   : > { %5005 = vmatmul.mubr.msk.f32.gmra.mxu0 %vm857_vm4, %v2682_v42 }
 0x5de   : > { %5006 = vmatprep.mubr.msk.f32.mxu0 %vm857_vm4, %v2683_v19 }
 0x5e1   : > { %5007 = vmatmul.mubr.msk.f32.gmra.mxu0 %vm857_vm4, %v2683_v19 }
 0x5e2   : > { %5008 = vmatprep.mubr.msk.f32.mxu0 %vm857_vm4, %v2684_v6 }
 0x5e5   : > { %5009 = vmatmul.mubr.msk.f32.gmra.mxu0 %vm857_vm4, %v2684_v6 }
 0x5e6   : > { %5010 = vmatprep.mubr.msk.f32.mxu0 %vm857_vm4, %v2685_v1 }
 0x5e9   : > { %5011 = vmatmul.mubr.msk.f32.gmra.mxu0 %vm857_vm4, %v2685_v1 }
 0x5ea   : > { %5012 = vmatprep.mubr.msk.f32.mxu0 %vm857_vm4, %v2686_v32 }
 0x5ed   : > { %5013 = vmatmul.mubr.msk.f32.gmra.mxu0 %vm857_vm4, %v2686_v32 }
 0x5ee   : > { %5014 = vmatprep.mubr.msk.f32.mxu0 %vm857_vm4, %v2687_v4 }
 0x5f1   : > { %5015 = vmatmul.mubr.msk.f32.gmra.mxu0 %vm857_vm4, %v2687_v4  ;;  %v377_v4 = vld [vmem:[%s5855_s24 + $0xd0] sm:$0xff] }
 0x5f2   : > { %5016 = vmatprep.mubr.msk.f32.mxu0 %vm857_vm4, %v2688_v24 }
 0x5f5   : > { %5017 = vmatmul.mubr.msk.f32.gmra.mxu0 %vm857_vm4, %v2688_v24  ;;  %v378_v24 = vld [vmem:[%s5855_s24 + $0xd8] sm:$0xff] }
 0x639   : > { %v2979_v2 = vpop.f32.mrf.mxu0 }
 0x63a   : > { %vm3170_vm5 = vcmp.ge.f32.partialorder %v2979_v2, 0.0  ;;  %v3234_v10 = vmul.f32 0.2, %v2979_v2 }
 0x63b   : > { %v2981_v27 = vpop.f32.mrf.mxu0 }
 0x63c   : > { %vm3171_vm2 = vcmp.ge.f32.partialorder %v2981_v27, 0.0  ;;  %v3235_v37 = vmul.f32 0.2, %v2981_v27  ;;  %v3298_v18 = vsel %vm3170_vm5, %v2979_v2, %v3234_v10 }
 0x63d   : > { %v2985_v44 = vpop.f32.mrf.mxu0  ;;  %v7227_v16 = vsel %vm3362_vm1, %v3298_v18, -1e+30 }
 0x63e   : > { %vm3172_vm3 = vcmp.ge.f32.partialorder %v2985_v44, 0.0  ;;  %v3236_v25 = vmul.f32 0.2, %v2985_v44  ;;  %v3299_v33 = vsel %vm3171_vm2, %v2981_v27, %v3235_v37  ;;  %vm3370_vm2 = vcmp.gt.f32.partialorder %v369_v49, 0.0 }
 0x63f   : > { %v2987_v39 = vpop.f32.mrf.mxu0  ;;  %v7229_v23 = vsel %vm3363_vm6, %v3299_v33, -1e+30  ;;  %vm3371_vm6 = vcmp.gt.f32.partialorder %v370_v52, 0.0 }
 0x640   : > { %vm3173_vm9 = vcmp.ge.f32.partialorder %v2987_v39, 0.0  ;;  %v3237_v8 = vmul.f32 0.2, %v2987_v39  ;;  %v3490_v56 = vmax.f32 %v7227_v16, %v7229_v23  ;;  %v3300_v43 = vsel %vm3172_vm3, %v2985_v44, %v3236_v25  ;;  %v381_v44 = vld [vmem:[%s5855_s24 + $0xf0] sm:$0xff]  ;;  %v382_v25 = vld [vmem:[%s5855_s24 + $0xf8] sm:$0xff] }
 0x641   : > { %v2991_v30 = vpop.f32.mrf.mxu0  ;;  %v7235_v3 = vsel %vm3364_vm7, %v3300_v43, -1e+30 }
 0x642   : > { %vm3174_vm10 = vcmp.ge.f32.partialorder %v2991_v30, 0.0  ;;  %v3238_v34 = vmul.f32 0.2, %v2991_v30  ;;  %3491 = vmax.xlane.f32.xlu0 %v3490_v56  ;;  %v3301_v47 = vsel %vm3173_vm9, %v2987_v39, %v3237_v8  ;;  %vm3373_vm9 = vcmp.gt.f32.partialorder %v374_v28, 0.0 }
 0x643   : > { %v2993_v53 = vpop.f32.mrf.mxu0  ;;  %v7237_v21 = vsel %vm3365_vm8, %v3301_v47, -1e+30  ;;  %vm3372_vm8 = vcmp.gt.f32.partialorder %v373_v38, 0.0  ;;  %v385_v47 = vld [vmem:[%s5855_s24 + $0x110] sm:$0xff]  ;;  %v394_v38 = vld [vmem:[%s5855_s24 + $0x158] sm:$0xff] }
 0x644   : > { %vm3175_vm13 = vcmp.ge.f32.partialorder %v2993_v53, 0.0  ;;  %v3239_v40 = vmul.f32 0.2, %v2993_v53  ;;  %v3493_v26 = vmax.f32 %v7235_v3, %v7237_v21  ;;  %v3302_v51 = vsel %vm3174_vm10, %v2991_v30, %v3238_v34 }
 0x645   : > { %v2997_v55 = vpop.f32.mrf.mxu0  ;;  %v7243_v61 = vsel %vm3366_vm11, %v3302_v51, -1e+30 }
 0x646   : > { %vm3176_vm14 = vcmp.ge.f32.partialorder %v2997_v55, 0.0  ;;  %v3240_v12 = vmul.f32 0.2, %v2997_v55  ;;  %3494 = vmax.xlane.f32.xlu1 %v3493_v26  ;;  %v3303_v5 = vsel %vm3175_vm13, %v2993_v53, %v3239_v40  ;;  %vm3375_vm13 = vcmp.gt.f32.partialorder %v378_v24, 0.0  ;;  %v386_v53 = vld [vmem:[%s5855_s24 + $0x118] sm:$0xff]  ;;  %v397_v24 = vld [vmem:[%s5855_s24 + $0x170] sm:$0xff] }
 0x647   : > { %v2999_v17 = vpop.f32.mrf.mxu0  ;;  %v7245_v62 = vsel %vm3367_vm12, %v3303_v5, -1e+30  ;;  %vm3374_vm12 = vcmp.gt.f32.partialorder %v377_v4, 0.0 }
 0x648   : > { %vm3177_vm5 = vcmp.ge.f32.partialorder %v2999_v17, 0.0  ;;  %v3241_v0 = vmul.f32 0.2, %v2999_v17  ;;  %v3496_v59 = vmax.f32 %v7243_v61, %v7245_v62  ;;  %v3304_v31 = vsel %vm3176_vm14, %v2997_v55, %v3240_v12 }
 0x649   : > { %v3003_v9 = vpop.f32.mrf.mxu0  ;;  %v7251_v15 = vsel %vm3368_vm15, %v3304_v31, -1e+30 }
 0x64a   : > { %vm3178_vm1 = vcmp.ge.f32.partialorder %v3003_v9, 0.0  ;;  %v3242_v36 = vmul.f32 0.2, %v3003_v9  ;;  %3497 = vmax.xlane.f32.xlu0 %v3496_v59  ;;  %v3305_v48 = vsel %vm3177_vm5, %v2999_v17, %v3241_v0  ;;  %vm3377_vm5 = vcmp.gt.f32.partialorder %v382_v25, 0.0  ;;  %v389_v0 = vld [vmem:[%s5855_s24 + $0x130] sm:$0xff]  ;;  %v390_v59 = vld [vmem:[%s5855_s24 + $0x138] sm:$0xff] }
 0x64b   : > { %v3005_v14 = vpop.f32.mrf.mxu0  ;;  %v7253_v29 = vsel %vm3369_vm0, %v3305_v48, -1e+30  ;;  %vm3376_vm0 = vcmp.gt.f32.partialorder %v381_v44, 0.0 }
 0x64c   : > { %vm3179_vm3 = vcmp.ge.f32.partialorder %v3005_v14, 0.0  ;;  %v3243_v7 = vmul.f32 0.2, %v3005_v14  ;;  %v3499_v46 = vmax.f32 %v7251_v15, %v7253_v29  ;;  %v3306_v50 = vsel %vm3178_vm1, %v3003_v9, %v3242_v36 }
 0x64d   : > { %v3009_v22 = vpop.f32.mrf.mxu0  ;;  %v7259_v42 = vsel %vm3370_vm2, %v3306_v50, -1e+30  ;;  %v393_v50 = vld [vmem:[%s5855_s24 + $0x150] sm:$0xff] }
 0x64e   : > { %vm3180_vm7 = vcmp.ge.f32.partialorder %v3009_v22, 0.0  ;;  %v3244_v20 = vmul.f32 0.2, %v3009_v22  ;;  %3500 = vmax.xlane.f32.xlu1 %v3499_v46  ;;  %v3307_v58 = vsel %vm3179_vm3, %v3005_v14, %v3243_v7  ;;  %vm3379_vm3 = vcmp.gt.f32.partialorder %v386_v53, 0.0 }
 0x64f   : > { %v3011_v35 = vpop.f32.mrf.mxu0  ;;  %v7261_v19 = vsel %vm3371_vm6, %v3307_v58, -1e+30  ;;  %vm3378_vm6 = vcmp.gt.f32.partialorder %v385_v47, 0.0 }
 0x650   : > { %vm3181_vm10 = vcmp.ge.f32.partialorder %v3011_v35, 0.0  ;;  %v3245_v6 = vmul.f32 0.2, %v3011_v35  ;;  %v3502_v1 = vmax.f32 %v7259_v42, %v7261_v19  ;;  %v3308_v32 = vsel %vm3180_vm7, %v3009_v22, %v3244_v20 }
 0x651   : > { %v3015_v63 = vpop.f32.mrf.mxu0  ;;  %v7267_v27 = vsel %vm3372_vm8, %v3308_v32, -1e+30 }
 0x652   : > { %vm3182_vm11 = vcmp.ge.f32.partialorder %v3015_v63, 0.0  ;;  %v3246_v2 = vmul.f32 0.2, %v3015_v63  ;;  %3503 = vmax.xlane.f32.xlu0 %v3502_v1  ;;  %v3309_v45 = vsel %vm3181_vm10, %v3011_v35, %v3245_v6  ;;  %vm3381_vm10 = vcmp.gt.f32.partialorder %v390_v59, 0.0 }
 0x653   : > { %v3017_v10 = vpop.f32.mrf.mxu0  ;;  %v7269_v37 = vsel %vm3373_vm9, %v3309_v45, -1e+30  ;;  %vm3380_vm9 = vcmp.gt.f32.partialorder %v389_v0, 0.0 }
 0x654   : > { %vm3183_vm14 = vcmp.ge.f32.partialorder %v3017_v10, 0.0  ;;  %v3247_v18 = vmul.f32 0.2, %v3017_v10  ;;  %v3505_v41 = vmax.f32 %v7267_v27, %v7269_v37  ;;  %v3310_v60 = vsel %vm3182_vm11, %v3015_v63, %v3246_v2  ;;  %v398_v63 = vld [vmem:[%s5855_s24 + $0x178] sm:$0xff] }
 0x655   : > { %v3021_v33 = vpop.f32.mrf.mxu0  ;;  %v7275_v43 = vsel %vm3374_vm12, %v3310_v60, -1e+30 }
 0x656   : > { %vm3184_vm15 = vcmp.ge.f32.partialorder %v3021_v33, 0.0  ;;  %v3248_v39 = vmul.f32 0.2, %v3021_v33  ;;  %3506 = vmax.xlane.f32.xlu1 %v3505_v41  ;;  %v3311_v8 = vsel %vm3183_vm14, %v3017_v10, %v3247_v18  ;;  %vm3383_vm14 = vcmp.gt.f32.partialorder %v394_v38, 0.0 }
 0x657   : > { %v3023_v56 = vpop.f32.mrf.mxu0  ;;  %v7277_v11 = vsel %vm3375_vm13, %v3311_v8, -1e+30  ;;  %vm3382_vm13 = vcmp.gt.f32.partialorder %v393_v50, 0.0  ;;  %v402_v8 = vld [vmem:[%s5855_s24 + $0x198] sm:$0xff] }
 0x658   : > { %vm3185_vm1 = vcmp.ge.f32.partialorder %v3023_v56, 0.0  ;;  %v3249_v13 = vmul.f32 0.2, %v3023_v56  ;;  %v3508_v30 = vmax.f32 %v7275_v43, %v7277_v11  ;;  %v3312_v34 = vsel %vm3184_vm15, %v3021_v33, %v3248_v39  ;;  %v401_v39 = vld [vmem:[%s5855_s24 + $0x190] sm:$0xff] }
 0x659   : > { %v3027_v40 = vpop.f32.mrf.mxu0  ;;  %v7283_v54 = vsel %vm3376_vm0, %v3312_v34, -1e+30 }
 0x65a   : > { %vm3186_vm2 = vcmp.ge.f32.partialorder %v3027_v40, 0.0  ;;  %v3250_v26 = vmul.f32 0.2, %v3027_v40  ;;  %3509 = vmax.xlane.f32.xlu0 %v3508_v30  ;;  %v3313_v51 = vsel %vm3185_vm1, %v3023_v56, %v3249_v13  ;;  %vm3385_vm1 = vcmp.gt.f32.partialorder %v398_v63, 0.0  ;;  %v414_v63 = vld [vmem:[%s5855_s24 + $0x1f8] sm:$0xff] }
 0x65b   : > { %v3029_v57 = vpop.f32.mrf.mxu0  ;;  %v7285_v55 = vsel %vm3377_vm5, %v3313_v51, -1e+30  ;;  %vm3384_vm5 = vcmp.gt.f32.partialorder %v397_v24, 0.0  ;;  %v413_v24 = vld [vmem:[%s5855_s24 + $0x1f0] sm:$0xff] }
 0x65c   : > { %vm3187_vm7 = vcmp.ge.f32.partialorder %v3029_v57, 0.0  ;;  %v3251_v12 = vmul.f32 0.2, %v3029_v57  ;;  %v3511_v5 = vmax.f32 %v7283_v54, %v7285_v55  ;;  %v3314_v17 = vsel %vm3186_vm2, %v3027_v40, %v3250_v26 }
 0x65d   : > { %v3033_v31 = vpop.f32.mrf.mxu0  ;;  %v7291_v36 = vsel %vm3378_vm6, %v3314_v17, -1e+30 }
 0x65e   : > { %vm3188_vm8 = vcmp.ge.f32.partialorder %v3033_v31, 0.0  ;;  %v3252_v49 = vmul.f32 0.2, %v3033_v31  ;;  %3512 = vmax.xlane.f32.xlu1 %v3511_v5  ;;  %v3315_v52 = vsel %vm3187_vm7, %v3029_v57, %v3251_v12  ;;  %vm3387_vm7 = vcmp.gt.f32.partialorder %v402_v8, 0.0  ;;  %v405_v57 = vld [vmem:[%s5855_s24 + $0x1b0] sm:$0xff]  ;;  %v406_v12 = vld [vmem:[%s5855_s24 + $0x1b8] sm:$0xff] }
 0x65f   : > { %v3035_v9 = vpop.f32.mrf.mxu0  ;;  %v7293_v48 = vsel %vm3379_vm3, %v3315_v52, -1e+30  ;;  %vm3386_vm3 = vcmp.gt.f32.partialorder %v401_v39, 0.0 }
 0x660   : > { %vm3189_vm11 = vcmp.ge.f32.partialorder %v3035_v9, 0.0  ;;  %v3253_v14 = vmul.f32 0.2, %v3035_v9  ;;  %v3514_v7 = vmax.f32 %v7291_v36, %v7293_v48  ;;  %v3316_v46 = vsel %vm3188_vm8, %v3033_v31, %v3252_v49 }
 0x661   : > { %v3039_v28 = vpop.f32.mrf.mxu0  ;;  %v7299_v35 = vsel %vm3380_vm9, %v3316_v46, -1e+30  ;;  %v410_v46 = vld [vmem:[%s5855_s24 + $0x1d8] sm:$0xff] }
 0x662   : > { %vm3190_vm12 = vcmp.ge.f32.partialorder %v3039_v28, 0.0  ;;  %v3254_v22 = vmul.f32 0.2, %v3039_v28  ;;  %3515 = vmax.xlane.f32.xlu0 %v3514_v7  ;;  %v3317_v20 = vsel %vm3189_vm11, %v3035_v9, %v3253_v14  ;;  %vm3389_vm11 = vcmp.gt.f32.partialorder %v406_v12, 0.0  ;;  %v409_v7 = vld [vmem:[%s5855_s24 + $0x1d0] sm:$0xff] }
 0x663   : > { %v3041_v58 = vpop.f32.mrf.mxu0  ;;  %v7301_v6 = vsel %vm3381_vm10, %v3317_v20, -1e+30  ;;  %vm3388_vm10 = vcmp.gt.f32.partialorder %v405_v57, 0.0 }
 0x664   : > { %vm3191_vm15 = vcmp.ge.f32.partialorder %v3041_v58, 0.0  ;;  %v3255_v1 = vmul.f32 0.2, %v3041_v58  ;;  %v3517_v32 = vmax.f32 %v7299_v35, %v7301_v6  ;;  %v3318_v4 = vsel %vm3190_vm12, %v3039_v28, %v3254_v22 }
 0x665   : > { %v3045_v2 = vpop.f32.mrf.mxu0  ;;  %v7307_v41 = vsel %vm3382_vm13, %v3318_v4, -1e+30 }
 0x666   : > { %vm3192_vm0 = vcmp.ge.f32.partialorder %v3045_v2, 0.0  ;;  %v3256_v45 = vmul.f32 0.2, %v3045_v2  ;;  %3518 = vmax.xlane.f32.xlu1 %v3517_v32  ;;  %v3319_v10 = vsel %vm3191_vm15, %v3041_v58, %v3255_v1  ;;  %vm3391_vm15 = vcmp.gt.f32.partialorder %v410_v46, 0.0 }
 0x667   : > { %v3047_v18 = vpop.f32.mrf.mxu0  ;;  %v7309_v60 = vsel %vm3383_vm14, %v3319_v10, -1e+30  ;;  %vm3390_vm14 = vcmp.gt.f32.partialorder %v409_v7, 0.0 }
 0x668   : > { %vm3193_vm2 = vcmp.ge.f32.partialorder %v3047_v18, 0.0  ;;  %v3257_v44 = vmul.f32 0.2, %v3047_v18  ;;  %v3520_v25 = vmax.f32 %v7307_v41, %v7309_v60  ;;  %v3320_v33 = vsel %vm3192_vm0, %v3045_v2, %v3256_v45 }
 0x669   : > { %v3051_v56 = vpop.f32.mrf.mxu0  ;;  %v7315_v47 = vsel %vm3384_vm5, %v3320_v33, -1e+30 }
 0x66a   : > { %vm3194_vm6 = vcmp.ge.f32.partialorder %v3051_v56, 0.0  ;;  %v3258_v13 = vmul.f32 0.2, %v3051_v56  ;;  %3521 = vmax.xlane.f32.xlu0 %v3520_v25  ;;  %v3321_v30 = vsel %vm3193_vm2, %v3047_v18, %v3257_v44  ;;  %vm3393_vm2 = vcmp.gt.f32.partialorder %v414_v63, 0.0 }
 0x66b   : > { %v3053_v34 = vpop.f32.mrf.mxu0  ;;  %v7317_v53 = vsel %vm3385_vm1, %v3321_v30, -1e+30  ;;  %vm3392_vm1 = vcmp.gt.f32.partialorder %v413_v24, 0.0 }
 0x66c   : > { %vm3195_vm8 = vcmp.ge.f32.partialorder %v3053_v34, 0.0  ;;  %v3259_v40 = vmul.f32 0.2, %v3053_v34  ;;  %v3523_v26 = vmax.f32 %v7315_v47, %v7317_v53  ;;  %v3322_v51 = vsel %vm3194_vm6, %v3051_v56, %v3258_v13  ;;  %v417_v56 = vld [vmem:[%s5855_s24 + $0x210] sm:$0xff]  ;;  %v418_v13 = vld [vmem:[%s5855_s24 + $0x218] sm:$0xff] }
 0x66d   : > { %v3057_v5 = vpop.f32.mrf.mxu0  ;;  %v7323_v31 = vsel %vm3386_vm3, %v3322_v51, -1e+30 }
 0x66e   : > { %vm3196_vm9 = vcmp.ge.f32.partialorder %v3057_v5, 0.0  ;;  %v3260_v17 = vmul.f32 0.2, %v3057_v5  ;;  %3524 = vmax.xlane.f32.xlu1 %v3523_v26  ;;  %v3323_v0 = vsel %vm3195_vm8, %v3053_v34, %v3259_v40  ;;  %vm3395_vm8 = vcmp.gt.f32.partialorder %v418_v13, 0.0 }
 0x66f   : > { %v3059_v59 = vpop.f32.mrf.mxu0  ;;  %v7325_v49 = vsel %vm3387_vm7, %v3323_v0, -1e+30  ;;  %vm3394_vm7 = vcmp.gt.f32.partialorder %v417_v56, 0.0  ;;  %v421_v0 = vld [vmem:[%s5855_s24 + $0x230] sm:$0xff]  ;;  %v430_v56 = vld [vmem:[%s5855_s24 + $0x278] sm:$0xff] }
 0x670   : > { %vm3197_vm12 = vcmp.ge.f32.partialorder %v3059_v59, 0.0  ;;  %v3261_v52 = vmul.f32 0.2, %v3059_v59  ;;  %v3526_v9 = vmax.f32 %v7323_v31, %v7325_v49  ;;  %v3324_v14 = vsel %vm3196_vm9, %v3057_v5, %v3260_v17 }
 0x671   : > { %v3063_v50 = vpop.f32.mrf.mxu0  ;;  %v7331_v20 = vsel %vm3388_vm10, %v3324_v14, -1e+30 }
 0x672   : > { %vm3198_vm13 = vcmp.ge.f32.partialorder %v3063_v50, 0.0  ;;  %v3262_v38 = vmul.f32 0.2, %v3063_v50  ;;  %3527 = vmax.xlane.f32.xlu0 %v3526_v9  ;;  %v3325_v28 = vsel %vm3197_vm12, %v3059_v59, %v3261_v52  ;;  %v422_v59 = vld [vmem:[%s5855_s24 + $0x238] sm:$0xff] }
 0x673   : > { %v3065_v22 = vpop.f32.mrf.mxu0  ;;  %v7333_v58 = vsel %vm3389_vm11, %v3325_v28, -1e+30  ;;  %vm3396_vm11 = vcmp.gt.f32.partialorder %v421_v0, 0.0  ;;  %vm3397_vm12 = vcmp.gt.f32.partialorder %v422_v59, 0.0  ;;  %v433_v59 = vld [vmem:[%s5855_s24 + $0x290] sm:$0xff] }
 0x674   : > { %vm3199_vm0 = vcmp.ge.f32.partialorder %v3065_v22, 0.0  ;;  %v3263_v1 = vmul.f32 0.2, %v3065_v22  ;;  %v3529_v32 = vmax.f32 %v7331_v20, %v7333_v58  ;;  %v3326_v4 = vsel %vm3198_vm13, %v3063_v50, %v3262_v38 }
 0x675   : > { %v3069_v2 = vpop.f32.mrf.mxu0  ;;  %v7339_v44 = vsel %vm3390_vm14, %v3326_v4, -1e+30 }
 0x676   : > { %vm3200_vm5 = vcmp.ge.f32.partialorder %v3069_v2, 0.0  ;;  %v3264_v45 = vmul.f32 0.2, %v3069_v2  ;;  %3530 = vmax.xlane.f32.xlu1 %v3529_v32  ;;  %v3327_v10 = vsel %vm3199_vm0, %v3065_v22, %v3263_v1  ;;  %v425_v1 = vld [vmem:[%s5855_s24 + $0x250] sm:$0xff]  ;;  %v426_v32 = vld [vmem:[%s5855_s24 + $0x258] sm:$0xff] }
 0x677   : > { %v3071_v18 = vpop.f32.mrf.mxu0  ;;  %v7341_v25 = vsel %vm3391_vm15, %v3327_v10, -1e+30  ;;  %vm3398_vm15 = vcmp.gt.f32.partialorder %v425_v1, 0.0  ;;  %vm3399_vm0 = vcmp.gt.f32.partialorder %v426_v32, 0.0 }
 0x678   : > { %vm3201_vm6 = vcmp.ge.f32.partialorder %v3071_v18, 0.0  ;;  %v3265_v33 = vmul.f32 0.2, %v3071_v18  ;;  %v3532_v39 = vmax.f32 %v7339_v44, %v7341_v25  ;;  %v3328_v8 = vsel %vm3200_vm5, %v3069_v2, %v3264_v45 }
 0x679   : > { %v3075_v30 = vpop.f32.mrf.mxu0  ;;  %v7347_v51 = vsel %vm3392_vm1, %v3328_v8, -1e+30  ;;  %v429_v8 = vld [vmem:[%s5855_s24 + $0x270] sm:$0xff] }
 0x67a   : > { %vm3202_vm3 = vcmp.ge.f32.partialorder %v3075_v30, 0.0  ;;  %v3266_v34 = vmul.f32 0.2, %v3075_v30  ;;  %3533 = vmax.xlane.f32.xlu0 %v3532_v39  ;;  %v3329_v40 = vsel %vm3201_vm6, %v3071_v18, %v3265_v33  ;;  %vm3401_vm6 = vcmp.gt.f32.partialorder %v430_v56, 0.0 }
 0x67b   : > { %v3077_v26 = vpop.f32.mrf.mxu0  ;;  %v7349_v57 = vsel %vm3393_vm2, %v3329_v40, -1e+30  ;;  %vm3400_vm2 = vcmp.gt.f32.partialorder %v429_v8, 0.0 }
 0x67c   : > { %vm3203_vm9 = vcmp.ge.f32.partialorder %v3077_v26, 0.0  ;;  %v3267_v12 = vmul.f32 0.2, %v3077_v26  ;;  %v3535_v5 = vmax.f32 %v7347_v51, %v7349_v57  ;;  %v3330_v17 = vsel %vm3202_vm3, %v3075_v30, %v3266_v34 }
 0x67d   : > { %v3081_v52 = vpop.f32.mrf.mxu0  ;;  %v7355_v46 = vsel %vm3394_vm7, %v3330_v17, -1e+30 }
 0x67e   : > { %vm3204_vm10 = vcmp.ge.f32.partialorder %v3081_v52, 0.0  ;;  %v3268_v9 = vmul.f32 0.2, %v3081_v52  ;;  %3536 = vmax.xlane.f32.xlu1 %v3535_v5  ;;  %v3331_v14 = vsel %vm3203_vm9, %v3077_v26, %v3267_v12 }
 0x67f   : > { %v3083_v7 = vpop.f32.mrf.mxu0  ;;  %v7357_v50 = vsel %vm3395_vm8, %v3331_v14, -1e+30  ;;  %vm3402_vm8 = vcmp.gt.f32.partialorder %v433_v59, 0.0 }
 0x680   : > { %vm3205_vm13 = vcmp.ge.f32.partialorder %v3083_v7, 0.0  ;;  %v3269_v38 = vmul.f32 0.2, %v3083_v7  ;;  %v3538_v28 = vmax.f32 %v7355_v46, %v7357_v50  ;;  %v3332_v22 = vsel %vm3204_vm10, %v3081_v52, %v3268_v9  ;;  %v434_v52 = vld [vmem:[%s5855_s24 + $0x298] sm:$0xff] }
 0x681   : > { %v3087_v4 = vpop.f32.mrf.mxu0  ;;  %v7363_v45 = vsel %vm3396_vm11, %v3332_v22, -1e+30  ;;  %vm3403_vm9 = vcmp.gt.f32.partialorder %v434_v52, 0.0 }
 0x682   : > { %vm3206_vm14 = vcmp.ge.f32.partialorder %v3087_v4, 0.0  ;;  %v3270_v24 = vmul.f32 0.2, %v3087_v4  ;;  %3539 = vmax.xlane.f32.xlu0 %v3538_v28  ;;  %v3333_v63 = vsel %vm3205_vm13, %v3083_v7, %v3269_v38 }
 0x683   : > { %v3089_v2 = vpop.f32.mrf.mxu0  ;;  %v7365_v10 = vsel %vm3397_vm12, %v3333_v63, -1e+30  ;;  %v438_v63 = vld [vmem:[%s5855_s24 + $0x2b8] sm:$0xff] }
 0x684   : > { %vm3207_vm5 = vcmp.ge.f32.partialorder %v3089_v2, 0.0  ;;  %v3271_v18 = vmul.f32 0.2, %v3089_v2  ;;  %v3541_v33 = vmax.f32 %v7363_v45, %v7365_v10  ;;  %v3334_v39 = vsel %vm3206_vm14, %v3087_v4, %v3270_v24  ;;  %v437_v24 = vld [vmem:[%s5855_s24 + $0x2b0] sm:$0xff] }
 0x685   : > { %v3093_v13 = vpop.f32.mrf.mxu0  ;;  %v7371_v26 = vsel %vm3398_vm15, %v3334_v39, -1e+30  ;;  %vm3404_vm12 = vcmp.gt.f32.partialorder %v437_v24, 0.0  ;;  %vm3405_vm13 = vcmp.gt.f32.partialorder %v438_v63, 0.0 }
 0x686   : > { %vm3208_vm1 = vcmp.ge.f32.partialorder %v3093_v13, 0.0  ;;  %v3272_v30 = vmul.f32 0.2, %v3093_v13  ;;  %3542 = vmax.xlane.f32.xlu1 %v3541_v33  ;;  %v3335_v34 = vsel %vm3207_vm5, %v3089_v2, %v3271_v18 }
 0x687   : > { %v3095_v40 = vpop.f32.mrf.mxu0  ;;  %v7373_v12 = vsel %vm3399_vm0, %v3335_v34, -1e+30 }
 0x688   : > { %vm3209_vm3 = vcmp.ge.f32.partialorder %v3095_v40, 0.0  ;;  %v3273_v5 = vmul.f32 0.2, %v3095_v40  ;;  %v3544_v17 = vmax.f32 %v7371_v26, %v7373_v12  ;;  %v3336_v0 = vsel %vm3208_vm1, %v3093_v13, %v3272_v30 }
 0x689   : > { %v3099_v9 = vpop.f32.mrf.mxu0  ;;  %v7379_v28 = vsel %vm3400_vm2, %v3336_v0, -1e+30 }
 0x68a   : > { %vm3210_vm7 = vcmp.ge.f32.partialorder %v3099_v9, 0.0  ;;  %v3274_v14 = vmul.f32 0.2, %v3099_v9  ;;  %3545 = vmax.xlane.f32.xlu0 %v3544_v17  ;;  %v3337_v7 = vsel %vm3209_vm3, %v3095_v40, %v3273_v5  ;;  %v441_v40 = vld [vmem:[%s5855_s24 + $0x2d0] sm:$0xff]  ;;  %v442_v5 = vld [vmem:[%s5855_s24 + $0x2d8] sm:$0xff] }
 0x68b   : > { %v3101_v38 = vpop.f32.mrf.mxu0  ;;  %v7381_v22 = vsel %vm3401_vm6, %v3337_v7, -1e+30  ;;  %vm3406_vm0 = vcmp.gt.f32.partialorder %v441_v40, 0.0  ;;  %vm3407_vm5 = vcmp.gt.f32.partialorder %v442_v5, 0.0  ;;  %v449_v40 = vld [vmem:[%s5855_s24 + $0x310] sm:$0xff]  ;;  %v450_v5 = vld [vmem:[%s5855_s24 + $0x318] sm:$0xff] }
 0x68c   : > { %vm3211_vm10 = vcmp.ge.f32.partialorder %v3101_v38, 0.0  ;;  %v3275_v1 = vmul.f32 0.2, %v3101_v38  ;;  %v3547_v32 = vmax.f32 %v7379_v28, %v7381_v22  ;;  %v3338_v4 = vsel %vm3210_vm7, %v3099_v9, %v3274_v14 }
 0x68d   : > { %v3105_v2 = vpop.f32.mrf.mxu0  ;;  %v7387_v8 = vsel %vm3402_vm8, %v3338_v4, -1e+30  ;;  %v446_v4 = vld [vmem:[%s5855_s24 + $0x2f8] sm:$0xff] }
 0x68e   : > { %vm3212_vm11 = vcmp.ge.f32.partialorder %v3105_v2, 0.0  ;;  %v3276_v18 = vmul.f32 0.2, %v3105_v2  ;;  %3548 = vmax.xlane.f32.xlu1 %v3547_v32  ;;  %v3339_v33 = vsel %vm3211_vm10, %v3101_v38, %v3275_v1  ;;  %v445_v32 = vld [vmem:[%s5855_s24 + $0x2f0] sm:$0xff]  ;;  %vm3409_vm3 = vcmp.gt.f32.partialorder %v446_v4, 0.0 }
 0x68f   : > { %v3107_v39 = vpop.f32.mrf.mxu0  ;;  %v7389_v56 = vsel %vm3403_vm9, %v3339_v33, -1e+30  ;;  %vm3408_vm6 = vcmp.gt.f32.partialorder %v445_v32, 0.0  ;;  %vm3410_vm9 = vcmp.gt.f32.partialorder %v449_v40, 0.0  ;;  %vm3411_vm10 = vcmp.gt.f32.partialorder %v450_v5, 0.0 }
 0x690   : > { %vm3213_vm14 = vcmp.ge.f32.partialorder %v3107_v39, 0.0  ;;  %v3277_v13 = vmul.f32 0.2, %v3107_v39  ;;  %v3550_v30 = vmax.f32 %v7387_v8, %v7389_v56  ;;  %v3340_v34 = vsel %vm3212_vm11, %v3105_v2, %v3276_v18 }
 0x691   : > { %v3111_v17 = vpop.f32.mrf.mxu0  ;;  %v7395_v9 = vsel %vm3404_vm12, %v3340_v34, -1e+30 }
 0x692   : > { %vm3214_vm15 = vcmp.ge.f32.partialorder %v3111_v17, 0.0  ;;  %v3278_v0 = vmul.f32 0.2, %v3111_v17  ;;  %3551 = vmax.xlane.f32.xlu0 %v3550_v30  ;;  %v3341_v59 = vsel %vm3213_vm14, %v3107_v39, %v3277_v13 }
 0x693   : > { %v3113_v52 = vpop.f32.mrf.mxu0  ;;  %v7397_v14 = vsel %vm3405_vm13, %v3341_v59, -1e+30 }
 0x694   : > { %vm3215_vm1 = vcmp.ge.f32.partialorder %v3113_v52, 0.0  ;;  %v3279_v7 = vmul.f32 0.2, %v3113_v52  ;;  %v3553_v38 = vmax.f32 %v7395_v9, %v7397_v14  ;;  %v3342_v1 = vsel %vm3214_vm15, %v3111_v17, %v3278_v0 }
 0x695   : > { %v3117_v24 = vpop.f32.mrf.mxu0  ;;  %v7403_v33 = vsel %vm3406_vm0, %v3342_v1, -1e+30 }
 0x696   : > { %vm3216_vm2 = vcmp.ge.f32.partialorder %v3117_v24, 0.0  ;;  %v3280_v63 = vmul.f32 0.2, %v3117_v24  ;;  %3554 = vmax.xlane.f32.xlu1 %v3553_v38  ;;  %v3343_v2 = vsel %vm3215_vm1, %v3113_v52, %v3279_v7 }
 0x697   : > { %v3119_v18 = vpop.f32.mrf.mxu0  ;;  %v7405_v39 = vsel %vm3407_vm5, %v3343_v2, -1e+30 }
 0x698   : > { %8033 = vst [vmem:[#allocation12_spill] sm:$0xff] %v7405_v39  ;;  %vm3217_vm7 = vcmp.ge.f32.partialorder %v3119_v18, 0.0  ;;  %v3281_v13 = vmul.f32 0.2, %v3119_v18  ;;  %v3556_v30 = vmax.f32 %v7403_v33, %v7405_v39  ;;  %v3344_v34 = vsel %vm3216_vm2, %v3117_v24, %v3280_v63  ;;  %v453_v24 = vld [vmem:[%s5855_s24 + $0x330] sm:$0xff]  ;;  %v454_v63 = vld [vmem:[%s5855_s24 + $0x338] sm:$0xff] }
 0x699   : > { %v3123_v17 = vpop.f32.mrf.mxu0  ;;  %v7411_v7 = vsel %vm3408_vm6, %v3344_v34, -1e+30  ;;  %vm3412_vm13 = vcmp.gt.f32.partialorder %v453_v24, 0.0  ;;  %vm3413_vm14 = vcmp.gt.f32.partialorder %v454_v63, 0.0 }
 0x69a   : > { %vm3218_vm8 = vcmp.ge.f32.partialorder %v3123_v17, 0.0  ;;  %v3282_v0 = vmul.f32 0.2, %v3123_v17  ;;  %3557 = vmax.xlane.f32.xlu0 %v3556_v30  ;;  %v3345_v59 = vsel %vm3217_vm7, %v3119_v18, %v3281_v13  ;;  %8034 = vst [vmem:[#allocation13_spill] sm:$0xff] %v7411_v7 }
 0x69b   : > { %v3125_v52 = vpop.f32.mrf.mxu0  ;;  %v7413_v38 = vsel %vm3409_vm3, %v3345_v59, -1e+30  ;;  %v457_v59 = vld [vmem:[%s5855_s24 + $0x350] sm:$0xff] }
 0x69c   : > { %8035 = vst [vmem:[#allocation14_spill] sm:$0xff] %v7413_v38  ;;  %vm3219_vm11 = vcmp.ge.f32.partialorder %v3125_v52, 0.0  ;;  %v3283_v1 = vmul.f32 0.2, %v3125_v52  ;;  %v3559_v32 = vmax.f32 %v7411_v7, %v7413_v38  ;;  %v3346_v4 = vsel %vm3218_vm8, %v3123_v17, %v3282_v0  ;;  %v458_v38 = vld [vmem:[%s5855_s24 + $0x358] sm:$0xff] }
 0x69d   : > { %v3129_v2 = vpop.f32.mrf.mxu0  ;;  %v7419_v34 = vsel %vm3410_vm9, %v3346_v4, -1e+30  ;;  %vm3414_vm5 = vcmp.gt.f32.partialorder %v457_v59, 0.0  ;;  %vm3415_vm1 = vcmp.gt.f32.partialorder %v458_v38, 0.0 }
 0x69e   : > { %vm3220_vm12 = vcmp.ge.f32.partialorder %v3129_v2, 0.0  ;;  %v3284_v18 = vmul.f32 0.2, %v3129_v2  ;;  %3560 = vmax.xlane.f32.xlu1 %v3559_v32  ;;  %v3347_v13 = vsel %vm3219_vm11, %v3125_v52, %v3283_v1  ;;  %8036 = vst [vmem:[#allocation15_spill] sm:$0xff] %v7419_v34 }
 0x69f   : > { %v3131_v30 = vpop.f32.mrf.mxu0  ;;  %v7421_v40 = vsel %vm3411_vm10, %v3347_v13, -1e+30  ;;  %v461_v13 = vld [vmem:[%s5855_s24 + $0x370] sm:$0xff] }
 0x6a0   : > { %8037 = vst [vmem:[#allocation16_spill] sm:$0xff] %v7421_v40  ;;  %vm3221_vm15 = vcmp.ge.f32.partialorder %v3131_v30, 0.0  ;;  %v3285_v5 = vmul.f32 0.2, %v3131_v30  ;;  %v3562_v17 = vmax.f32 %v7419_v34, %v7421_v40  ;;  %v3348_v0 = vsel %vm3220_vm12, %v3129_v2, %v3284_v18  ;;  %v462_v40 = vld [vmem:[%s5855_s24 + $0x378] sm:$0xff] }
 0x6a1   : > { %v3135_v7 = vpop.f32.mrf.mxu0  ;;  %v7427_v4 = vsel %vm3412_vm13, %v3348_v0, -1e+30  ;;  %vm3416_vm3 = vcmp.gt.f32.partialorder %v461_v13, 0.0  ;;  %vm3417_vm7 = vcmp.gt.f32.partialorder %v462_v40, 0.0 }
 0x6a2   : > { %vm3222_vm0 = vcmp.ge.f32.partialorder %v3135_v7, 0.0  ;;  %v3286_v52 = vmul.f32 0.2, %v3135_v7  ;;  %3563 = vmax.xlane.f32.xlu0 %v3562_v17  ;;  %v3349_v1 = vsel %vm3221_vm15, %v3131_v30, %v3285_v5  ;;  %8038 = vst [vmem:[#allocation17_spill] sm:$0xff] %v7427_v4 }
 0x6a3   : > { %v3137_v32 = vpop.f32.mrf.mxu0  ;;  %v7429_v24 = vsel %vm3413_vm14, %v3349_v1, -1e+30  ;;  %v465_v1 = vld [vmem:[%s5855_s24 + $0x390] sm:$0xff] }
 0x6a4   : > { %8039 = vst [vmem:[#allocation18_spill] sm:$0xff] %v7429_v24  ;;  %vm3223_vm2 = vcmp.ge.f32.partialorder %v3137_v32, 0.0  ;;  %v3287_v63 = vmul.f32 0.2, %v3137_v32  ;;  %v3565_v2 = vmax.f32 %v7427_v4, %v7429_v24  ;;  %v3350_v18 = vsel %vm3222_vm0, %v3135_v7, %v3286_v52  ;;  %v466_v24 = vld [vmem:[%s5855_s24 + $0x398] sm:$0xff] }
 0x6a5   : > { %v3141_v34 = vpop.f32.mrf.mxu0  ;;  %v7435_v0 = vsel %vm3414_vm5, %v3350_v18, -1e+30  ;;  %vm3418_vm10 = vcmp.gt.f32.partialorder %v465_v1, 0.0  ;;  %vm3419_vm11 = vcmp.gt.f32.partialorder %v466_v24, 0.0 }
 0x6a6   : > { %vm3224_vm6 = vcmp.ge.f32.partialorder %v3141_v34, 0.0  ;;  %v3288_v30 = vmul.f32 0.2, %v3141_v34  ;;  %3566 = vmax.xlane.f32.xlu1 %v3565_v2  ;;  %v3351_v5 = vsel %vm3223_vm2, %v3137_v32, %v3287_v63  ;;  %8040 = vst [vmem:[#allocation19_spill] sm:$0xff] %v7435_v0 }
 0x6a7   : > { %v3143_v17 = vpop.f32.mrf.mxu0  ;;  %v7437_v59 = vsel %vm3415_vm1, %v3351_v5, -1e+30  ;;  %v469_v5 = vld [vmem:[%s5855_s24 + $0x3b0] sm:$0xff] }
 0x6a8   : > { %8041 = vst [vmem:[#allocation5_spill] sm:$0xff] %v7437_v59  ;;  %vm3225_vm8 = vcmp.ge.f32.partialorder %v3143_v17, 0.0  ;;  %v3289_v38 = vmul.f32 0.2, %v3143_v17  ;;  %v3568_v7 = vmax.f32 %v7435_v0, %v7437_v59  ;;  %v3352_v52 = vsel %vm3224_vm6, %v3141_v34, %v3288_v30  ;;  %v470_v59 = vld [vmem:[%s5855_s24 + $0x3b8] sm:$0xff] }
 0x6a9   : > { %v3147_v4 = vpop.f32.mrf.mxu0  ;;  %v7443_v18 = vsel %vm3416_vm3, %v3352_v52, -1e+30  ;;  %vm3420_vm14 = vcmp.gt.f32.partialorder %v469_v5, 0.0  ;;  %vm3421_vm15 = vcmp.gt.f32.partialorder %v470_v59, 0.0 }
 0x6aa   : > { %vm3226_vm9 = vcmp.ge.f32.partialorder %v3147_v4, 0.0  ;;  %v3290_v32 = vmul.f32 0.2, %v3147_v4  ;;  %3569 = vmax.xlane.f32.xlu0 %v3568_v7  ;;  %v3353_v63 = vsel %vm3225_vm8, %v3143_v17, %v3289_v38  ;;  %8042 = vst [vmem:[#allocation11_spill] sm:$0xff] %v7443_v18 }
 0x6ab   : > { %v3149_v2 = vpop.f32.mrf.mxu0  ;;  %v7445_v13 = vsel %vm3417_vm7, %v3353_v63, -1e+30  ;;  %v473_v63 = vld [vmem:[%s5855_s24 + $0x3d0] sm:$0xff] }
 0x6ac   : > { %8043 = vst [vmem:[#allocation7_spill] sm:$0xff] %v7445_v13  ;;  %vm3227_vm12 = vcmp.ge.f32.partialorder %v3149_v2, 0.0  ;;  %v3291_v40 = vmul.f32 0.2, %v3149_v2  ;;  %v3571_v34 = vmax.f32 %v7443_v18, %v7445_v13  ;;  %v3354_v30 = vsel %vm3226_vm9, %v3147_v4, %v3290_v32  ;;  %v474_v13 = vld [vmem:[%s5855_s24 + $0x3d8] sm:$0xff] }
 0x6ad   : > { %v3153_v0 = vpop.f32.mrf.mxu0  ;;  %v7451_v52 = vsel %vm3418_vm10, %v3354_v30, -1e+30  ;;  %vm3422_vm1 = vcmp.gt.f32.partialorder %v473_v63, 0.0  ;;  %vm3423_vm2 = vcmp.gt.f32.partialorder %v474_v13, 0.0 }
 0x6ae   : > { %vm3228_vm13 = vcmp.ge.f32.partialorder %v3153_v0, 0.0  ;;  %v3292_v17 = vmul.f32 0.2, %v3153_v0  ;;  %3572 = vmax.xlane.f32.xlu1 %v3571_v34  ;;  %v3355_v38 = vsel %vm3227_vm12, %v3149_v2, %v3291_v40  ;;  %8044 = vst [vmem:[#allocation10_spill] sm:$0xff] %v7451_v52 }
 0x6af   : > { %v3155_v7 = vpop.f32.mrf.mxu0  ;;  %v7453_v1 = vsel %vm3419_vm11, %v3355_v38, -1e+30  ;;  %v477_v38 = vld [vmem:[%s5855_s24 + $0x3f0] sm:$0xff] }
 0x6b0   : > { %8045 = vst [vmem:[#allocation9_spill] sm:$0xff] %v7453_v1  ;;  %vm3229_vm0 = vcmp.ge.f32.partialorder %v3155_v7, 0.0  ;;  %v3293_v24 = vmul.f32 0.2, %v3155_v7  ;;  %v3574_v4 = vmax.f32 %v7451_v52, %v7453_v1  ;;  %v3356_v32 = vsel %vm3228_vm13, %v3153_v0, %v3292_v17  ;;  %v478_v1 = vld [vmem:[%s5855_s24 + $0x3f8] sm:$0xff]  ;;  %s4534_s24 = sshll.u32 %s5795_s28, 2 }
 0x6b1   : > { %v3159_v18 = vpop.f32.mrf.mxu0  ;;  %v7459_v30 = vsel %vm3420_vm14, %v3356_v32, -1e+30  ;;  %vm3424_vm7 = vcmp.gt.f32.partialorder %v477_v38, 0.0  ;;  %vm3425_vm8 = vcmp.gt.f32.partialorder %v478_v1, 0.0  ;;  %p337_p9 = scmp.lt.s32.totalorder %s4534_s24, 7 }
 0x6b2   : > { %vm3230_vm5 = vcmp.ge.f32.partialorder %v3159_v18, 0.0  ;;  %v3294_v2 = vmul.f32 0.2, %v3159_v18  ;;  %3575 = vmax.xlane.f32.xlu0 %v3574_v4  ;;  %v3357_v40 = vsel %vm3229_vm0, %v3155_v7, %v3293_v24 }
 0x6b3   : > { %v3161_v34 = vpop.f32.mrf.mxu0  ;;  %v7461_v5 = vsel %vm3421_vm15, %v3357_v40, -1e+30  ;;  %s8078_s24 = smov (!%p337_p9, %s4534_s24), 7 }
 0x6b4   : > { %8046 = vst [vmem:[#allocation6_spill] sm:$0xff] %v7461_v5  ;;  %vm3231_vm6 = vcmp.ge.f32.partialorder %v3161_v34, 0.0  ;;  %v3295_v59 = vmul.f32 0.2, %v3161_v34  ;;  %v3577_v0 = vmax.f32 %v7459_v30, %v7461_v5  ;;  %v3358_v17 = vsel %vm3230_vm5, %v3159_v18, %v3294_v2  ;;  %s4713_s12 = sshll.u32 %s8078_s24, 4  ;;  %s4538_s15 = sshll.u32 %s8078_s24, 3 }
 0x6b5   : > { %v3165_v52 = vpop.f32.mrf.mxu0  ;;  %v7467_v4 = vsel %vm3422_vm1, %v3358_v17, -1e+30  ;;  %s7630_s28 = scalar_lea.vmem %s7910_s2, %s4713_s12  ;;  %s347_s22 = scalar_lea.vmem %s7915_s7, %s4538_s15 }
 0x6b6   : > { %vm3232_vm3 = vcmp.ge.f32.partialorder %v3165_v52, 0.0  ;;  %v3296_v39 = vmul.f32 0.2, %v3165_v52  ;;  %3578 = vmax.xlane.f32.xlu1 %v3577_v0  ;;  %v3359_v7 = vsel %vm3231_vm6, %v3161_v34, %v3295_v59 }
 0x6b7   : > { %v3167_v24 = vpop.f32.mrf.mxu0  ;;  %v7469_v32 = vsel %vm3423_vm2, %v3359_v7, -1e+30 }
 0x6b8   : > { %vm3233_vm9 = vcmp.ge.f32.partialorder %v3167_v24, 0.0  ;;  %v3297_v13 = vmul.f32 0.2, %v3167_v24  ;;  %v3580_v63 = vmax.f32 %v7467_v4, %v7469_v32  ;;  %v3360_v18 = vsel %vm3232_vm3, %v3165_v52, %v3296_v39 }
 0x6b9   : > { %v7473_v40 = vsel %vm3424_vm7, %v3360_v18, -1e+30 }
 0x6ba   : > { %3581 = vmax.xlane.f32.xlu0 %v3580_v63  ;;  %v3361_v2 = vsel %vm3233_vm9, %v3167_v24, %v3297_v13 }
 0x6bb   : > { %v7475_v5 = vsel %vm3425_vm8, %v3361_v2, -1e+30 }
 0x6bc   : > { %v3583_v34 = vmax.f32 %v7473_v40, %v7475_v5 }
 0x6be   : > { %3584 = vmax.xlane.f32.xlu1 %v3583_v34 }
 0x6cb   : > { %v3492_v59 = vpop.xlane.xlu0 %3491 }
 0x6cc   : > { %v3586_v0 = vsub.f32 %v7227_v16, %v3492_v59  ;;  %v3587_v1 = vsub.f32 %v7229_v23, %v3492_v59 }
 0x6ce   : > { %v3650_v17 = vmul.f32 1.442695, %v3586_v0  ;;  %v3652_v38 = vmul.f32 1.442695, %v3587_v1 }
 0x6cf   : > { %v3495_v7 = vpop.xlane.xlu1 %3494 }
 0x6d0   : > { %5458 = vpow2.f32 %v3650_v17  ;;  %v3588_v39 = vsub.f32 %v7235_v3, %v3495_v7  ;;  %v3589_v52 = vsub.f32 %v7237_v21, %v3495_v7 }
 0x6d1   : > { %5460 = vpow2.f32 %v3652_v38 }
 0x6d2   : > { %v3654_v24 = vmul.f32 1.442695, %v3588_v39  ;;  %v3656_v13 = vmul.f32 1.442695, %v3589_v52 }
 0x6d3   : > { %v3498_v63 = vpop.xlane.xlu0 %3497 }
 0x6d4   : > { %5462 = vpow2.f32 %v3654_v24  ;;  %v3590_v18 = vsub.f32 %v7243_v61, %v3498_v63  ;;  %v3591_v2 = vsub.f32 %v7245_v62, %v3498_v63 }
 0x6d5   : > { %5464 = vpow2.f32 %v3656_v13 }
 0x6d6   : > { %v3658_v16 = vmul.f32 1.442695, %v3590_v18  ;;  %v3660_v23 = vmul.f32 1.442695, %v3591_v2 }
 0x6d7   : > { %v3501_v34 = vpop.xlane.xlu1 %3500 }
 0x6d8   : > { %5466 = vpow2.f32 %v3658_v16  ;;  %v3592_v59 = vsub.f32 %v7251_v15, %v3501_v34  ;;  %v3593_v3 = vsub.f32 %v7253_v29, %v3501_v34 }
 0x6d9   : > { %5468 = vpow2.f32 %v3660_v23 }
 0x6da   : > { %v3662_v21 = vmul.f32 1.442695, %v3592_v59  ;;  %v3664_v0 = vmul.f32 1.442695, %v3593_v3 }
 0x6db   : > { %v3504_v1 = vpop.xlane.xlu0 %3503 }
 0x6dc   : > { %5470 = vpow2.f32 %v3662_v21  ;;  %v3594_v17 = vsub.f32 %v7259_v42, %v3504_v1  ;;  %v3595_v61 = vsub.f32 %v7261_v19, %v3504_v1 }
 0x6dd   : > { %v5459_v38 = vpop.eup %5458  ;;  %5472 = vpow2.f32 %v3664_v0 }
 0x6de   : > { %v5461_v62 = vpop.eup %5460  ;;  %v3666_v7 = vmul.f32 1.442695, %v3594_v17  ;;  %v3668_v39 = vmul.f32 1.442695, %v3595_v61 }
 0x6df   : > { %v3507_v52 = vpop.xlane.xlu1 %3506  ;;  %v7489_v24 = vadd.f32 %v5461_v62, %v5459_v38 }
 0x6e0   : > { %5474 = vpow2.f32 %v3666_v7  ;;  %v3596_v15 = vsub.f32 %v7267_v27, %v3507_v52  ;;  %v3597_v29 = vsub.f32 %v7269_v37, %v3507_v52 }
 0x6e1   : > { %v5463_v13 = vpop.eup %5462  ;;  %5476 = vpow2.f32 %v3668_v39 }
 0x6e2   : > { %v5465_v63 = vpop.eup %5464  ;;  %v3874_v18 = vpack.c.bf16 %v5463_v13, %v5459_v38  ;;  %v3670_v42 = vmul.f32 1.442695, %v3596_v15  ;;  %v3672_v2 = vmul.f32 1.442695, %v3597_v29 }
 0x6e3   : > { %v3510_v19 = vpop.xlane.xlu0 %3509  ;;  %v3875_v16 = vpack.c.bf16 %v5465_v63, %v5461_v62  ;;  %v7493_v23 = vadd.f32 %v5465_v63, %v5463_v13 }
 0x6e4   : > { %5478 = vpow2.f32 %v3670_v42  ;;  %v3598_v34 = vsub.f32 %v7275_v43, %v3510_v19  ;;  %v3599_v59 = vsub.f32 %v7277_v11, %v3510_v19 }
 0x6e5   : > { %v5467_v3 = vpop.eup %5466  ;;  %5480 = vpow2.f32 %v3672_v2  ;;  %3954 = vmatprep.mubr.bf16.mxu1 %v3875_v16 }
 0x6e6   : > { %v5469_v27 = vpop.eup %5468  ;;  %v3674_v37 = vmul.f32 1.442695, %v3598_v34  ;;  %v3676_v21 = vmul.f32 1.442695, %v3599_v59  ;;  %3955 = vmatmul.mubr.bf16.vlgmr.msra.gmra.mxu1 %v3874_v18 }
 0x6e7   : > { %v3513_v0 = vpop.xlane.xlu1 %3512  ;;  %v7497_v1 = vadd.f32 %v5469_v27, %v5467_v3 }
 0x6e8   : > { %5482 = vpow2.f32 %v3674_v37  ;;  %v3600_v17 = vsub.f32 %v7283_v54, %v3513_v0  ;;  %v3601_v61 = vsub.f32 %v7285_v55, %v3513_v0 }
 0x6e9   : > { %v5471_v38 = vpop.eup %5470  ;;  %5484 = vpow2.f32 %v3676_v21 }
 0x6ea   : > { %v5473_v43 = vpop.eup %5472  ;;  %v3678_v62 = vmul.f32 1.442695, %v3600_v17  ;;  %v3680_v11 = vmul.f32 1.442695, %v3601_v61  ;;  %v3876_v7 = vpack.c.bf16 %v5471_v38, %v5467_v3 }
 0x6eb   : > { %v3516_v39 = vpop.xlane.xlu0 %3515  ;;  %v3877_v52 = vpack.c.bf16 %v5473_v43, %v5469_v27  ;;  %v7501_v15 = vadd.f32 %v5473_v43, %v5471_v38 }
 0x6ec   : > { %5486 = vpow2.f32 %v3678_v62  ;;  %v3602_v29 = vsub.f32 %v7291_v36, %v3516_v39  ;;  %v3603_v13 = vsub.f32 %v7293_v48, %v3516_v39 }
 0x6ed   : > { %v5475_v63 = vpop.eup %5474  ;;  %5488 = vpow2.f32 %v3680_v11  ;;  %3962 = vmatprep.mubr.bf16.mxu1 %v3877_v52 }
 0x6ee   : > { %v5477_v54 = vpop.eup %5476  ;;  %v3682_v55 = vmul.f32 1.442695, %v3602_v29  ;;  %v3684_v18 = vmul.f32 1.442695, %v3603_v13  ;;  %3963 = vmatmul.mubr.bf16.gmra.mxu1 %v3876_v7 }
 0x6ef   : > { %v3519_v42 = vpop.xlane.xlu1 %3518  ;;  %v7505_v2 = vadd.f32 %v5477_v54, %v5475_v63 }
 0x6f0   : > { %5490 = vpow2.f32 %v3682_v55  ;;  %v3604_v19 = vsub.f32 %v7299_v35, %v3519_v42  ;;  %v3605_v16 = vsub.f32 %v7301_v6, %v3519_v42 }
 0x6f1   : > { %v5479_v34 = vpop.eup %5478  ;;  %5492 = vpow2.f32 %v3684_v18 }
 0x6f2   : > { %v5481_v36 = vpop.eup %5480  ;;  %v3686_v59 = vmul.f32 1.442695, %v3604_v19  ;;  %v3688_v48 = vmul.f32 1.442695, %v3605_v16  ;;  %v3878_v3 = vpack.c.bf16 %v5479_v34, %v5475_v63 }
 0x6f3   : > { %v3522_v27 = vpop.xlane.xlu0 %3521  ;;  %v3879_v37 = vpack.c.bf16 %v5481_v36, %v5477_v54  ;;  %v7509_v21 = vadd.f32 %v5481_v36, %v5479_v34 }
 0x6f4   : > { %5494 = vpow2.f32 %v3686_v59  ;;  %v3606_v0 = vsub.f32 %v7307_v41, %v3522_v27  ;;  %v3607_v17 = vsub.f32 %v7309_v60, %v3522_v27 }
 0x6f5   : > { %v5483_v61 = vpop.eup %5482  ;;  %5496 = vpow2.f32 %v3688_v48  ;;  %3970 = vmatprep.mubr.bf16.mxu1 %v3879_v37 }
 0x6f6   : > { %v5485_v35 = vpop.eup %5484  ;;  %v3690_v6 = vmul.f32 1.442695, %v3606_v0  ;;  %v3692_v38 = vmul.f32 1.442695, %v3607_v17  ;;  %3971 = vmatmul.mubr.bf16.gmra.mxu1 %v3878_v3 }
 0x6f7   : > { %v3525_v43 = vpop.xlane.xlu1 %3524  ;;  %v7513_v62 = vadd.f32 %v5485_v35, %v5483_v61 }
 0x6f8   : > { %5498 = vpow2.f32 %v3690_v6  ;;  %v3608_v11 = vsub.f32 %v7315_v47, %v3525_v43  ;;  %v3609_v7 = vsub.f32 %v7317_v53, %v3525_v43 }
 0x6f9   : > { %v5487_v39 = vpop.eup %5486  ;;  %5500 = vpow2.f32 %v3692_v38 }
 0x6fa   : > { %v5489_v41 = vpop.eup %5488  ;;  %v3694_v52 = vmul.f32 1.442695, %v3608_v11  ;;  %v3696_v60 = vmul.f32 1.442695, %v3609_v7  ;;  %v3880_v29 = vpack.c.bf16 %v5487_v39, %v5483_v61 }
 0x6fb   : > { %v3528_v13 = vpop.xlane.xlu0 %3527  ;;  %v3881_v63 = vpack.c.bf16 %v5489_v41, %v5485_v35  ;;  %v7517_v54 = vadd.f32 %v5489_v41, %v5487_v39 }
 0x6fc   : > { %5502 = vpow2.f32 %v3694_v52  ;;  %v3610_v55 = vsub.f32 %v7323_v31, %v3528_v13  ;;  %v3611_v18 = vsub.f32 %v7325_v49, %v3528_v13 }
 0x6fd   : > { %v5491_v42 = vpop.eup %5490  ;;  %5504 = vpow2.f32 %v3696_v60  ;;  %3978 = vmatprep.mubr.bf16.mxu1 %v3881_v63 }
 0x6fe   : > { %v5493_v47 = vpop.eup %5492  ;;  %v3698_v53 = vmul.f32 1.442695, %v3610_v55  ;;  %v3700_v19 = vmul.f32 1.442695, %v3611_v18  ;;  %3979 = vmatmul.mubr.bf16.gmra.mxu1 %v3880_v29 }
 0x6ff   : > { %v3531_v16 = vpop.xlane.xlu1 %3530  ;;  %v3802_v34 = vadd.f32 %v5493_v47, %v5491_v42 }
 0x700   : > { %5506 = vpow2.f32 %v3698_v53  ;;  %v3612_v36 = vsub.f32 %v7331_v20, %v3531_v16  ;;  %v3613_v59 = vsub.f32 %v7333_v58, %v3531_v16 }
 0x701   : > { %v5495_v48 = vpop.eup %5494  ;;  %5508 = vpow2.f32 %v3700_v19  ;;  %3803 = vadd.xlane.f32.xlu0 %v3802_v34 }
 0x702   : > { %v5497_v31 = vpop.eup %5496  ;;  %v3702_v3 = vmul.f32 1.442695, %v3612_v36  ;;  %v3704_v49 = vmul.f32 1.442695, %v3613_v59  ;;  %v3882_v27 = vpack.c.bf16 %v5495_v48, %v5491_v42 }
 0x703   : > { %v3534_v37 = vpop.xlane.xlu0 %3533  ;;  %v3883_v0 = vpack.c.bf16 %v5497_v31, %v5493_v47  ;;  %v3805_v17 = vadd.f32 %v5497_v31, %v5495_v48 }
 0x704   : > { %5510 = vpow2.f32 %v3702_v3  ;;  %v3614_v61 = vsub.f32 %v7339_v44, %v3534_v37  ;;  %v3615_v35 = vsub.f32 %v7341_v25, %v3534_v37 }
 0x705   : > { %v5499_v6 = vpop.eup %5498  ;;  %5512 = vpow2.f32 %v3704_v49  ;;  %3986 = vmatprep.mubr.bf16.mxu1 %v3883_v0  ;;  %3806 = vadd.xlane.f32.xlu1 %v3805_v17 }
 0x706   : > { %v5501_v20 = vpop.eup %5500  ;;  %v3706_v58 = vmul.f32 1.442695, %v3614_v61  ;;  %v3708_v38 = vmul.f32 1.442695, %v3615_v35  ;;  %3987 = vmatmul.mubr.bf16.gmra.mxu1 %v3882_v27 }
 0x707   : > { %v3537_v43 = vpop.xlane.xlu1 %3536  ;;  %v3808_v11 = vadd.f32 %v5501_v20, %v5499_v6 }
 0x708   : > { %5514 = vpow2.f32 %v3706_v58  ;;  %v3616_v7 = vsub.f32 %v7347_v51, %v3537_v43  ;;  %v3617_v39 = vsub.f32 %v7349_v57, %v3537_v43 }
 0x709   : > { %v5503_v41 = vpop.eup %5502  ;;  %5516 = vpow2.f32 %v3708_v38  ;;  %3809 = vadd.xlane.f32.xlu0 %v3808_v11 }
 0x70a   : > { %v5505_v44 = vpop.eup %5504  ;;  %v3710_v25 = vmul.f32 1.442695, %v3616_v7  ;;  %v3712_v52 = vmul.f32 1.442695, %v3617_v39  ;;  %v3884_v60 = vpack.c.bf16 %v5503_v41, %v5499_v6 }
 0x70b   : > { %v3540_v29 = vpop.xlane.xlu0 %3539  ;;  %v3885_v13 = vpack.c.bf16 %v5505_v44, %v5501_v20  ;;  %v3811_v63 = vadd.f32 %v5505_v44, %v5503_v41 }
 0x70c   : > { %5518 = vpow2.f32 %v3710_v25  ;;  %v3618_v55 = vsub.f32 %v7355_v46, %v3540_v29  ;;  %v3619_v18 = vsub.f32 %v7357_v50, %v3540_v29 }
 0x70d   : > { %v5507_v42 = vpop.eup %5506  ;;  %5520 = vpow2.f32 %v3712_v52  ;;  %3994 = vmatprep.mubr.bf16.mxu1 %v3885_v13  ;;  %3812 = vadd.xlane.f32.xlu1 %v3811_v63 }
 0x70e   : > { %v5509_v51 = vpop.eup %5508  ;;  %v3714_v57 = vmul.f32 1.442695, %v3618_v55  ;;  %v3716_v47 = vmul.f32 1.442695, %v3619_v18  ;;  %3995 = vmatmul.mubr.bf16.gmra.mxu1 %v3884_v60 }
 0x70f   : > { %v3543_v53 = vpop.xlane.xlu1 %3542  ;;  %v3814_v19 = vadd.f32 %v5509_v51, %v5507_v42 }
 0x710   : > { %5522 = vpow2.f32 %v3714_v57  ;;  %v3620_v16 = vsub.f32 %v7363_v45, %v3543_v53  ;;  %v3621_v34 = vsub.f32 %v7365_v10, %v3543_v53 }
 0x711   : > { %v5511_v36 = vpop.eup %5510  ;;  %5524 = vpow2.f32 %v3716_v47  ;;  %3815 = vadd.xlane.f32.xlu0 %v3814_v19  ;;  %v8047_v19 = vld [vmem:[#allocation12_spill] sm:$0xff] }
 0x712   : > { %v5513_v46 = vpop.eup %5512  ;;  %v3718_v50 = vmul.f32 1.442695, %v3620_v16  ;;  %v3720_v59 = vmul.f32 1.442695, %v3621_v34  ;;  %v3886_v48 = vpack.c.bf16 %v5511_v36, %v5507_v42 }
 0x713   : > { %v3546_v31 = vpop.xlane.xlu0 %3545  ;;  %v3887_v3 = vpack.c.bf16 %v5513_v46, %v5509_v51  ;;  %v3817_v49 = vadd.f32 %v5513_v46, %v5511_v36 }
 0x714   : > { %5526 = vpow2.f32 %v3718_v50  ;;  %v3622_v27 = vsub.f32 %v7371_v26, %v3546_v31  ;;  %v3623_v37 = vsub.f32 %v7373_v12, %v3546_v31  ;;  %v8049_v31 = vld [vmem:[#allocation14_spill] sm:$0xff] }
 0x715   : > { %v5515_v0 = vpop.eup %5514  ;;  %5528 = vpow2.f32 %v3720_v59  ;;  %4002 = vmatprep.mubr.bf16.mxu1 %v3887_v3  ;;  %3818 = vadd.xlane.f32.xlu1 %v3817_v49  ;;  %v8048_v59 = vld [vmem:[#allocation13_spill] sm:$0xff] }
 0x716   : > { %v5517_v45 = vpop.eup %5516  ;;  %v3722_v10 = vmul.f32 1.442695, %v3622_v27  ;;  %v3724_v17 = vmul.f32 1.442695, %v3623_v37  ;;  %4003 = vmatmul.mubr.bf16.gmra.mxu1 %v3886_v48 }
 0x717   : > { %v3549_v61 = vpop.xlane.xlu1 %3548  ;;  %v3820_v35 = vadd.f32 %v5517_v45, %v5515_v0 }
 0x718   : > { %5530 = vpow2.f32 %v3722_v10  ;;  %v3624_v6 = vsub.f32 %v7379_v28, %v3549_v61  ;;  %v3625_v20 = vsub.f32 %v7381_v22, %v3549_v61  ;;  %v8050_v61 = vld [vmem:[#allocation15_spill] sm:$0xff] }
 0x719   : > { %v5519_v58 = vpop.eup %5518  ;;  %5532 = vpow2.f32 %v3724_v17  ;;  %3821 = vadd.xlane.f32.xlu0 %v3820_v35 }
 0x71a   : > { %v5521_v26 = vpop.eup %5520  ;;  %v3726_v12 = vmul.f32 1.442695, %v3624_v6  ;;  %v3728_v38 = vmul.f32 1.442695, %v3625_v20  ;;  %v3888_v43 = vpack.c.bf16 %v5519_v58, %v5515_v0  ;;  %v8051_v6 = vld [vmem:[#allocation16_spill] sm:$0xff] }
 0x71b   : > { %v3552_v11 = vpop.xlane.xlu0 %3551  ;;  %v3889_v7 = vpack.c.bf16 %v5521_v26, %v5517_v45  ;;  %v3823_v39 = vadd.f32 %v5521_v26, %v5519_v58 }
 0x71c   : > { %5534 = vpow2.f32 %v3726_v12  ;;  %v3626_v41 = vsub.f32 %v7387_v8, %v3552_v11  ;;  %v3627_v44 = vsub.f32 %v7389_v56, %v3552_v11  ;;  %v8052_v11 = vld [vmem:[#allocation17_spill] sm:$0xff] }
 0x71d   : > { %v5523_v25 = vpop.eup %5522  ;;  %5536 = vpow2.f32 %v3728_v38  ;;  %4010 = vmatprep.mubr.bf16.mxu1 %v3889_v7  ;;  %3824 = vadd.xlane.f32.xlu1 %v3823_v39  ;;  %v8053_v39 = vld [vmem:[#allocation18_spill] sm:$0xff] }
 0x71e   : > { %v5525_v28 = vpop.eup %5524  ;;  %v3730_v22 = vmul.f32 1.442695, %v3626_v41  ;;  %4011 = vmatmul.mubr.bf16.gmra.mxu1 %v3888_v43  ;;  %v3732_v52 = vmul.f32 1.442695, %v3627_v44 }
 0x71f   : > { %v3555_v60 = vpop.xlane.xlu1 %3554  ;;  %v7537_v29 = vadd.f32 %v5525_v28, %v5523_v25 }
 0x720   : > { %v3628_v13 = vsub.f32 %v7395_v9, %v3555_v60  ;;  %v3629_v63 = vsub.f32 %v7397_v14, %v3555_v60  ;;  %5538 = vpow2.f32 %v3730_v22 }
 0x721   : > { %v5527_v55 = vpop.eup %5526  ;;  %5540 = vpow2.f32 %v3732_v52 }
 0x722   : > { %v5529_v18 = vpop.eup %5528  ;;  %v3734_v8 = vmul.f32 1.442695, %v3628_v13  ;;  %v3736_v56 = vmul.f32 1.442695, %v3629_v63  ;;  %v3890_v42 = vpack.c.bf16 %v5527_v55, %v5523_v25 }
 0x723   : > { %v3558_v51 = vpop.xlane.xlu0 %3557  ;;  %v3891_v57 = vpack.c.bf16 %v5529_v18, %v5525_v28  ;;  %v7541_v47 = vadd.f32 %v5529_v18, %v5527_v55  ;;  %v8054_v55 = vld [vmem:[#allocation19_spill] sm:$0xff] }
 0x724   : > { %5542 = vpow2.f32 %v3734_v8  ;;  %v3630_v53 = vsub.f32 %v7403_v33, %v3558_v51  ;;  %v3631_v16 = vsub.f32 %v8047_v19, %v3558_v51  ;;  %v8055_v8 = vld [vmem:[#allocation5_spill] sm:$0xff] }
 0x725   : > { %v5531_v34 = vpop.eup %5530  ;;  %5544 = vpow2.f32 %v3736_v56  ;;  %4018 = vmatprep.mubr.bf16.mxu1 %v3891_v57 }
 0x726   : > { %v5533_v9 = vpop.eup %5532  ;;  %v3738_v14 = vmul.f32 1.442695, %v3630_v53  ;;  %4019 = vmatmul.mubr.bf16.gmra.mxu1 %v3890_v42  ;;  %v3740_v36 = vmul.f32 1.442695, %v3631_v16  ;;  %v8056_v16 = vld [vmem:[#allocation11_spill] sm:$0xff] }
 0x727   : > { %v3561_v46 = vpop.xlane.xlu1 %3560  ;;  %v7545_v50 = vadd.f32 %v5533_v9, %v5531_v34 }
 0x728   : > { %v3632_v48 = vsub.f32 %v8048_v59, %v3561_v46  ;;  %v3633_v3 = vsub.f32 %v8049_v31, %v3561_v46  ;;  %5546 = vpow2.f32 %v3738_v14 }
 0x729   : > { %v5535_v49 = vpop.eup %5534  ;;  %5548 = vpow2.f32 %v3740_v36 }
 0x72a   : > { %v5537_v27 = vpop.eup %5536  ;;  %v3742_v33 = vmul.f32 1.442695, %v3632_v48  ;;  %v3744_v37 = vmul.f32 1.442695, %v3633_v3  ;;  %v3892_v0 = vpack.c.bf16 %v5535_v49, %v5531_v34 }
 0x72b   : > { %v3564_v45 = vpop.xlane.xlu0 %3563  ;;  %v3893_v10 = vpack.c.bf16 %v5537_v27, %v5533_v9  ;;  %v7549_v17 = vadd.f32 %v5537_v27, %v5535_v49  ;;  %v8057_v9 = vld [vmem:[#allocation7_spill] sm:$0xff]  ;;  %v8058_v27 = vld [vmem:[#allocation10_spill] sm:$0xff] }
 0x72c   : > { %5550 = vpow2.f32 %v3742_v33  ;;  %v3634_v35 = vsub.f32 %v8050_v61, %v3564_v45  ;;  %v3635_v20 = vsub.f32 %v8051_v6, %v3564_v45 }
 0x72d   : > { %5552 = vpow2.f32 %v3744_v37  ;;  %4026 = vmatprep.mubr.bf16.mxu1 %v3893_v10  ;;  %v7553_v12 = vpop.eup %5538  ;;  %v8059_v37 = vld [vmem:[#allocation9_spill] sm:$0xff] }
 0x72e   : > { %v3746_v58 = vmul.f32 1.442695, %v3634_v35  ;;  %v3748_v26 = vmul.f32 1.442695, %v3635_v20  ;;  %4027 = vmatmul.mubr.bf16.gmra.mxu1 %v3892_v0  ;;  %v7555_v43 = vpop.eup %5540 }
 0x72f   : > { %v3567_v38 = vpop.xlane.xlu1 %3566 }
 0x730   : > { %5554 = vpow2.f32 %v3746_v58  ;;  %v3636_v7 = vsub.f32 %v8052_v11, %v3567_v38  ;;  %v3637_v41 = vsub.f32 %v8053_v39, %v3567_v38 }
 0x731   : > { %v5543_v44 = vpop.eup %5542  ;;  %5556 = vpow2.f32 %v3748_v26  ;;  %v8060_v26 = vld [vmem:[#allocation6_spill] sm:$0xff] }
 0x732   : > { %v5545_v25 = vpop.eup %5544  ;;  %v3750_v28 = vmul.f32 1.442695, %v3636_v7  ;;  %v3752_v22 = vmul.f32 1.442695, %v3637_v41  ;;  %v3894_v52 = vpack.c.bf16 %v5543_v44, %v7553_v12 }
 0x733   : > { %v3570_v60 = vpop.xlane.xlu0 %3569  ;;  %v3895_v13 = vpack.c.bf16 %v5545_v25, %v7555_v43  ;;  %v7561_v63 = vadd.f32 %v5545_v25, %v5543_v44 }
 0x734   : > { %5558 = vpow2.f32 %v3750_v28  ;;  %v3638_v18 = vsub.f32 %v8054_v55, %v3570_v60  ;;  %v3639_v56 = vsub.f32 %v8055_v8, %v3570_v60 }
 0x735   : > { %5560 = vpow2.f32 %v3752_v22  ;;  %4034 = vmatprep.mubr.bf16.mxu1 %v3895_v13  ;;  %v7565_v57 = vpop.eup %5546 }
 0x736   : > { %v3754_v42 = vmul.f32 1.442695, %v3638_v18  ;;  %v3756_v51 = vmul.f32 1.442695, %v3639_v56  ;;  %4035 = vmatmul.mubr.bf16.gmra.mxu1 %v3894_v52  ;;  %v7567_v19 = vpop.eup %5548 }
 0x737   : > { %v3573_v53 = vpop.xlane.xlu1 %3572 }
 0x738   : > { %5562 = vpow2.f32 %v3754_v42  ;;  %v3640_v34 = vsub.f32 %v8056_v16, %v3573_v53  ;;  %v3641_v14 = vsub.f32 %v8057_v9, %v3573_v53 }
 0x739   : > { %v7571_v36 = vpop.eup %5550  ;;  %5564 = vpow2.f32 %v3756_v51 }
 0x73a   : > { %v7573_v46 = vpop.eup %5552  ;;  %v3758_v59 = vmul.f32 1.442695, %v3640_v34  ;;  %v3760_v48 = vmul.f32 1.442695, %v3641_v14  ;;  %v3896_v31 = vpack.c.bf16 %v7571_v36, %v7565_v57 }
 0x73b   : > { %v3576_v3 = vpop.xlane.xlu0 %3575  ;;  %v3897_v49 = vpack.c.bf16 %v7573_v46, %v7567_v19 }
 0x73c   : > { %5566 = vpow2.f32 %v3758_v59  ;;  %v3642_v33 = vsub.f32 %v8058_v27, %v3576_v3  ;;  %v3643_v0 = vsub.f32 %v8059_v37, %v3576_v3 }
 0x73d   : > { %v5555_v45 = vpop.eup %5554  ;;  %5568 = vpow2.f32 %v3760_v48  ;;  %4042 = vmatprep.mubr.bf16.mxu1 %v3897_v49 }
 0x73e   : > { %v5557_v10 = vpop.eup %5556  ;;  %v3762_v61 = vmul.f32 1.442695, %v3642_v33  ;;  %v3764_v35 = vmul.f32 1.442695, %v3643_v0  ;;  %4043 = vmatmul.mubr.bf16.gmra.mxu1 %v3896_v31 }
 0x73f   : > { %v3579_v6 = vpop.xlane.xlu1 %3578  ;;  %v3850_v20 = vadd.f32 %v5557_v10, %v5555_v45 }
 0x740   : > { %5570 = vpow2.f32 %v3762_v61  ;;  %v3644_v58 = vsub.f32 %v7459_v30, %v3579_v6  ;;  %v3645_v38 = vsub.f32 %v8060_v26, %v3579_v6  ;;  %v3838_v26 = vadd.f32 %v7555_v43, %v7553_v12 }
 0x741   : > { %v5559_v11 = vpop.eup %5558  ;;  %5572 = vpow2.f32 %v3764_v35  ;;  %3851 = vadd.xlane.f32.xlu0 %v3850_v20  ;;  %v3844_v35 = vadd.f32 %v7567_v19, %v7565_v57 }
 0x742   : > { %v5561_v7 = vpop.eup %5560  ;;  %v3766_v39 = vmul.f32 1.442695, %v3644_v58  ;;  %v3768_v41 = vmul.f32 1.442695, %v3645_v38  ;;  %v3898_v44 = vpack.c.bf16 %v5559_v11, %v5555_v45  ;;  %v3847_v58 = vadd.f32 %v7573_v46, %v7571_v36 }
 0x743   : > { %v3582_v25 = vpop.xlane.xlu0 %3581  ;;  %v3899_v28 = vpack.c.bf16 %v5561_v7, %v5557_v10  ;;  %v3853_v22 = vadd.f32 %v5561_v7, %v5559_v11 }
 0x744   : > { %5574 = vpow2.f32 %v3766_v39  ;;  %v3646_v52 = vsub.f32 %v7467_v4, %v3582_v25  ;;  %v3647_v60 = vsub.f32 %v7469_v32, %v3582_v25 }
 0x745   : > { %v5563_v13 = vpop.eup %5562  ;;  %5576 = vpow2.f32 %v3768_v41  ;;  %4050 = vmatprep.mubr.bf16.mxu1 %v3899_v28  ;;  %3854 = vadd.xlane.f32.xlu1 %v3853_v22 }
 0x746   : > { %v5565_v30 = vpop.eup %5564  ;;  %v3770_v55 = vmul.f32 1.442695, %v3646_v52  ;;  %v3772_v18 = vmul.f32 1.442695, %v3647_v60  ;;  %4051 = vmatmul.mubr.bf16.gmra.mxu1 %v3898_v44 }
 0x747   : > { %v3585_v8 = vpop.xlane.xlu1 %3584  ;;  %v3856_v56 = vadd.f32 %v5565_v30, %v5563_v13 }
 0x748   : > { %5578 = vpow2.f32 %v3770_v55  ;;  %v3648_v42 = vsub.f32 %v7473_v40, %v3585_v8  ;;  %v3649_v51 = vsub.f32 %v7475_v5, %v3585_v8  ;;  %v4184_v8 = vld [vmem:[%s7630_s28 + $0x8] sm:$0xff] }
 0x749   : > { %v5567_v53 = vpop.eup %5566  ;;  %5580 = vpow2.f32 %v3772_v18  ;;  %3857 = vadd.xlane.f32.xlu0 %v3856_v56  ;;  %v4186_v56 = vld [vmem:[%s7630_s28 + $0x18] sm:$0xff] }
 0x74a   : > { %v5569_v4 = vpop.eup %5568  ;;  %v3774_v32 = vmul.f32 1.442695, %v3648_v42  ;;  %v3776_v16 = vmul.f32 1.442695, %v3649_v51  ;;  %v3900_v34 = vpack.c.bf16 %v5567_v53, %v5563_v13  ;;  %v4192_v42 = vpack.c.bf16 %v4186_v56, %v4184_v8 }
 0x74b   : > { %v3901_v9 = vpack.c.bf16 %v5569_v4, %v5565_v30  ;;  %v3859_v14 = vadd.f32 %v5569_v4, %v5567_v53  ;;  %v8061_v30 = vld [vmem:[#allocation8_spill] sm:$0xff] }
 0x74c   : > { %5582 = vpow2.f32 %v3774_v32  ;;  %v4149_v55 = vsub.s32 1, %v8061_v30  ;;  %4243 = vmatprep.mubr.bf16.mxu0 %v4192_v42 }
 0x74d   : > { %v5571_v59 = vpop.eup %5570  ;;  %5584 = vpow2.f32 %v3776_v16  ;;  %4058 = vmatprep.mubr.bf16.mxu1 %v3901_v9  ;;  %3860 = vadd.xlane.f32.xlu1 %v3859_v14  ;;  %v7637_v16 = vld [vmem:[%s7914_s6] sm:$0xff] }
 0x74e   : > { %v5573_v48 = vpop.eup %5572  ;;  %4059 = vmatmul.mubr.bf16.gmra.mxu1 %v3900_v34  ;;  %v7640_v34 = vrot.slane %v7637_v16, %v4149_v55 }
 0x74f   : > { %v3862_v31 = vadd.f32 %v5573_v48, %v5571_v59 }
 0x751   : > { %v5575_v40 = vpop.eup %5574  ;;  %3863 = vadd.xlane.f32.xlu0 %v3862_v31 }
 0x752   : > { %v5577_v5 = vpop.eup %5576  ;;  %v3902_v3 = vpack.c.bf16 %v5575_v40, %v5571_v59 }
 0x753   : > { %v3903_v49 = vpack.c.bf16 %v5577_v5, %v5573_v48  ;;  %v3865_v27 = vadd.f32 %v5577_v5, %v5575_v40 }
 0x755   : > { %v5579_v33 = vpop.eup %5578  ;;  %4066 = vmatprep.mubr.bf16.mxu1 %v3903_v49  ;;  %3866 = vadd.xlane.f32.xlu1 %v3865_v27 }
 0x756   : > { %v5581_v37 = vpop.eup %5580  ;;  %4067 = vmatmul.mubr.bf16.gmra.mxu1 %v3902_v3 }
 0x757   : > { %v3868_v0 = vadd.f32 %v5581_v37, %v5579_v33 }
 0x759   : > { %v5583_v45 = vpop.eup %5582  ;;  %3869 = vadd.xlane.f32.xlu0 %v3868_v0 }
 0x75a   : > { %v5585_v10 = vpop.eup %5584  ;;  %v3904_v61 = vpack.c.bf16 %v5583_v45, %v5579_v33 }
 0x75b   : > { %v3905_v6 = vpack.c.bf16 %v5585_v10, %v5581_v37  ;;  %v3871_v20 = vadd.f32 %v5585_v10, %v5583_v45 }
 0x75d   : > { %3845 = vadd.xlane.f32.xlu0 %v3844_v35  ;;  %4074 = vmatprep.mubr.bf16.mxu1 %v3905_v6 }
 0x75e   : > { %3872 = vadd.xlane.f32.xlu1 %v3871_v20  ;;  %4075 = vmatmul.mubr.bf16.gmra.mxu1 %v3904_v61 }
 0x761   : > { %3797 = vadd.xlane.f32.xlu0 %v7513_v62 }
 0x762   : > { %3848 = vadd.xlane.f32.xlu1 %v3847_v58 }
 0x765   : > { %3839 = vadd.xlane.f32.xlu0 %v3838_v26 }
 0x766   : > { %3800 = vadd.xlane.f32.xlu1 %v7517_v54 }
 0x769   : > { %3791 = vadd.xlane.f32.xlu0 %v7505_v2 }
 0x76a   : > { %3842 = vadd.xlane.f32.xlu1 %v7561_v63 }
 0x76d   : > { %3833 = vadd.xlane.f32.xlu0 %v7545_v50 }
 0x76e   : > { %3794 = vadd.xlane.f32.xlu1 %v7509_v21 }
 0x771   : > { %3785 = vadd.xlane.f32.xlu0 %v7497_v1 }
 0x772   : > { %3836 = vadd.xlane.f32.xlu1 %v7549_v17 }
 0x775   : > { %3827 = vadd.xlane.f32.xlu0 %v7537_v29 }
 0x776   : > { %3788 = vadd.xlane.f32.xlu1 %v7501_v15 }
 0x779   : > { %3779 = vadd.xlane.f32.xlu0 %v7489_v24 }
 0x77a   : > { %3830 = vadd.xlane.f32.xlu1 %v7541_v47 }
 0x77e   : > { %3782 = vadd.xlane.f32.xlu1 %v7493_v23 }
 0x78a   : > { %v3804_v19 = vpop.xlane.xlu0 %3803 }
 0x78b   : > { %5586 = vrcp.f32 %v3804_v19 }
 0x78e   : > { %v3807_v38 = vpop.xlane.xlu1 %3806 }
 0x78f   : > { %5588 = vrcp.f32 %v3807_v38 }
 0x792   : > { %v3810_v44 = vpop.xlane.xlu0 %3809 }
 0x793   : > { %5590 = vrcp.f32 %v3810_v44 }
 0x796   : > { %v3813_v22 = vpop.xlane.xlu1 %3812 }
 0x797   : > { %5592 = vrcp.f32 %v3813_v22 }
 0x798   : > { %v5587_v51 = vpop.eup %5586 }
 0x79a   : > { %v3816_v53 = vpop.xlane.xlu0 %3815 }
 0x79b   : > { %5594 = vrcp.f32 %v3816_v53 }
 0x79c   : > { %v5589_v14 = vpop.eup %5588 }
 0x79e   : > { %v3819_v59 = vpop.xlane.xlu1 %3818 }
 0x79f   : > { %5596 = vrcp.f32 %v3819_v59 }
 0x7a0   : > { %v5591_v0 = vpop.eup %5590 }
 0x7a2   : > { %v3822_v27 = vpop.xlane.xlu0 %3821 }
 0x7a3   : > { %5598 = vrcp.f32 %v3822_v27 }
 0x7a4   : > { %v5593_v6 = vpop.eup %5592 }
 0x7a6   : > { %v5034_v2 = vpop.f32.mrf.mxu1  ;;  %v3825_v10 = vpop.xlane.xlu1 %3824 }
 0x7a7   : > { %5600 = vrcp.f32 %v3825_v10 }
 0x7a8   : > { %v5035_v62 = vpop.f32.mrf.mxu1 }
 0x7a9   : > { %v7606_v54 = vadd.f32 %v5035_v62, %v5034_v2 }
 0x7aa   : > { %v5037_v50 = vpop.f32.mrf.mxu1 }
 0x7ac   : > { %v5038_v21 = vpop.f32.mrf.mxu1 }
 0x7ad   : > { %v7608_v12 = vadd.f32 %v5038_v21, %v5037_v50 }
 0x7ae   : > { %v5040_v1 = vpop.f32.mrf.mxu1 }
 0x7b0   : > { %v5041_v17 = vpop.f32.mrf.mxu1 }
 0x7b1   : > { %v7610_v43 = vadd.f32 %v5041_v17, %v5040_v1 }
 0x7b2   : > { %v5043_v29 = vpop.f32.mrf.mxu1 }
 0x7b4   : > { %v5044_v15 = vpop.f32.mrf.mxu1 }
 0x7b5   : > { %v7612_v24 = vadd.f32 %v5044_v15, %v5043_v29 }
 0x7b6   : > { %v5046_v47 = vpop.f32.mrf.mxu1 }
 0x7b8   : > { %v5047_v63 = vpop.f32.mrf.mxu1 }
 0x7b9   : > { %v7614_v23 = vadd.f32 %v5047_v63, %v5046_v47  ;;  %v5595_v47 = vpop.eup %5594 }
 0x7ba   : > { %v5049_v57 = vpop.f32.mrf.mxu1 }
 0x7bc   : > { %v5050_v36 = vpop.f32.mrf.mxu1 }
 0x7bd   : > { %v7616_v46 = vadd.f32 %v5050_v36, %v5049_v57  ;;  %v5597_v36 = vpop.eup %5596 }
 0x7be   : > { %v5052_v11 = vpop.f32.mrf.mxu1  ;;  %v5599_v8 = vpop.eup %5598 }
 0x7bf   : > { %v5601_v53 = vpop.eup %5600 }
 0x7c0   : > { %v5053_v7 = vpop.f32.mrf.mxu1 }
 0x7c1   : > { %v7618_v39 = vadd.f32 %v5053_v7, %v5052_v11 }
 0x7c2   : > { %v5055_v41 = vpop.f32.mrf.mxu1 }
 0x7c4   : > { %v5056_v25 = vpop.f32.mrf.mxu1 }
 0x7c5   : > { %v7621_v28 = vadd.f32 %v5056_v25, %v5055_v41 }
 0x7c6   : > { %v5058_v52 = vpop.f32.mrf.mxu1 }
 0x7c8   : > { %v5059_v60 = vpop.f32.mrf.mxu1 }
 0x7c9   : > { %v5060_v13 = vadd.f32 %v5059_v60, %v5058_v52 }
 0x7ca   : > { %v5061_v18 = vpop.f32.mrf.mxu1  ;;  %v7650_v20 = vpop.xlane.xlu0 %3851 }
 0x7cb   : > { %v4123_v32 = vmul.f32 %v5587_v51, %v5060_v13 }
 0x7cc   : > { %v5062_v4 = vpop.f32.mrf.mxu1 }
 0x7cd   : > { %v5063_v9 = vadd.f32 %v5062_v4, %v5061_v18  ;;  %v7643_v5 = vadd.f32 %v7640_v34, %v4123_v32 }
 0x7ce   : > { %v5064_v48 = vpop.f32.mrf.mxu1  ;;  %v7660_v29 = vpop.xlane.xlu1 %3854 }
 0x7cf   : > { %v4124_v31 = vmul.f32 %v5589_v14, %v5063_v9 }
 0x7d0   : > { %v5065_v40 = vpop.f32.mrf.mxu1 }
 0x7d1   : > { %v7646_v3 = vadd.f32 %v7640_v34, %v4124_v31  ;;  %v5066_v49 = vadd.f32 %v5065_v40, %v5064_v48 }
 0x7d2   : > { %v5067_v33 = vpop.f32.mrf.mxu1  ;;  %v7658_v1 = vpop.xlane.xlu0 %3857 }
 0x7d3   : > { %v4125_v61 = vmul.f32 %v5591_v0, %v5066_v49 }
 0x7d4   : > { %v5068_v45 = vpop.f32.mrf.mxu1 }
 0x7d5   : > { %v5069_v35 = vadd.f32 %v5068_v45, %v5067_v33  ;;  %v7653_v62 = vadd.f32 %v7640_v34, %v4125_v61 }
 0x7d6   : > { %v5070_v58 = vpop.f32.mrf.mxu1  ;;  %v7666_v7 = vpop.xlane.xlu1 %3860 }
 0x7d7   : > { %v4126_v26 = vmul.f32 %v5593_v6, %v5069_v35 }
 0x7d8   : > { %v5071_v2 = vpop.f32.mrf.mxu1 }
 0x7d9   : > { %v7656_v50 = vadd.f32 %v7640_v34, %v4126_v26  ;;  %v5072_v21 = vadd.f32 %v5071_v2, %v5070_v58 }
 0x7da   : > { %v5073_v17 = vpop.f32.mrf.mxu1  ;;  %v7664_v38 = vpop.xlane.xlu0 %3863 }
 0x7db   : > { %v4127_v57 = vmul.f32 %v5595_v47, %v5072_v21 }
 0x7dc   : > { %v5074_v63 = vpop.f32.mrf.mxu1 }
 0x7dd   : > { %v5075_v19 = vadd.f32 %v5074_v63, %v5073_v17  ;;  %v7669_v25 = vadd.f32 %v7640_v34, %v4127_v57 }
 0x7de   : > { %v5076_v11 = vpop.f32.mrf.mxu1  ;;  %v7678_v18 = vpop.xlane.xlu1 %3866 }
 0x7df   : > { %v4128_v41 = vmul.f32 %v5597_v36, %v5075_v19 }
 0x7e0   : > { %v5077_v44 = vpop.f32.mrf.mxu1 }
 0x7e1   : > { %v7672_v22 = vadd.f32 %v7640_v34, %v4128_v41  ;;  %v5078_v52 = vadd.f32 %v5077_v44, %v5076_v11 }
 0x7e2   : > { %v5079_v60 = vpop.f32.mrf.mxu1  ;;  %v7674_v13 = vpop.xlane.xlu0 %3869 }
 0x7e3   : > { %v4129_v42 = vmul.f32 %v5599_v8, %v5078_v52 }
 0x7e4   : > { %v5080_v56 = vpop.f32.mrf.mxu1 }
 0x7e5   : > { %v5081_v51 = vadd.f32 %v5080_v56, %v5079_v60  ;;  %v7685_v48 = vadd.f32 %v7640_v34, %v4129_v42 }
 0x7e6   : > { %v5082_v4 = vpop.f32.mrf.mxu1  ;;  %v7680_v32 = vpop.xlane.xlu0 %3845 }
 0x7e7   : > { %v4130_v9 = vmul.f32 %v5601_v53, %v5081_v51  ;;  %v7682_v14 = vpop.xlane.xlu1 %3872 }
 0x7e8   : > { %v5083_v59 = vpop.f32.mrf.mxu1 }
 0x7e9   : > { %v7688_v31 = vadd.f32 %v7640_v34, %v4130_v9  ;;  %v7690_v40 = vadd.f32 %v5083_v59, %v5082_v4 }
 0x7ea   : > { %v5085_v49 = vpop.f32.mrf.mxu1  ;;  %v3798_v27 = vpop.xlane.xlu0 %3797 }
 0x7eb   : > { %v4202_v33 = vpack.c.bf16 %v7688_v31, %v7685_v48  ;;  %v7694_v0 = vpop.xlane.xlu1 %3848  ;;  %5602 = vrcp.f32 %v3798_v27 }
 0x7ec   : > { %v5086_v45 = vpop.f32.mrf.mxu1 }
 0x7ed   : > { %v7696_v10 = vadd.f32 %v5086_v45, %v5085_v49 }
 0x7ee   : > { %v5088_v61 = vpop.f32.mrf.mxu1  ;;  %v7698_v35 = vpop.xlane.xlu0 %3839 }
 0x7ef   : > { %v3801_v6 = vpop.xlane.xlu1 %3800 }
 0x7f0   : > { %5604 = vrcp.f32 %v3801_v6  ;;  %v5089_v58 = vpop.f32.mrf.mxu1 }
 0x7f1   : > { %v5090_v26 = vadd.f32 %v5089_v58, %v5088_v61 }
 0x7f2   : > { %v5091_v2 = vpop.f32.mrf.mxu1  ;;  %v3792_v21 = vpop.xlane.xlu0 %3791 }
 0x7f3   : > { %v7700_v17 = vpop.xlane.xlu1 %3842  ;;  %5606 = vrcp.f32 %v3792_v21 }
 0x7f4   : > { %v5092_v47 = vpop.f32.mrf.mxu1 }
 0x7f5   : > { %v5093_v63 = vadd.f32 %v5092_v47, %v5091_v2 }
 0x7f6   : > { %v7702_v57 = vpop.f32.mrf.mxu1  ;;  %v3834_v19 = vpop.xlane.xlu0 %3833 }
 0x7f7   : > { %5608 = vrcp.f32 %v3834_v19  ;;  %v3795_v36 = vpop.xlane.xlu1 %3794 }
 0x7f8   : > { %5610 = vrcp.f32 %v3795_v36  ;;  %v7704_v11 = vpop.f32.mrf.mxu1  ;;  %v5603_v41 = vpop.eup %5602 }
 0x7f9   : > { %v4121_v56 = vmul.f32 %v5603_v41, %v7618_v39 }
 0x7fa   : > { %v7706_v44 = vpop.f32.mrf.mxu1  ;;  %v3786_v52 = vpop.xlane.xlu0 %3785 }
 0x7fb   : > { %5612 = vrcp.f32 %v3786_v52  ;;  %v3837_v60 = vpop.xlane.xlu1 %3836  ;;  %v7717_v49 = vadd.f32 %v7640_v34, %v4121_v56 }
 0x7fc   : > { %5614 = vrcp.f32 %v3837_v60  ;;  %v7708_v8 = vpop.f32.mrf.mxu1 }
 0x7fd   : > { %v5605_v42 = vpop.eup %5604  ;;  %v5099_v48 = vadd.f32 %v7708_v8, %v7706_v44 }
 0x7fe   : > { %v7711_v51 = vpop.f32.mrf.mxu1  ;;  %v3828_v53 = vpop.xlane.xlu0 %3827  ;;  %v4122_v4 = vmul.f32 %v5605_v42, %v7621_v28 }
 0x7ff   : > { %5616 = vrcp.f32 %v3828_v53  ;;  %v3789_v9 = vpop.xlane.xlu1 %3788 }
 0x800   : > { %5618 = vrcp.f32 %v3789_v9  ;;  %v7714_v59 = vpop.f32.mrf.mxu1  ;;  %v7720_v27 = vadd.f32 %v7640_v34, %v4122_v4  ;;  %v5607_v45 = vpop.eup %5606 }
 0x801   : > { %v4119_v21 = vmul.f32 %v5607_v45, %v7614_v23 }
 0x802   : > { %v7722_v61 = vpop.f32.mrf.mxu1  ;;  %v3780_v39 = vpop.xlane.xlu0 %3779 }
 0x803   : > { %5620 = vrcp.f32 %v3780_v39  ;;  %v3831_v28 = vpop.xlane.xlu1 %3830  ;;  %v7735_v56 = vadd.f32 %v7640_v34, %v4119_v21 }
 0x804   : > { %v5609_v58 = vpop.eup %5608  ;;  %5622 = vrcp.f32 %v3831_v28  ;;  %v7726_v2 = vpop.f32.mrf.mxu1 }
 0x805   : > { %v5611_v47 = vpop.eup %5610  ;;  %v4133_v53 = vmul.f32 %v5609_v58, %v5090_v26 }
 0x806   : > { %v7729_v19 = vpop.f32.mrf.mxu1  ;;  %v4120_v36 = vmul.f32 %v5611_v47, %v7616_v46 }
 0x807   : > { %v3783_v41 = vpop.xlane.xlu1 %3782  ;;  %v7745_v28 = vadd.f32 %v7640_v34, %v4133_v53 }
 0x808   : > { %v5613_v52 = vpop.eup %5612  ;;  %5624 = vrcp.f32 %v3783_v41  ;;  %v7732_v60 = vpop.f32.mrf.mxu1  ;;  %v7738_v42 = vadd.f32 %v7640_v34, %v4120_v36 }
 0x809   : > { %v5615_v4 = vpop.eup %5614  ;;  %v4117_v21 = vmul.f32 %v5613_v52, %v7610_v43  ;;  %5626 = vrcp.f32 %v7678_v18 }
 0x80a   : > { %v7740_v9 = vpop.f32.mrf.mxu1  ;;  %v4134_v45 = vmul.f32 %v5615_v4, %v5093_v63  ;;  %5628 = vrcp.f32 %v7674_v13 }
 0x80b   : > { %v7755_v63 = vadd.f32 %v7640_v34, %v4117_v21  ;;  %5630 = vrcp.f32 %v7664_v38 }
 0x80c   : > { %v5617_v46 = vpop.eup %5616  ;;  %v5110_v39 = vpop.f32.mrf.mxu1  ;;  %v7748_v47 = vadd.f32 %v7640_v34, %v4134_v45  ;;  %5632 = vrcp.f32 %v7682_v14 }
 0x80d   : > { %v5619_v36 = vpop.eup %5618  ;;  %v4131_v4 = vmul.f32 %v5617_v46, %v7690_v40  ;;  %5634 = vrcp.f32 %v7666_v7 }
 0x80e   : > { %v5112_v41 = vpop.f32.mrf.mxu1  ;;  %v4118_v58 = vmul.f32 %v5619_v36, %v7612_v24  ;;  %5636 = vrcp.f32 %v7658_v1 }
 0x80f   : > { %v7765_v24 = vadd.f32 %v7640_v34, %v4131_v4  ;;  %5638 = vrcp.f32 %v7660_v29 }
 0x810   : > { %v5621_v6 = vpop.eup %5620  ;;  %v5113_v23 = vpop.f32.mrf.mxu1  ;;  %v7758_v53 = vadd.f32 %v7640_v34, %v4118_v58  ;;  %5640 = vrcp.f32 %v7650_v20 }
 0x811   : > { %v5623_v45 = vpop.eup %5622  ;;  %v4115_v21 = vmul.f32 %v5621_v6, %v7606_v54  ;;  %5642 = vrcp.f32 %v7680_v32  ;;  %v5114_v20 = vadd.f32 %v5113_v23, %v5112_v41 }
 0x812   : > { %v5115_v37 = vpop.f32.mrf.mxu1  ;;  %v4132_v52 = vmul.f32 %v5623_v45, %v7696_v10  ;;  %5644 = vrcp.f32 %v7694_v0 }
 0x813   : > { %v7778_v4 = vadd.f32 %v7640_v34, %v4115_v21  ;;  %5646 = vrcp.f32 %v7700_v17 }
 0x814   : > { %v5116_v26 = vpop.f32.mrf.mxu1  ;;  %v7768_v36 = vadd.f32 %v7640_v34, %v4132_v52  ;;  %5648 = vrcp.f32 %v7698_v35 }
 0x815   : > { %v5625_v58 = vpop.eup %5624  ;;  %v5117_v18 = vadd.f32 %v5116_v26, %v5115_v37  ;;  %v5108_v26 = vadd.f32 %v7732_v60, %v7729_v19  ;;  %v5102_v19 = vadd.f32 %v7714_v59, %v7711_v51  ;;  %v5096_v59 = vadd.f32 %v7704_v11, %v7702_v57 }
 0x816   : > { %v5118_v40 = vpop.f32.mrf.mxu1  ;;  %v4116_v43 = vmul.f32 %v5625_v58, %v7608_v12  ;;  %v5627_v52 = vpop.eup %5626  ;;  %v8064_v57 = vpack.c.bf16 %v7646_v3, %v7643_v5  ;;  %v8068_v5 = vpack.c.bf16 %v7758_v53, %v7755_v63  ;;  %v4185_v3 = vld [vmem:[%s7630_s28 + $0x10] sm:$0xff]  ;;  %v4187_v53 = vld [vmem:[%s7630_s28 + $0x20] sm:$0xff] }
 0x817   : > { %v5629_v58 = vpop.eup %5628  ;;  %v5259_v63 = vld [vmem:[%s7913_s5 + $0x30] sm:$0xff]  }
 0x818   : > { %v5119_v10 = vpop.f32.mrf.mxu1  ;;  %v7781_v45 = vadd.f32 %v7640_v34, %v4116_v43  ;;  %v5631_v1 = vpop.eup %5630 }
 0x819   : > { %v5120_v21 = vadd.f32 %v5119_v10, %v5118_v40  ;;  %v5633_v55 = vpop.eup %5632 }
 0x81a   : > { %v5121_v54 = vpop.f32.mrf.mxu1 }
 0x81c   : > { %v5122_v12 = vpop.f32.mrf.mxu1 }
 0x81d   : > { %v5123_v6 = vadd.f32 %v5122_v12, %v5121_v54  ;;  %v4143_v54 = vmul.f32 %v5631_v1, %v5120_v21  ;;  %v5635_v12 = vpop.eup %5634  ;;  %v8062_v21 = vpack.c.bf16 %v7672_v22, %v7669_v25 }
 0x81e   : > { %v5124_v13 = vpop.f32.mrf.mxu1  ;;  %v4142_v0 = vmul.f32 %v5635_v12, %v5117_v18  ;;  %v5637_v37 = vpop.eup %5636 }
 0x81f   : > { %v4144_v46 = vmul.f32 %v5627_v52, %v5123_v6  ;;  %v4179_v35 = vadd.f32 %v7640_v34, %v4143_v54  ;;  %v5639_v41 = vpop.eup %5638  ;;  %v8067_v54 = vpack.c.bf16 %v7748_v47, %v7745_v28  ;;  %v8070_v28 = vpack.c.bf16 %v7781_v45, %v7778_v4  ;;  %v5261_v4 = vld [vmem:[%s7913_s5 + $0x20] sm:$0xff]   ;;  %v5262_v45 = vld [vmem:[%s7913_s5 + $0x18] sm:$0xff]  }
 0x820   : > { %v5125_v38 = vpop.f32.mrf.mxu1 }
 0x821   : > { %v5126_v43 = vadd.f32 %v5125_v38, %v5124_v13  ;;  %v5111_v13 = vadd.f32 %v5110_v39, %v7740_v9  ;;  %v4180_v40 = vadd.f32 %v7640_v34, %v4144_v46  ;;  %v4141_v38 = vmul.f32 %v5637_v37, %v5114_v20  ;;  %v5641_v46 = vpop.eup %5640 }
 0x822   : > { %v5127_v14 = vpop.f32.mrf.mxu1  ;;  %v4178_v9 = vadd.f32 %v7640_v34, %v4142_v0  ;;  %v5643_v18 = vpop.eup %5642  ;;  %v4139_v60 = vmul.f32 %v5641_v46, %v5108_v26  ;;  %v8066_v20 = vpack.c.bf16 %v7738_v42, %v7735_v56  ;;  %v5258_v56 = vld [vmem:[%s7913_s5 + $0x38] sm:$0xff]   ;;  %v5264_v0 = vld [vmem:[%s7913_s5 + $0x8] sm:$0xff]  }
 0x823   : > { %v4145_v29 = vmul.f32 %v5629_v58, %v5126_v43  ;;  %v4209_v39 = vpack.c.bf16 %v4180_v40, %v4179_v35  ;;  %v4177_v6 = vadd.f32 %v7640_v34, %v4141_v38  ;;  %v5645_v43 = vpop.eup %5644  ;;  %v4137_v31 = vmul.f32 %v5643_v18, %v5102_v19  ;;  %v5265_v40 = vld [vmem:[%s7913_s5] sm:$0xff]  }
 0x824   : > { %v5128_v7 = vpop.f32.mrf.mxu1  ;;  %v4280_v19 = vsub.s32 2, %v8061_v30 }
 0x825   : > { %v5129_v15 = vadd.f32 %v5128_v7, %v5127_v14  ;;  %v4181_v17 = vadd.f32 %v7640_v34, %v4145_v29  ;;  %v4208_v52 = vpack.c.bf16 %v4178_v9, %v4177_v6  ;;  %v8063_v29 = vpack.c.bf16 %v7656_v50, %v7653_v62 }
 0x826   : > { %v4173_v22 = vadd.f32 %v7640_v34, %v4137_v31  ;;  %v8065_v50 = vpack.c.bf16 %v7720_v27, %v7717_v49  ;;  %v8069_v49 = vpack.c.bf16 %v7768_v36, %v7765_v24  ;;  %v4188_v27 = vld [vmem:[%s7630_s28 + $0x28] sm:$0xff]  ;;  %v4189_v24 = vld [vmem:[%s7630_s28 + $0x30] sm:$0xff]  ;;  %v4281_v6 = vrot.slane %v7637_v16, %v4280_v19 }
 0x827   : > { %v4146_v32 = vmul.f32 %v5633_v55, %v5129_v15  ;;  %v5105_v15 = vadd.f32 %v7726_v2, %v7722_v61  ;;  %v4140_v55 = vmul.f32 %v5639_v41, %v5111_v13  ;;  %v5647_v61 = vpop.eup %5646  ;;  %v5260_v36 = vld [vmem:[%s7913_s5 + $0x28] sm:$0xff]   ;;  %v4193_v12 = vpack.c.bf16 %v4189_v24, %v4187_v53  ;;  %v5263_v13 = vld [vmem:[%s7913_s5 + $0x10] sm:$0xff]  }
 0x828   : > { %v5649_v51 = vpop.eup %5648  ;;  %v4136_v58 = vmul.f32 %v5647_v61, %v5099_v48 }
 0x829   : > { %v4182_v10 = vadd.f32 %v7640_v34, %v4146_v32  ;;  %v4138_v2 = vmul.f32 %v5645_v43, %v5105_v15  ;;  %v4176_v14 = vadd.f32 %v7640_v34, %v4140_v55  ;;  %v4135_v25 = vmul.f32 %v5649_v51, %v5096_v59  ;;  %v4190_v32 = vld [vmem:[%s7630_s28 + $0x38] sm:$0xff] }
 0x82a   : > { %v4172_v44 = vadd.f32 %v7640_v34, %v4136_v58  ;;  %v4194_v47 = vpack.c.bf16 %v4190_v32, %v4188_v27 }
 0x82b   : > { %v4210_v23 = vpack.c.bf16 %v4182_v10, %v4181_v17  ;;  %v4174_v7 = vadd.f32 %v7640_v34, %v4138_v2  ;;  %v4171_v11 = vadd.f32 %v7640_v34, %v4135_v25 }
 0x82d   : > { %5130 = vmatprep.subr.bf16.mxu0 %v4210_v23  ;;  %v4206_v8 = vpack.c.bf16 %v4174_v7, %v4173_v22  ;;  %v4205_v62 = vpack.c.bf16 %v4172_v44, %v4171_v11 }
 0x82e   : > { %5131 = vmatpush3.bf16.msra.mxu0 %v4202_v33  ;;  %v4175_v33 = vadd.f32 %v7640_v34, %v4139_v60  ;;  %v4183_v34 = vld [vmem:[%s7630_s28] sm:$0xff] }
 0x82f   : > { %5132 = vmatprep.subr.bf16.mxu0 %v4209_v39  ;;  %v4191_v42 = vpack.c.bf16 %v4185_v3, %v4183_v34 }
 0x830   : > { %v4207_v1 = vpack.c.bf16 %v4176_v14, %v4175_v33 }
 0x832   : > { %5133 = vmatpush3.bf16.msra.mxu0 %v8062_v21 }
 0x833   : > { %5134 = vmatprep.subr.bf16.mxu0 %v4208_v52 }
 0x836   : > { %5135 = vmatpush3.bf16.msra.mxu0 %v8063_v29 }
 0x837   : > { %5136 = vmatprep.subr.bf16.mxu0 %v4207_v1 }
 0x83a   : > { %5137 = vmatpush3.bf16.msra.mxu0 %v8064_v57 }
 0x83b   : > { %5138 = vmatprep.subr.bf16.mxu0 %v4206_v8 }
 0x83e   : > { %5139 = vmatpush3.bf16.msra.mxu0 %v8065_v50 }
 0x83f   : > { %5140 = vmatprep.subr.bf16.mxu0 %v4205_v62 }
 0x842   : > { %5141 = vmatpush3.bf16.msra.mxu0 %v8066_v20 }
 0x843   : > { %5142 = vmatprep.subr.bf16.mxu0 %v8067_v54 }
 0x846   : > { %5143 = vmatpush3.bf16.msra.mxu0 %v8068_v5 }
 0x847   : > { %5144 = vmatprep.subr.bf16.mxu0 %v8069_v49 }
 0x84a   : > { %5145 = vmatpush3.bf16.msra.mxu0 %v8070_v28 }
 0x84b   : > { %5168 = vmatprep.subr.bf16.mxu0 %v5258_v56 }
 0x84d   : > { %4244 = vmatmul.mubr.bf16.vlgmr.msra.gmra.mxu0 %v4191_v42 }
 0x84e   : > { %4251 = vmatprep.mubr.bf16.mxu0 %v4194_v47  ;;  %5169 = vmatpush3.bf16.msra.mxu0 %v5258_v56 }
 0x84f   : > { %5170 = vmatprep.subr.bf16.mxu0 %v5259_v63 }
 0x852   : > { %5171 = vmatpush3.bf16.msra.mxu0 %v5259_v63 }
 0x853   : > { %5172 = vmatprep.subr.bf16.mxu0 %v5260_v36 }
 0x855   : > { %4252 = vmatmul.mubr.bf16.gmra.mxu0 %v4193_v12 }
 0x856   : > { %5173 = vmatpush3.bf16.msra.mxu0 %v5260_v36 }
 0x857   : > { %5174 = vmatprep.subr.bf16.mxu0 %v5261_v4 }
 0x85a   : > { %5175 = vmatpush3.bf16.msra.mxu0 %v5261_v4 }
 0x85b   : > { %5176 = vmatprep.subr.bf16.mxu0 %v5262_v45 }
 0x85e   : > { %5177 = vmatpush3.bf16.msra.mxu0 %v5262_v45 }
 0x85f   : > { %5178 = vmatprep.subr.bf16.mxu0 %v5263_v13 }
 0x862   : > { %5179 = vmatpush3.bf16.msra.mxu0 %v5263_v13 }
 0x863   : > { %5180 = vmatprep.subr.bf16.mxu0 %v5264_v0 }
 0x866   : > { %5181 = vmatpush3.bf16.msra.mxu0 %v5264_v0 }
 0x867   : > { %5182 = vmatprep.subr.bf16.mxu0 %v5265_v40 }
 0x86a   : > { %5183 = vmatpush3.bf16.msra.mxu0 %v5265_v40 }
 0x90d   : > { %v5146_v17 = vpop.f32.mrf.mxu0 }
 0x90f   : > { %v5147_v10 = vpop.f32.mrf.mxu0 }
 0x910   : > { %v5148_v38 = vadd.f32 %v5147_v10, %v5146_v17 }
 0x911   : > { %v5149_v37 = vpop.f32.mrf.mxu0 }
 0x913   : > { %v5150_v26 = vpop.f32.mrf.mxu0 }
 0x914   : > { %v5151_v35 = vadd.f32 %v5150_v26, %v5149_v37 }
 0x915   : > { %v5152_v23 = vpop.f32.mrf.mxu0 }
 0x916   : > { %v4260_v41 = vpack.c.bf16 %v5151_v35, %v5148_v38 }
 0x917   : > { %v5153_v15 = vpop.f32.mrf.mxu0 }
 0x918   : > { %5184 = vmatprep.mubr.bf16.mxu0 %v4260_v41  ;;  %v5154_v39 = vadd.f32 %v5153_v15, %v5152_v23 }
 0x919   : > { %v5155_v55 = vpop.f32.mrf.mxu0 }
 0x91b   : > { %v5156_v9 = vpop.f32.mrf.mxu0 }
 0x91c   : > { %v5157_v46 = vadd.f32 %v5156_v9, %v5155_v55 }
 0x91e   : > { %v4261_v18 = vpack.c.bf16 %v5157_v46, %v5154_v39 }
 0x920   : > { %5185 = vmatmul.mubr.bf16.vlgmr.msra.gmra.mxu0 %v4261_v18 }
 0x9e0   : > { %v5186_v60 = vpop.f32.mrf.mxu0 }
 0x9e1   : > { %v4373_v14 = vadd.f32 %v5186_v60, %v4281_v6 }
 0x9e2   : > { %v4364_v43 = vpop.f32.mrf.mxu0 }
 0x9e3   : > { %v4365_v61 = vadd.f32 %v4364_v43, %v4281_v6  ;;  %v4385_v51 = vsel %vm857_vm4, %v4373_v14, -inf }
 0x9e4   : > { %v5187_v2 = vpop.f32.mrf.mxu0 }
 0x9e5   : > { %v4379_v52 = vsel %vm857_vm4, %v4365_v61, -inf  ;;  %v4376_v31 = vadd.f32 %v5187_v2, %v4281_v6 }
 0x9e6   : > { %v4367_v21 = vpop.f32.mrf.mxu0  ;;  %4380 = vmax.xlane.f32.xlu0 %v4379_v52 }
 0x9e7   : > { %v4368_v48 = vadd.f32 %v4367_v21, %v4281_v6  ;;  %v4388_v30 = vsel %vm857_vm4, %v4376_v31, -inf }
 0x9e9   : > { %v4382_v33 = vsel %vm857_vm4, %v4368_v48, -inf }
 0x9ea   : > { %4383 = vmax.xlane.f32.xlu1 %v4382_v33  ;;  %4386 = vmax.xlane.f32.xlu0 %v4385_v51 }
 0x9ee   : > { %4389 = vmax.xlane.f32.xlu1 %v4388_v30 }
 0xa6f   : > { %v4381_v16 = vpop.xlane.xlu0 %4380 }
 0xa70   : > { %v4391_v59 = vsub.f32 %v4365_v61, %v4381_v16 }
 0xa72   : > { %v4395_v58 = vmul.f32 1.442695, %v4391_v59 }
 0xa73   : > { %v4384_v7 = vpop.xlane.xlu1 %4383  ;;  %v4387_v1 = vpop.xlane.xlu0 %4386 }
 0xa74   : > { %5650 = vpow2.f32 %v4395_v58  ;;  %v4392_v29 = vsub.f32 %v4368_v48, %v4384_v7  ;;  %v4393_v25 = vsub.f32 %v4373_v14, %v4387_v1 }
 0xa76   : > { %v4397_v22 = vmul.f32 1.442695, %v4392_v29  ;;  %v4399_v44 = vmul.f32 1.442695, %v4393_v25 }
 0xa77   : > { %v4390_v8 = vpop.xlane.xlu1 %4389 }
 0xa78   : > { %5652 = vpow2.f32 %v4397_v22  ;;  %v4394_v57 = vsub.f32 %v4376_v31, %v4390_v8 }
 0xa79   : > { %5654 = vpow2.f32 %v4399_v44 }
 0xa7a   : > { %v4401_v11 = vmul.f32 1.442695, %v4394_v57 }
 0xa7c   : > { %5656 = vpow2.f32 %v4401_v11 }
 0xa81   : > { %v5651_v62 = vpop.eup %5650 }
 0xa82   : > { %v4403_v50 = vsel %vm857_vm4, %v5651_v62, 0.0 }
 0xa83   : > { %4404 = vadd.xlane.f32.xlu0 %v4403_v50 }
 0xa85   : > { %v5653_v20 = vpop.eup %5652 }
 0xa86   : > { %v5655_v54 = vpop.eup %5654  ;;  %v4406_v5 = vsel %vm857_vm4, %v5653_v20, 0.0 }
 0xa87   : > { %4407 = vadd.xlane.f32.xlu1 %v4406_v5  ;;  %v4409_v34 = vsel %vm857_vm4, %v5655_v54, 0.0 }
 0xa88   : > { %4410 = vadd.xlane.f32.xlu0 %v4409_v34 }
 0xa89   : > { %v5657_v3 = vpop.eup %5656 }
 0xa8a   : > { %v4412_v49 = vsel %vm857_vm4, %v5657_v3, 0.0 }
 0xa8b   : > { %4413 = vadd.xlane.f32.xlu1 %v4412_v49 }
 0xb0c   : > { %v4405_v27 = vpop.xlane.xlu0 %4404 }
 0xb0d   : > { %5658 = vlog2.f32 %v4405_v27 }
 0xb10   : > { %v4408_v32 = vpop.xlane.xlu1 %4407 }
 0xb11   : > { %5660 = vlog2.f32 %v4408_v32  ;;  %v4411_v56 = vpop.xlane.xlu0 %4410 }
 0xb12   : > { %5662 = vlog2.f32 %v4411_v56 }
 0xb14   : > { %v4414_v42 = vpop.xlane.xlu1 %4413 }
 0xb15   : > { %5664 = vlog2.f32 %v4414_v42 }
 0xb1a   : > { %v5659_v28 = vpop.eup %5658 }
 0xb1b   : > { %v4416_v47 = vmul.f32 0.6931472, %v5659_v28 }
 0xb1d   : > { %v4423_v63 = vsub.f32 %v4391_v59, %v4416_v47 }
 0xb1e   : > { %v5661_v53 = vpop.eup %5660 }
 0xb1f   : > { %v5663_v24 = vpop.eup %5662  ;;  %4427 = vst.msk [vmem:[%s347_s22] sm:$0xff] %vm857_vm4, %v4423_v63  ;;  %v4418_v36 = vmul.f32 0.6931472, %v5661_v53 }
 0xb20   : > { %v4420_v12 = vmul.f32 0.6931472, %v5663_v24 }
 0xb21   : > { %v4424_v4 = vsub.f32 %v4392_v29, %v4418_v36 }
 0xb22   : > { %v5665_v45 = vpop.eup %5664  ;;  %v4425_v13 = vsub.f32 %v4393_v25, %v4420_v12 }
 0xb23   : > { %4428 = vst.msk [vmem:[%s347_s22 + $0x8] sm:$0xff] %vm857_vm4, %v4424_v4  ;;  %v4422_v0 = vmul.f32 0.6931472, %v5665_v45 }
 0xb24   : > { %4429 = vst.msk [vmem:[%s347_s22 + $0x10] sm:$0xff] %vm857_vm4, %v4425_v13 }
 0xb25   : > { %v4426_v40 = vsub.f32 %v4394_v57, %v4422_v0 }
 0xb27   : > { %4430 = vst.msk [vmem:[%s347_s22 + $0x18] sm:$0xff] %vm857_vm4, %v4426_v40 }
 0xb28 PF: > { %p17_p1 = scmp.ge.s32.totalorder %s5798_s29, 4   ;;  %s8071_s24 = smov %s5721_s25 }
 0xb29   : > { %s8072_s25 = smov %s5725_s26  ;;  %s8073_s26 = smov %s5808_s9 }
 0xb2a   : > { %s8074_s27 = smov %s5798_s29  ;;  %19 = sbr.rel (!%p17_p1) target bundleno = 3 (0x3), region = 94 }
 0xb2f   :  { %4453 = vsyncpa [#allocation3], 1 }
 0xb30   :  { %4455 = vsyncpa [#allocation3 + $0x1], 1 }

</bundles_post_ra>
